<compile_context>
chip_gen: v5e
topology: v5e:2x2
jax: 0.10.0
libtpu: 0.0.40
codegen_flags: <defaults>
</compile_context>

<pallas_src>
import functools

import jax
import jax.numpy as jnp
from jax.experimental import pallas as pl
from jax.experimental.pallas import tpu as pltpu

N_COMPONENTS = 32
H1, H2, H3, OUT = 250, 500, 1000, 784          # logical (PyTorch) dims
H1P, H2P, H3P, OUTP = 256, 512, 1024, 896       # lane-padded dims
MAX_TILE_B = 256                                # batch rows per grid step


def _round_up(x, m):
    return (x + m - 1) // m * m


def _pad2(a, rows, cols):
    return jnp.pad(a, ((0, rows - a.shape[0]), (0, cols - a.shape[1])))


def _decoder_kernel(x_ref, w1_ref, b1_ref, w2_ref, b2_ref,
                    w3_ref, b3_ref, w4_ref, b4_ref, o_ref):
    # x_ref: [tile_b, 32] f32; weights: bf16 [in_pad, out_pad]; biases: f32 [1, out_pad]
    y = x_ref[...]
    y = jnp.dot(y.astype(jnp.bfloat16), w1_ref[...],
                preferred_element_type=jnp.float32) + b1_ref[...]
    y = jnp.maximum(y, 0.0)
    y = jnp.dot(y.astype(jnp.bfloat16), w2_ref[...],
                preferred_element_type=jnp.float32) + b2_ref[...]
    y = jnp.maximum(y, 0.0)
    y = jnp.dot(y.astype(jnp.bfloat16), w3_ref[...],
                preferred_element_type=jnp.float32) + b3_ref[...]
    y = jnp.maximum(y, 0.0)
    y = jnp.dot(y.astype(jnp.bfloat16), w4_ref[...],
                preferred_element_type=jnp.float32) + b4_ref[...]
    o_ref[...] = y.astype(o_ref.dtype)


def decoder_forward(x, params):
    """x: [B, n_components] float32 -> [B, 1, 28, 28] float32.

    params: list of 4 (w [in,out] f32, b [out] f32) pairs (unpadded, [in,out]
    layout = transpose of nn.Linear's [out,in]).
    """
    (w1, b1), (w2, b2), (w3, b3), (w4, b4) = params

    # Pad to lane-aligned dims; weights -> bf16, biases stay f32 as [1, out_pad].
    pads = [(N_COMPONENTS, H1P), (H1P, H2P), (H2P, H3P), (H3P, OUTP)]
    kparams = []
    for (w, b), (rin, cout) in zip(params, pads):
        wp = _pad2(w, rin, cout).astype(jnp.bfloat16)
        bp = jnp.pad(b, (0, cout - b.shape[0])).reshape(1, cout).astype(jnp.float32)
        kparams.append((wp, bp))
    (w1p, b1p), (w2p, b2p), (w3p, b3p), (w4p, b4p) = kparams

    B = x.shape[0]
    tile_b = min(MAX_TILE_B, _round_up(B, 8))
    b_pad = _round_up(B, tile_b)
    x_p = jnp.pad(x, ((0, b_pad - B), (0, 0))).astype(jnp.float32)
    grid = (b_pad // tile_b,)

    def const_spec(shape):
        # Full-array block; never changes across grid steps -> DMA'd once,
        # resident in VMEM for the whole call.
        return pl.BlockSpec(shape, lambda i: (0, 0))

    flops = 2 * b_pad * (N_COMPONENTS * H1P + H1P * H2P + H2P * H3P + H3P * OUTP)
    bytes_accessed = (
        sum(int(w.size) * 2 + int(b.size) * 4 for w, b in kparams)  # bf16 W + f32 b
        + int(x_p.size) * 4                                         # activations in
        + b_pad * OUTP * 4                                          # activations out
    )

    y = pl.pallas_call(
        _decoder_kernel,
        out_shape=jax.ShapeDtypeStruct((b_pad, OUTP), jnp.float32),
        grid=grid,
        in_specs=[
            pl.BlockSpec((tile_b, N_COMPONENTS), lambda i: (i, 0)),
            const_spec(w1p.shape), const_spec(b1p.shape),
            const_spec(w2p.shape), const_spec(b2p.shape),
            const_spec(w3p.shape), const_spec(b3p.shape),
            const_spec(w4p.shape), const_spec(b4p.shape),
        ],
        out_specs=pl.BlockSpec((tile_b, OUTP), lambda i: (i, 0)),
        compiler_params=pltpu.CompilerParams(
            dimension_semantics=("parallel",),   # megacore on v7x; no-op on v5e/v6e
            vmem_limit_bytes=24 << 20,           # ~2x actual working set, << 64 MiB
        ),
        cost_estimate=pl.CostEstimate(
            flops=flops, transcendentals=0, bytes_accessed=bytes_accessed),
    )(x_p, w1p, b1p, w2p, b2p, w3p, b3p, w4p, b4p)

    return y[:B, :OUT].reshape(-1, 1, 28, 28)


def init_params(key, n_components=N_COMPONENTS):
    """PyTorch-style uniform(+/- 1/sqrt(fan_in)) init.

    Weights are stored as [in, out] (transpose of nn.Linear), biases as [out].
    """
    dims = [(n_components, H1), (H1, H2), (H2, H3), (H3, OUT)]
    params = []
    for fan_in, fan_out in dims:
        key, kw, kb = jax.random.split(key, 3)
        bound = 1.0 / jnp.sqrt(jnp.float32(fan_in))
        w = jax.random.uniform(kw, (fan_in, fan_out), jnp.float32, -bound, bound)
        b = jax.random.uniform(kb, (fan_out,), jnp.float32, -bound, bound)
        params.append((w, b))
    return params


def decoder_reference(x, params):
    """Plain-JAX reference using the same bf16-quantized weights (f32 compute)."""
    y = x
    for i, (w, b) in enumerate(params):
        wq = w.astype(jnp.bfloat16).astype(jnp.float32)
        y = y @ wq + b
        if i < 3:
            y = jnp.maximum(y, 0.0)
    return y.reshape(-1, 1, 28, 28)


if __name__ == "__main__":
    key = jax.random.PRNGKey(0)
    key, kx = jax.random.split(key)

    B = 8  # NOTE: tiny batch is HBM-weight-bandwidth bound; B>=256/tile amortizes weights.
    x = jax.random.normal(kx, (B, N_COMPONENTS), jnp.float32)
    params = init_params(key)

    out = decoder_forward(x, params)
    out = jax.block_until_ready(out)

    ref = decoder_reference(x, params)
    assert out.shape == (B, 1, 28, 28), out.shape
    # bf16 weights + bf16 activation inputs to the MXU -> looser tolerance.
    assert jnp.allclose(out, ref, atol=3e-2, rtol=3e-2), (
        "mismatch vs reference, max abs diff = %f" % float(jnp.max(jnp.abs(out - ref))))

    print("KERNEL_OK")
</pallas_src>

<mosaic_0001>
module attributes {stable_mosaic.version = 11 : i64} {
  func.func @_decoder_kernel(%arg0: i32, %arg1: memref<8x32xf32, #tpu.memory_space<vmem>>, %arg2: memref<32x256xbf16, #tpu.memory_space<vmem>>, %arg3: memref<1x256xf32, #tpu.memory_space<vmem>>, %arg4: memref<256x512xbf16, #tpu.memory_space<vmem>>, %arg5: memref<1x512xf32, #tpu.memory_space<vmem>>, %arg6: memref<512x1024xbf16, #tpu.memory_space<vmem>>, %arg7: memref<1x1024xf32, #tpu.memory_space<vmem>>, %arg8: memref<1024x896xbf16, #tpu.memory_space<vmem>>, %arg9: memref<1x896xf32, #tpu.memory_space<vmem>>, %arg10: memref<8x896xf32, #tpu.memory_space<vmem>>) attributes {dimension_semantics = [#tpu.dimension_semantics<parallel>], iteration_bounds = array<i64: 1>, scalar_prefetch = 0 : i64, scratch_operands = 0 : i64, tpu.core_type = #tpu.core_type<tc>, window_params = [{transform_indices = @transform_0, window_bounds = array<i64: 8, 32>}, {pipeline_mode = #tpu.pipeline_mode<synchronous>, transform_indices = @transform_1, window_bounds = array<i64: 32, 256>}, {pipeline_mode = #tpu.pipeline_mode<synchronous>, transform_indices = @transform_2, window_bounds = array<i64: 1, 256>}, {pipeline_mode = #tpu.pipeline_mode<synchronous>, transform_indices = @transform_3, window_bounds = array<i64: 256, 512>}, {pipeline_mode = #tpu.pipeline_mode<synchronous>, transform_indices = @transform_4, window_bounds = array<i64: 1, 512>}, {pipeline_mode = #tpu.pipeline_mode<synchronous>, transform_indices = @transform_5, window_bounds = array<i64: 512, 1024>}, {pipeline_mode = #tpu.pipeline_mode<synchronous>, transform_indices = @transform_6, window_bounds = array<i64: 1, 1024>}, {pipeline_mode = #tpu.pipeline_mode<synchronous>, transform_indices = @transform_7, window_bounds = array<i64: 1024, 896>}, {pipeline_mode = #tpu.pipeline_mode<synchronous>, transform_indices = @transform_8, window_bounds = array<i64: 1, 896>}, {transform_indices = @transform_9, window_bounds = array<i64: 8, 896>}]} {
    %c0 = arith.constant 0 : index
    %c0_0 = arith.constant 0 : index
    %0 = vector.load %arg1[%c0, %c0_0] : memref<8x32xf32, #tpu.memory_space<vmem>>, vector<8x32xf32>
    %1 = arith.truncf %0 : vector<8x32xf32> to vector<8x32xbf16>
    %c0_1 = arith.constant 0 : index
    %c0_2 = arith.constant 0 : index
    %2 = vector.load %arg2[%c0_1, %c0_2] : memref<32x256xbf16, #tpu.memory_space<vmem>>, vector<32x256xbf16>
    %cst = arith.constant dense<0.000000e+00> : vector<8x256xf32>
    %3 = tpu.matmul %1, %2, %cst {dimension_numbers = #tpu.dot_dimension_numbers<[1], [0], [0], [1], [0, 0, 1, 1], [], []>} : vector<8x32xbf16>, vector<32x256xbf16>, vector<8x256xf32> -> vector<8x256xf32>
    %c0_3 = arith.constant 0 : index
    %c0_4 = arith.constant 0 : index
    %4 = vector.load %arg3[%c0_3, %c0_4] : memref<1x256xf32, #tpu.memory_space<vmem>>, vector<1x256xf32>
    %5 = vector.broadcast %4 : vector<1x256xf32> to vector<8x256xf32>
    %6 = arith.addf %3, %5 : vector<8x256xf32>
    %cst_5 = arith.constant 0.000000e+00 : f32
    %7 = vector.broadcast %cst_5 : f32 to vector<8x256xf32>
    %8 = arith.maximumf %6, %7 : vector<8x256xf32>
    %9 = arith.truncf %8 : vector<8x256xf32> to vector<8x256xbf16>
    %c0_6 = arith.constant 0 : index
    %c0_7 = arith.constant 0 : index
    %10 = vector.load %arg4[%c0_6, %c0_7] : memref<256x512xbf16, #tpu.memory_space<vmem>>, vector<256x512xbf16>
    %cst_8 = arith.constant dense<0.000000e+00> : vector<8x512xf32>
    %11 = tpu.matmul %9, %10, %cst_8 {dimension_numbers = #tpu.dot_dimension_numbers<[1], [0], [0], [1], [0, 0, 1, 1], [], []>} : vector<8x256xbf16>, vector<256x512xbf16>, vector<8x512xf32> -> vector<8x512xf32>
    %c0_9 = arith.constant 0 : index
    %c0_10 = arith.constant 0 : index
    %12 = vector.load %arg5[%c0_9, %c0_10] : memref<1x512xf32, #tpu.memory_space<vmem>>, vector<1x512xf32>
    %13 = vector.broadcast %12 : vector<1x512xf32> to vector<8x512xf32>
    %14 = arith.addf %11, %13 : vector<8x512xf32>
    %cst_11 = arith.constant 0.000000e+00 : f32
    %15 = vector.broadcast %cst_11 : f32 to vector<8x512xf32>
    %16 = arith.maximumf %14, %15 : vector<8x512xf32>
    %17 = arith.truncf %16 : vector<8x512xf32> to vector<8x512xbf16>
    %c0_12 = arith.constant 0 : index
    %c0_13 = arith.constant 0 : index
    %18 = vector.load %arg6[%c0_12, %c0_13] : memref<512x1024xbf16, #tpu.memory_space<vmem>>, vector<512x1024xbf16>
    %cst_14 = arith.constant dense<0.000000e+00> : vector<8x1024xf32>
    %19 = tpu.matmul %17, %18, %cst_14 {dimension_numbers = #tpu.dot_dimension_numbers<[1], [0], [0], [1], [0, 0, 1, 1], [], []>} : vector<8x512xbf16>, vector<512x1024xbf16>, vector<8x1024xf32> -> vector<8x1024xf32>
    %c0_15 = arith.constant 0 : index
    %c0_16 = arith.constant 0 : index
    %20 = vector.load %arg7[%c0_15, %c0_16] : memref<1x1024xf32, #tpu.memory_space<vmem>>, vector<1x1024xf32>
    %21 = vector.broadcast %20 : vector<1x1024xf32> to vector<8x1024xf32>
    %22 = arith.addf %19, %21 : vector<8x1024xf32>
    %cst_17 = arith.constant 0.000000e+00 : f32
    %23 = vector.broadcast %cst_17 : f32 to vector<8x1024xf32>
    %24 = arith.maximumf %22, %23 : vector<8x1024xf32>
    %25 = arith.truncf %24 : vector<8x1024xf32> to vector<8x1024xbf16>
    %c0_18 = arith.constant 0 : index
    %c0_19 = arith.constant 0 : index
    %26 = vector.load %arg8[%c0_18, %c0_19] : memref<1024x896xbf16, #tpu.memory_space<vmem>>, vector<1024x896xbf16>
    %cst_20 = arith.constant dense<0.000000e+00> : vector<8x896xf32>
    %27 = tpu.matmul %25, %26, %cst_20 {dimension_numbers = #tpu.dot_dimension_numbers<[1], [0], [0], [1], [0, 0, 1, 1], [], []>} : vector<8x1024xbf16>, vector<1024x896xbf16>, vector<8x896xf32> -> vector<8x896xf32>
    %c0_21 = arith.constant 0 : index
    %c0_22 = arith.constant 0 : index
    %28 = vector.load %arg9[%c0_21, %c0_22] : memref<1x896xf32, #tpu.memory_space<vmem>>, vector<1x896xf32>
    %29 = vector.broadcast %28 : vector<1x896xf32> to vector<8x896xf32>
    %30 = arith.addf %27, %29 : vector<8x896xf32>
    %c0_23 = arith.constant 0 : index
    %c0_24 = arith.constant 0 : index
    %31 = vector.load %arg10[%c0_23, %c0_24] : memref<8x896xf32, #tpu.memory_space<vmem>>, vector<8x896xf32>
    tpu.vector_store %arg10[%c0_23, %c0_24], %30 {strides = array<i32>} : memref<8x896xf32, #tpu.memory_space<vmem>>, vector<8x896xf32>,
    return
  }
  func.func @transform_0(%arg0: i32) -> (i32, i32) {
    %c0_i32 = arith.constant 0 : i32
    %c0_i32_0 = arith.constant 0 : i32
    return %arg0, %c0_i32 : i32, i32
  }
  func.func @transform_1(%arg0: i32) -> (i32, i32) {
    %c0_i32 = arith.constant 0 : i32
    %c0_i32_0 = arith.constant 0 : i32
    %c0_i32_1 = arith.constant 0 : i32
    return %c0_i32, %c0_i32_0 : i32, i32
  }
  func.func @transform_2(%arg0: i32) -> (i32, i32) {
    %c0_i32 = arith.constant 0 : i32
    %c0_i32_0 = arith.constant 0 : i32
    %c0_i32_1 = arith.constant 0 : i32
    return %c0_i32, %c0_i32_0 : i32, i32
  }
  func.func @transform_3(%arg0: i32) -> (i32, i32) {
    %c0_i32 = arith.constant 0 : i32
    %c0_i32_0 = arith.constant 0 : i32
    %c0_i32_1 = arith.constant 0 : i32
    return %c0_i32, %c0_i32_0 : i32, i32
  }
  func.func @transform_4(%arg0: i32) -> (i32, i32) {
    %c0_i32 = arith.constant 0 : i32
    %c0_i32_0 = arith.constant 0 : i32
    %c0_i32_1 = arith.constant 0 : i32
    return %c0_i32, %c0_i32_0 : i32, i32
  }
  func.func @transform_5(%arg0: i32) -> (i32, i32) {
    %c0_i32 = arith.constant 0 : i32
    %c0_i32_0 = arith.constant 0 : i32
    %c0_i32_1 = arith.constant 0 : i32
    return %c0_i32, %c0_i32_0 : i32, i32
  }
  func.func @transform_6(%arg0: i32) -> (i32, i32) {
    %c0_i32 = arith.constant 0 : i32
    %c0_i32_0 = arith.constant 0 : i32
    %c0_i32_1 = arith.constant 0 : i32
    return %c0_i32, %c0_i32_0 : i32, i32
  }
  func.func @transform_7(%arg0: i32) -> (i32, i32) {
    %c0_i32 = arith.constant 0 : i32
    %c0_i32_0 = arith.constant 0 : i32
    %c0_i32_1 = arith.constant 0 : i32
    return %c0_i32, %c0_i32_0 : i32, i32
  }
  func.func @transform_8(%arg0: i32) -> (i32, i32) {
    %c0_i32 = arith.constant 0 : i32
    %c0_i32_0 = arith.constant 0 : i32
    %c0_i32_1 = arith.constant 0 : i32
    return %c0_i32, %c0_i32_0 : i32, i32
  }
  func.func @transform_9(%arg0: i32) -> (i32, i32) {
    %c0_i32 = arith.constant 0 : i32
    %c0_i32_0 = arith.constant 0 : i32
    return %arg0, %c0_i32 : i32, i32
  }
}

</mosaic_0001>

<bundles_post_ra>
// kernel: tpu_custom_call.1
= control target key start
LH: loop header
LB: loop body
LE: loop exit
PB: predicated region body
PF: predicated region fallthrough
CT: control target
= control target key end

     0   :  { %14 = vsyncpa [#allocation3], 0  ;;  %s10814_s0 = inlined_call_operand.hbm [shape: f32[8,32], index: 0, kind: input, shape index: {}]   ;;  %s10815_s1 = inlined_call_operand.hbm [shape: bf16[32,256], index: 1, kind: input, shape index: {}]   ;;  %s10816_s2 = inlined_call_operand.hbm [shape: f32[1,256], index: 2, kind: input, shape index: {}]   ;;  %s10817_s3 = inlined_call_operand.hbm [shape: bf16[256,512], index: 3, kind: input, shape index: {}]   ;;  %s10818_s4 = inlined_call_operand.hbm [shape: f32[1,512], index: 4, kind: input, shape index: {}]   ;;  %s10819_s5 = inlined_call_operand.hbm [shape: bf16[512,1024], index: 5, kind: input, shape index: {}]   ;;  %s10820_s6 = inlined_call_operand.hbm [shape: f32[1,1024], index: 6, kind: input, shape index: {}]   ;;  %s10821_s7 = inlined_call_operand.hbm [shape: bf16[1024,896], index: 7, kind: input, shape index: {}]   ;;  %s10822_s8 = inlined_call_operand.hbm [shape: f32[1,896], index: 8, kind: input, shape index: {}]   ;;  %s10823_s9 = inlined_call_operand.hbm [shape: f32[8,896], index: 9, kind: output, shape index: {}]  }
   0x1   :  { %15 = vsyncpa [#allocation6], 0 }
   0x2   :  { %16 = vsyncpa [#allocation9], 0 }
   0x3   :  { %17 = vsyncpa [#allocation12], 0 }
   0x4   :  { %18 = vsyncpa [#allocation15], 0  ;;  %s35_s11 = sshll.u32 %s10815_s1, 4  ;;  %s36_s11 = int_to_ptr.hbm [resolvable:$true] %s35_s11 }
   0x5   :  { %19 = vsyncpa [#allocation4], 0  ;;  %s10445_s12 = smov [#allocation5]   ;;  %s59_s16 = sshll.u32 %s10817_s3, 4  ;;  %s60_s16 = int_to_ptr.hbm [resolvable:$true] %s59_s16 }
   0x6   :  { %s37_s13 = sshll.u32 %s10445_s12, 4  ;;  %s10446_s17 = smov 128   ;;  %s38_s13 = int_to_ptr.vmem [resolvable:$true] %s37_s13 }
   0x7   :  { %s10447_s18 = smov 8   ;;  %s10448_s19 = smov [#allocation8]  }
   0x8   :  { %43 = dma.hbm_to_vmem [thread:$0]  %s36_s11, 512, %s38_s13, [#allocation6], %s10446_s17, %s10446_s17, %s10447_s18  }
   0x9   :  { %s61_s20 = sshll.u32 %s10448_s19, 4  ;;  %s10449_s21 = smov 256   ;;  %s62_s20 = int_to_ptr.vmem [resolvable:$true] %s61_s20 }
   0xa   :  { %s10450_s22 = smov 16   ;;  %s83_s24 = sshll.u32 %s10819_s5, 4  ;;  %s84_s24 = int_to_ptr.hbm [resolvable:$true] %s83_s24 }
   0xb   :  { %67 = dma.hbm_to_vmem [thread:$0]  %s60_s16, 8192, %s62_s20, [#allocation9], %s10449_s21, %s10449_s21, %s10450_s22  }
   0xc   :  { %s10451_s25 = smov [#allocation11]   ;;  %s107_s28 = sshll.u32 %s10821_s7, 4  ;;  %s108_s28 = int_to_ptr.hbm [resolvable:$true] %s107_s28 }
   0xd   :  { %s85_s26 = sshll.u32 %s10451_s25, 4  ;;  %s10452_s29 = smov 512   ;;  %s86_s26 = int_to_ptr.vmem [resolvable:$true] %s85_s26 }
   0xe   :  { %s10453_s30 = smov 32   ;;  %s10454_s10 = smov [#allocation14]  }
   0xf   :  { %91 = dma.hbm_to_vmem [thread:$0]  %s84_s24, 32768, %s86_s26, [#allocation12], %s10452_s29, %s10452_s29, %s10453_s30  }
  0x10   :  { %s109_s11 = sshll.u32 %s10454_s10, 4  ;;  %s10455_s12 = smov 448   ;;  %s110_s11 = int_to_ptr.vmem [resolvable:$true] %s109_s11 }
  0x11   :  { %s10456_s13 = smov 28   ;;  %s25_s15 = sshll.u32 %s10814_s0, 4  ;;  %s26_s15 = int_to_ptr.hbm [resolvable:$true] %s25_s15 }
  0x12   :  { %115 = dma.hbm_to_vmem [thread:$0]  %s108_s28, 57344, %s110_s11, [#allocation15], %s10455_s12, %s10455_s12, %s10456_s13  }
  0x13   :  { %s10457_s16 = smov [#allocation2]   ;;  %s49_s19 = sshll.u32 %s10816_s2, 4  ;;  %s50_s19 = int_to_ptr.hbm [resolvable:$true] %s49_s19 }
  0x14   :  { %s27_s17 = sshll.u32 %s10457_s16, 4  ;;  %s10458_s20 = smov [#allocation7]   ;;  %s28_s17 = int_to_ptr.vmem [resolvable:$true] %s27_s17 }
  0x15   :  { %30 = dma.hbm_to_vmem [thread:$0]  %s26_s15, 128, %s28_s17, [#allocation3]  }
  0x16   :  { %s51_s21 = sshll.u32 %s10458_s20, 4  ;;  %s73_s23 = sshll.u32 %s10818_s4, 4  ;;  %s52_s21 = int_to_ptr.vmem [resolvable:$true] %s51_s21  ;;  %s74_s23 = int_to_ptr.hbm [resolvable:$true] %s73_s23 }
  0x17   :  { %54 = dma.hbm_to_vmem [thread:$0]  %s50_s19, 32, %s52_s21, [#allocation6]  }
  0x18   :  { %s97_s25 = sshll.u32 %s10820_s6, 4  ;;  %s10459_s26 = smov [#allocation10]   ;;  %s98_s25 = int_to_ptr.hbm [resolvable:$true] %s97_s25 }
  0x19   :  { %s75_s27 = sshll.u32 %s10459_s26, 4  ;;  %s10460_s2 = smov [#allocation13]   ;;  %s76_s27 = int_to_ptr.vmem [resolvable:$true] %s75_s27 }
  0x1a   :  { %78 = dma.hbm_to_vmem [thread:$0]  %s74_s23, 64, %s76_s27, [#allocation9]  }
  0x1b   :  { %s99_s3 = sshll.u32 %s10460_s2, 4  ;;  %s121_s30 = sshll.u32 %s10822_s8, 4  ;;  %s100_s3 = int_to_ptr.vmem [resolvable:$true] %s99_s3  ;;  %s122_s30 = int_to_ptr.hbm [resolvable:$true] %s121_s30 }
  0x1c   :  { %102 = dma.hbm_to_vmem [thread:$0]  %s98_s25, 128, %s100_s3, [#allocation12]  }
  0x1d   :  { %s10461_s4 = smov [#allocation16]  }
  0x1e   :  { %s123_s10 = sshll.u32 %s10461_s4, 4  ;;  %s124_s10 = int_to_ptr.vmem [resolvable:$true] %s123_s10 }
  0x1f   :  { %126 = dma.hbm_to_vmem [thread:$0]  %s122_s30, 112, %s124_s10, [#allocation15]  }
  0x20   :  { %10433 = dma.done.wait [#allocation3], 128  }
  0x21   :  { %10434 = vsyncadd [#allocation3], 4294967168 }
  0x22   :  { %10435 = dma.done.wait [#allocation6], 544  }
  0x23   :  { %10436 = vsyncadd [#allocation6], 4294966752 }
  0x24   :  { %10437 = dma.done.wait [#allocation9], 8256  }
  0x25   :  { %10438 = vsyncadd [#allocation9], 4294959040 }
  0x26   :  { %10439 = dma.done.wait [#allocation12], 32896  }
  0x27   :  { %10440 = vsyncadd [#allocation12], 4294934400 }
  0x28   :  { %10441 = dma.done.wait [#allocation15], 57456  }
  0x29   :  { %10442 = vsyncadd [#allocation15], 4294909840  ;;  %v6320_v0 = vld [vmem:[#allocation5 + $0x10] sm:$0xf]  ;;  %v9403_v1 = vld [vmem:[#allocation5 + $0x14] sm:$0xf0] }
  0x2a   :  { %v9402_v2 = vld [vmem:[#allocation5 + $0x14] sm:$0xf]  ;;  %v6321_v3 = vor.u32 %v9403_v1, %v6320_v0  ;;  %v6322_v4 = vld [vmem:[#allocation5 + $0x18] sm:$0xf0]  ;;  %v6312_v5 = vld [vmem:[#allocation5] sm:$0xf] }
  0x2b   :  { %v9401_v6 = vld [vmem:[#allocation5 + $0x4] sm:$0xf0]  ;;  %v6325_v7 = vor.u32 %v9402_v2, %v6322_v4  ;;  %v9400_v8 = vld [vmem:[#allocation5 + $0x4] sm:$0xf]  ;;  %v6314_v9 = vld [vmem:[#allocation5 + $0x8] sm:$0xf0] }
  0x2c   :  { %v164_v10 = vld [vmem:[#allocation2] sm:$0xff]  ;;  %vm196_vm0 = vcmask 261120   ;;  %206 = vmatpush.bf16.msra.mxu0 %v6321_v3  ;;  %v6313_v11 = vor.u32 %v9401_v6, %v6312_v5  ;;  %v6442_v12 = vld [vmem:[#allocation8 + $0xe0] sm:$0xf]  ;;  %v9434_v13 = vld [vmem:[#allocation8 + $0xec] sm:$0xf0]  ;;  %v6317_v15 = vor.u32 %v9400_v8, %v6314_v9 }
  0x2d   :  { %v6570_v14 = vld [vmem:[#allocation8 + $0x1e0] sm:$0xf]  ;;  %219 = vmatpush.bf16.msra.mxu1 %v6325_v7  ;;  %v6443_v16 = vor.u32 %v9434_v13, %v6442_v12  ;;  %v9466_v17 = vld [vmem:[#allocation8 + $0x1ec] sm:$0xf0]  ;;  %v9432_v18 = vld [vmem:[#allocation8 + $0xe4] sm:$0xf]  ;;  %v165_v25 = vpack.c.bf16 %v164_v10, %v164_v10 }
  0x2e   :  { %v6444_v19 = vld [vmem:[#allocation8 + $0xf0] sm:$0xf0]  ;;  %v6571_v20 = vor.u32 %v9466_v17, %v6570_v14  ;;  %v9464_v22 = vld [vmem:[#allocation8 + $0x1e4] sm:$0xf]  ;;  %v6426_v24 = vld [vmem:[#allocation8 + $0xc0] sm:$0xf] }
  0x2f   :  { %v6447_v21 = vor.u32 %v9432_v18, %v6444_v19  ;;  %v6572_v23 = vld [vmem:[#allocation8 + $0x1f0] sm:$0xf0]  ;;  %624 = vmatpush.bf16.msra.mxu2 %v6443_v16  ;;  %v9430_v27 = vld [vmem:[#allocation8 + $0xcc] sm:$0xf0]  ;;  %v6554_v28 = vld [vmem:[#allocation8 + $0x1c0] sm:$0xf] }
  0x30   :  { %v6575_v26 = vor.u32 %v9464_v22, %v6572_v23  ;;  %v9462_v29 = vld [vmem:[#allocation8 + $0x1cc] sm:$0xf0]  ;;  %207 = vmatpush.bf16.msra.mxu0 %v6313_v11  ;;  %637 = vmatpush.bf16.msra.mxu3 %v6571_v20  ;;  %v6427_v30 = vor.u32 %v9430_v27, %v6426_v24  ;;  %v9428_v32 = vld [vmem:[#allocation8 + $0xc4] sm:$0xf]  ;;  %v6428_v33 = vld [vmem:[#allocation8 + $0xd0] sm:$0xf0] }
  0x31   :  { %v6555_v31 = vor.u32 %v9462_v29, %v6554_v28  ;;  %v9460_v34 = vld [vmem:[#allocation8 + $0x1c4] sm:$0xf]  ;;  %220 = vmatpush.bf16.msra.mxu1 %v6317_v15  ;;  %v6431_v35 = vor.u32 %v9428_v32, %v6428_v33  ;;  %v6556_v36 = vld [vmem:[#allocation8 + $0x1d0] sm:$0xf0]  ;;  %v6410_v37 = vld [vmem:[#allocation8 + $0xa0] sm:$0xf] }
  0x32   :  { %v9426_v38 = vld [vmem:[#allocation8 + $0xac] sm:$0xf0]  ;;  %v6559_v39 = vor.u32 %v9460_v34, %v6556_v36  ;;  %v6538_v40 = vld [vmem:[#allocation8 + $0x1a0] sm:$0xf]  ;;  %v9424_v42 = vld [vmem:[#allocation8 + $0xa4] sm:$0xf] }
  0x33   :  { %v9458_v41 = vld [vmem:[#allocation8 + $0x1ac] sm:$0xf0]  ;;  %6326 = vmatmul.msk.bf16.vlgmr.msra.gmra.mxu0 %vm196_vm0, %v165_v25  ;;  %625 = vmatpush.bf16.msra.mxu2 %v6427_v30  ;;  %v6411_v43 = vor.u32 %v9426_v38, %v6410_v37  ;;  %v6412_v44 = vld [vmem:[#allocation8 + $0xb0] sm:$0xf0]  ;;  %v9456_v45 = vld [vmem:[#allocation8 + $0x1a4] sm:$0xf] }
  0x34   :  { %650 = vmatpush.bf16.msrb.mxu0 %v6447_v21  ;;  %v6540_v46 = vld [vmem:[#allocation8 + $0x1b0] sm:$0xf0]  ;;  %6327 = vmatmul.msk.bf16.vlgmr.msra.gmra.mxu1 %vm196_vm0, %v165_v25  ;;  %v6539_v47 = vor.u32 %v9458_v41, %v6538_v40  ;;  %v6394_v48 = vld [vmem:[#allocation8 + $0x80] sm:$0xf]  ;;  %v9422_v49 = vld [vmem:[#allocation8 + $0x8c] sm:$0xf0]  ;;  %v6415_v50 = vor.u32 %v9424_v42, %v6412_v44 }
  0x35   :  { %663 = vmatpush.bf16.msrb.mxu1 %v6575_v26  ;;  %638 = vmatpush.bf16.msra.mxu3 %v6555_v31  ;;  %v6522_v51 = vld [vmem:[#allocation8 + $0x180] sm:$0xf]  ;;  %v9454_v52 = vld [vmem:[#allocation8 + $0x18c] sm:$0xf0]  ;;  %v6543_v53 = vor.u32 %v9456_v45, %v6540_v46  ;;  %v9420_v54 = vld [vmem:[#allocation8 + $0x84] sm:$0xf]  ;;  %v6395_v56 = vor.u32 %v9422_v49, %v6394_v48 }
  0x36   :  { %v6396_v55 = vld [vmem:[#allocation8 + $0x90] sm:$0xf0]  ;;  %v9452_v57 = vld [vmem:[#allocation8 + $0x184] sm:$0xf]  ;;  %v6523_v59 = vor.u32 %v9454_v52, %v6522_v51  ;;  %v6378_v60 = vld [vmem:[#allocation8 + $0x60] sm:$0xf] }
  0x37   :  { %626 = vmatpush.bf16.msra.mxu2 %v6411_v43  ;;  %v6524_v58 = vld [vmem:[#allocation8 + $0x190] sm:$0xf0]  ;;  %v9418_v61 = vld [vmem:[#allocation8 + $0x6c] sm:$0xf0]  ;;  %v6399_v62 = vor.u32 %v9420_v54, %v6396_v55  ;;  %v6506_v63 = vld [vmem:[#allocation8 + $0x160] sm:$0xf] }
  0x38   :  { %651 = vmatpush.bf16.msrb.mxu0 %v6431_v35  ;;  %v9450_v0 = vld [vmem:[#allocation8 + $0x16c] sm:$0xf0]  ;;  %v6527_v1 = vor.u32 %v9452_v57, %v6524_v58  ;;  %v9416_v2 = vld [vmem:[#allocation8 + $0x64] sm:$0xf]  ;;  %v6380_v3 = vld [vmem:[#allocation8 + $0x70] sm:$0xf0]  ;;  %v6379_v4 = vor.u32 %v9418_v61, %v6378_v60 }
  0x39   :  { %664 = vmatpush.bf16.msrb.mxu1 %v6559_v39  ;;  %639 = vmatpush.bf16.msra.mxu3 %v6539_v47  ;;  %v9448_v5 = vld [vmem:[#allocation8 + $0x164] sm:$0xf]  ;;  %v6508_v6 = vld [vmem:[#allocation8 + $0x170] sm:$0xf0]  ;;  %v6507_v7 = vor.u32 %v9450_v0, %v6506_v63  ;;  %v6362_v8 = vld [vmem:[#allocation8 + $0x40] sm:$0xf]  ;;  %v6383_v10 = vor.u32 %v9416_v2, %v6380_v3 }
  0x3a   :  { %v9414_v9 = vld [vmem:[#allocation8 + $0x4c] sm:$0xf0]  ;;  %v6490_v11 = vld [vmem:[#allocation8 + $0x140] sm:$0xf]  ;;  %v6511_v13 = vor.u32 %v9448_v5, %v6508_v6  ;;  %v9412_v14 = vld [vmem:[#allocation8 + $0x44] sm:$0xf] }
  0x3b   :  { %627 = vmatpush.bf16.msra.mxu2 %v6395_v56  ;;  %v9446_v12 = vld [vmem:[#allocation8 + $0x14c] sm:$0xf0]  ;;  %v6364_v15 = vld [vmem:[#allocation8 + $0x50] sm:$0xf0]  ;;  %v6363_v16 = vor.u32 %v9414_v9, %v6362_v8  ;;  %v9444_v17 = vld [vmem:[#allocation8 + $0x144] sm:$0xf] }
  0x3c   :  { %652 = vmatpush.bf16.msrb.mxu0 %v6415_v50  ;;  %v6492_v18 = vld [vmem:[#allocation8 + $0x150] sm:$0xf0]  ;;  %v6491_v19 = vor.u32 %v9446_v12, %v6490_v11  ;;  %v6346_v20 = vld [vmem:[#allocation8 + $0x20] sm:$0xf]  ;;  %v9410_v21 = vld [vmem:[#allocation8 + $0x2c] sm:$0xf0]  ;;  %v6367_v22 = vor.u32 %v9412_v14, %v6364_v15 }
  0x3d   :  { %665 = vmatpush.bf16.msrb.mxu1 %v6543_v53  ;;  %640 = vmatpush.bf16.msra.mxu3 %v6523_v59  ;;  %v6474_v23 = vld [vmem:[#allocation8 + $0x120] sm:$0xf]  ;;  %v9442_v24 = vld [vmem:[#allocation8 + $0x12c] sm:$0xf0]  ;;  %v6495_v25 = vor.u32 %v9444_v17, %v6492_v18  ;;  %v9408_v26 = vld [vmem:[#allocation8 + $0x24] sm:$0xf]  ;;  %v6347_v29 = vor.u32 %v9410_v21, %v6346_v20 }
  0x3e   :  { %v6348_v27 = vld [vmem:[#allocation8 + $0x30] sm:$0xf0]  ;;  %v9440_v28 = vld [vmem:[#allocation8 + $0x124] sm:$0xf]  ;;  %v6330_v31 = vld [vmem:[#allocation8] sm:$0xf]  ;;  %v6475_v33 = vor.u32 %v9442_v24, %v6474_v23 }
  0x3f   :  { %628 = vmatpush.bf16.msra.mxu2 %v6379_v4  ;;  %v6476_v30 = vld [vmem:[#allocation8 + $0x130] sm:$0xf0]  ;;  %v9406_v32 = vld [vmem:[#allocation8 + $0xc] sm:$0xf0]  ;;  %v6458_v34 = vld [vmem:[#allocation8 + $0x100] sm:$0xf]  ;;  %v6351_v37 = vor.u32 %v9408_v26, %v6348_v27 }
  0x40   :  { %653 = vmatpush.bf16.msrb.mxu0 %v6399_v62  ;;  %v9438_v35 = vld [vmem:[#allocation8 + $0x10c] sm:$0xf0]  ;;  %v9404_v36 = vld [vmem:[#allocation8 + $0x4] sm:$0xf]  ;;  %v6332_v38 = vld [vmem:[#allocation8 + $0x10] sm:$0xf0]  ;;  %v6479_v41 = vor.u32 %v9440_v28, %v6476_v30  ;;  %v6331_v45 = vor.u32 %v9406_v32, %v6330_v31 }
  0x41   :  { %666 = vmatpush.bf16.msrb.mxu1 %v6527_v1  ;;  %641 = vmatpush.bf16.msra.mxu3 %v6507_v7  ;;  %v6450_v39 = vld [vmem:[#allocation8 + $0xe8] sm:$0xf]  ;;  %v9435_v40 = vld [vmem:[#allocation8 + $0xf4] sm:$0xf0]  ;;  %v9436_v42 = vld [vmem:[#allocation8 + $0x104] sm:$0xf]  ;;  %v6459_v49 = vor.u32 %v9438_v35, %v6458_v34  ;;  %v6335_v53 = vor.u32 %v9404_v36, %v6332_v38 }
  0x42   :  { %v6578_v43 = vld [vmem:[#allocation8 + $0x1e8] sm:$0xf]  ;;  %v9467_v44 = vld [vmem:[#allocation8 + $0x1f4] sm:$0xf0]  ;;  %v6460_v46 = vld [vmem:[#allocation8 + $0x110] sm:$0xf0]  ;;  %v6451_v50 = vor.u32 %v9435_v40, %v6450_v39 }
  0x43   :  { %629 = vmatpush.bf16.msra.mxu2 %v6363_v16  ;;  %v9433_v47 = vld [vmem:[#allocation8 + $0xec] sm:$0xf]  ;;  %v6452_v48 = vld [vmem:[#allocation8 + $0xf8] sm:$0xf0]  ;;  %v6579_v54 = vor.u32 %v9467_v44, %v6578_v43  ;;  %v6434_v55 = vld [vmem:[#allocation8 + $0xc8] sm:$0xf]  ;;  %v6463_v57 = vor.u32 %v9436_v42, %v6460_v46 }
  0x44   :  { %654 = vmatpush.bf16.msrb.mxu0 %v6383_v10  ;;  %v9465_v51 = vld [vmem:[#allocation8 + $0x1ec] sm:$0xf]  ;;  %v6580_v52 = vld [vmem:[#allocation8 + $0x1f8] sm:$0xf0]  ;;  %v9431_v56 = vld [vmem:[#allocation8 + $0xd4] sm:$0xf0]  ;;  %v6455_v58 = vor.u32 %v9433_v47, %v6452_v48 }
  0x45   :  { %667 = vmatpush.bf16.msrb.mxu1 %v6511_v13  ;;  %642 = vmatpush.bf16.msra.mxu3 %v6491_v19  ;;  %v6562_v59 = vld [vmem:[#allocation8 + $0x1c8] sm:$0xf]  ;;  %v9463_v60 = vld [vmem:[#allocation8 + $0x1d4] sm:$0xf0]  ;;  %v6583_v61 = vor.u32 %v9465_v51, %v6580_v52  ;;  %v9429_v62 = vld [vmem:[#allocation8 + $0xcc] sm:$0xf]  ;;  %v6435_v0 = vor.u32 %v9431_v56, %v6434_v55 }
  0x46   :  { %v6436_v63 = vld [vmem:[#allocation8 + $0xd8] sm:$0xf0]  ;;  %v9461_v1 = vld [vmem:[#allocation8 + $0x1cc] sm:$0xf]  ;;  %v6563_v3 = vor.u32 %v9463_v60, %v6562_v59  ;;  %v6418_v6 = vld [vmem:[#allocation8 + $0xa8] sm:$0xf] }
  0x47   :  { %630 = vmatpush.bf16.msra.mxu2 %v6347_v29  ;;  %v6564_v2 = vld [vmem:[#allocation8 + $0x1d8] sm:$0xf0]  ;;  %v6439_v4 = vor.u32 %v9429_v62, %v6436_v63  ;;  %v9427_v7 = vld [vmem:[#allocation8 + $0xb4] sm:$0xf0]  ;;  %v6546_v8 = vld [vmem:[#allocation8 + $0x1a8] sm:$0xf] }
  0x48   :  { %655 = vmatpush.bf16.msrb.mxu0 %v6367_v22  ;;  %v6567_v5 = vor.u32 %v9461_v1, %v6564_v2  ;;  %v6419_v9 = vor.u32 %v9427_v7, %v6418_v6  ;;  %v9459_v10 = vld [vmem:[#allocation8 + $0x1b4] sm:$0xf0]  ;;  %v9425_v11 = vld [vmem:[#allocation8 + $0xac] sm:$0xf]  ;;  %v6420_v12 = vld [vmem:[#allocation8 + $0xb8] sm:$0xf0] }
  0x49   :  { %668 = vmatpush.bf16.msrb.mxu1 %v6495_v25  ;;  %643 = vmatpush.bf16.msra.mxu3 %v6475_v33  ;;  %v6547_v13 = vor.u32 %v9459_v10, %v6546_v8  ;;  %v6423_v14 = vor.u32 %v9425_v11, %v6420_v12  ;;  %v9457_v15 = vld [vmem:[#allocation8 + $0x1ac] sm:$0xf]  ;;  %v6548_v16 = vld [vmem:[#allocation8 + $0x1b8] sm:$0xf0]  ;;  %v6402_v18 = vld [vmem:[#allocation8 + $0x88] sm:$0xf] }
  0x4a   :  { %v6551_v17 = vor.u32 %v9457_v15, %v6548_v16  ;;  %v9423_v19 = vld [vmem:[#allocation8 + $0x94] sm:$0xf0]  ;;  %v6530_v20 = vld [vmem:[#allocation8 + $0x188] sm:$0xf]  ;;  %v9421_v23 = vld [vmem:[#allocation8 + $0x8c] sm:$0xf] }
  0x4b   :  { %631 = vmatpush.bf16.msra.mxu2 %v6331_v45  ;;  %v6403_v21 = vor.u32 %v9423_v19, %v6402_v18  ;;  %v9455_v22 = vld [vmem:[#allocation8 + $0x194] sm:$0xf0]  ;;  %v6404_v24 = vld [vmem:[#allocation8 + $0x98] sm:$0xf0]  ;;  %v9453_v27 = vld [vmem:[#allocation8 + $0x18c] sm:$0xf] }
  0x4c   :  { %656 = vmatpush.bf16.msrb.mxu0 %v6351_v37  ;;  %v6531_v25 = vor.u32 %v9455_v22, %v6530_v20  ;;  %v6407_v26 = vor.u32 %v9421_v23, %v6404_v24  ;;  %v6532_v28 = vld [vmem:[#allocation8 + $0x198] sm:$0xf0]  ;;  %v6386_v30 = vld [vmem:[#allocation8 + $0x68] sm:$0xf]  ;;  %v9419_v31 = vld [vmem:[#allocation8 + $0x74] sm:$0xf0] }
  0x4d   :  { %669 = vmatpush.bf16.msrb.mxu1 %v6479_v41  ;;  %644 = vmatpush.bf16.msra.mxu3 %v6459_v49  ;;  %v6535_v29 = vor.u32 %v9453_v27, %v6532_v28  ;;  %v6514_v32 = vld [vmem:[#allocation8 + $0x168] sm:$0xf]  ;;  %v6387_v33 = vor.u32 %v9419_v31, %v6386_v30  ;;  %v9451_v34 = vld [vmem:[#allocation8 + $0x174] sm:$0xf0]  ;;  %v9417_v35 = vld [vmem:[#allocation8 + $0x6c] sm:$0xf] }
  0x4e   :  { %v6388_v36 = vld [vmem:[#allocation8 + $0x78] sm:$0xf0]  ;;  %v6515_v37 = vor.u32 %v9451_v34, %v6514_v32  ;;  %v9449_v39 = vld [vmem:[#allocation8 + $0x16c] sm:$0xf]  ;;  %v6370_v42 = vld [vmem:[#allocation8 + $0x48] sm:$0xf] }
  0x4f   :  { %676 = vmatpush.bf16.msrb.mxu2 %v6451_v50  ;;  %v6391_v38 = vor.u32 %v9417_v35, %v6388_v36  ;;  %v6516_v40 = vld [vmem:[#allocation8 + $0x178] sm:$0xf0]  ;;  %v9415_v43 = vld [vmem:[#allocation8 + $0x54] sm:$0xf0]  ;;  %v6498_v44 = vld [vmem:[#allocation8 + $0x148] sm:$0xf] }
  0x50   :  { %657 = vmatpush.bf16.msrb.mxu0 %v6335_v53  ;;  %v6519_v41 = vor.u32 %v9449_v39, %v6516_v40  ;;  %v6371_v45 = vor.u32 %v9415_v43, %v6370_v42  ;;  %v9447_v46 = vld [vmem:[#allocation8 + $0x154] sm:$0xf0]  ;;  %v9413_v47 = vld [vmem:[#allocation8 + $0x4c] sm:$0xf]  ;;  %v6372_v48 = vld [vmem:[#allocation8 + $0x58] sm:$0xf0] }
  0x51   :  { %689 = vmatpush.bf16.msrb.mxu3 %v6579_v54  ;;  %670 = vmatpush.bf16.msrb.mxu1 %v6463_v57  ;;  %v6499_v49 = vor.u32 %v9447_v46, %v6498_v44  ;;  %v6375_v50 = vor.u32 %v9413_v47, %v6372_v48  ;;  %v9445_v51 = vld [vmem:[#allocation8 + $0x14c] sm:$0xf]  ;;  %v6500_v52 = vld [vmem:[#allocation8 + $0x158] sm:$0xf0]  ;;  %v6354_v53 = vld [vmem:[#allocation8 + $0x28] sm:$0xf] }
  0x52   :  { %v6503_v54 = vor.u32 %v9445_v51, %v6500_v52  ;;  %v9411_v55 = vld [vmem:[#allocation8 + $0x34] sm:$0xf0]  ;;  %v6482_v56 = vld [vmem:[#allocation8 + $0x128] sm:$0xf]  ;;  %v9409_v59 = vld [vmem:[#allocation8 + $0x2c] sm:$0xf] }
  0x53   :  { %677 = vmatpush.bf16.msrb.mxu2 %v6435_v0  ;;  %v9443_v57 = vld [vmem:[#allocation8 + $0x134] sm:$0xf0]  ;;  %v6356_v60 = vld [vmem:[#allocation8 + $0x38] sm:$0xf0]  ;;  %v6338_v1 = vld [vmem:[#allocation8 + $0x8] sm:$0xf] }
  0x54   :  { %702 = vmatpush.bf16.msra.mxu0 %v6455_v58  ;;  %v6355_v58 = vor.u32 %v9411_v55, %v6354_v53  ;;  %v6483_v62 = vor.u32 %v9443_v57, %v6482_v56  ;;  %v6359_v63 = vor.u32 %v9409_v59, %v6356_v60  ;;  %v6484_v0 = vld [vmem:[#allocation8 + $0x138] sm:$0xf0]  ;;  %v9407_v2 = vld [vmem:[#allocation8 + $0x14] sm:$0xf0]  ;;  %v9405_v6 = vld [vmem:[#allocation8 + $0xc] sm:$0xf] }
  0x55   :  { %715 = vmatpush.bf16.msra.mxu1 %v6583_v61  ;;  %690 = vmatpush.bf16.msrb.mxu3 %v6563_v3  ;;  %v9441_v61 = vld [vmem:[#allocation8 + $0x12c] sm:$0xf]  ;;  %v6340_v7 = vld [vmem:[#allocation8 + $0x18] sm:$0xf0]  ;;  %v6339_v10 = vor.u32 %v9407_v2, %v6338_v1  ;;  %v7066_v20 = vld [vmem:[#allocation11 + $0x3c0] sm:$0xf] }
  0x56   :  { %v6487_v3 = vor.u32 %v9441_v61, %v6484_v0  ;;  %v9437_v8 = vld [vmem:[#allocation8 + $0x10c] sm:$0xf]  ;;  %v6343_v12 = vor.u32 %v9405_v6, %v6340_v7  ;;  %v6810_v22 = vld [vmem:[#allocation11 + $0x1c0] sm:$0xf]  ;;  %s10462_s6 = smov [#allocation17]   ;;  %s6296_s13 = sshll.u32 %s10823_s9, 4  ;;  %s6297_s13 = int_to_ptr.hbm [resolvable:$true] %s6296_s13 }
  0x57   :  { %678 = vmatpush.bf16.msrb.mxu2 %v6419_v9  ;;  %v6468_v9 = vld [vmem:[#allocation8 + $0x118] sm:$0xf0]  ;;  %v9528_v24 = vld [vmem:[#allocation11 + $0x1dc] sm:$0xf0]  ;;  %s6294_s8 = sshll.u32 %s10462_s6, 4  ;;  %s6295_s8 = int_to_ptr.vmem [resolvable:$true] %s6294_s8 }
  0x58   :  { %703 = vmatpush.bf16.msra.mxu0 %v6439_v4  ;;  %v6466_v4 = vld [vmem:[#allocation8 + $0x108] sm:$0xf]  ;;  %v7322_v28 = vld [vmem:[#allocation11 + $0x5c0] sm:$0xf]  ;;  %v6811_v35 = vor.u32 %v9528_v24, %v6810_v22 }
  0x59   :  { %716 = vmatpush.bf16.msra.mxu1 %v6567_v5  ;;  %691 = vmatpush.bf16.msrb.mxu3 %v6547_v13  ;;  %v9439_v5 = vld [vmem:[#allocation8 + $0x114] sm:$0xf0]  ;;  %v6471_v13 = vor.u32 %v9437_v8, %v6468_v9  ;;  %v9584_v34 = vld [vmem:[#allocation11 + $0x39c] sm:$0xf0] }
  0x5a   :  { %v6467_v11 = vor.u32 %v9439_v5, %v6466_v4  ;;  %v7546_v40 = vld [vmem:[#allocation11 + $0x780] sm:$0xf] }
  0x5b   :  { %679 = vmatpush.bf16.msrb.mxu2 %v6403_v21  ;;  %v9592_v21 = vld [vmem:[#allocation11 + $0x3dc] sm:$0xf0] }
  0x5c   :  { %704 = vmatpush.bf16.msra.mxu0 %v6423_v14  ;;  %v170_v14 = vld [vmem:[#allocation7] sm:$0x3]  ;;  %v7067_v32 = vor.u32 %v9592_v21, %v7066_v20  ;;  %v9712_v42 = vld [vmem:[#allocation11 + $0x79c] sm:$0xf0] }
  0x5d   :  { %717 = vmatpush.bf16.msra.mxu1 %v6551_v17  ;;  %692 = vmatpush.bf16.msrb.mxu3 %v6531_v25  ;;  %v172_v15 = vperm.slane %v170_v14, 0  ;;  %v173_v16 = vperm.slane %v170_v14, 1  ;;  %v7578_v25 = vld [vmem:[#allocation11 + $0x7c0] sm:$0xf]  ;;  %v7547_v53 = vor.u32 %v9712_v42, %v7546_v40 }
  0x5e   :  { %v7290_v43 = vld [vmem:[#allocation11 + $0x580] sm:$0xf] }
  0x5f   :  { %680 = vmatpush.bf16.msrb.mxu2 %v6387_v33  ;;  %v7034_v33 = vld [vmem:[#allocation11 + $0x380] sm:$0xf] }
  0x60   :  { %705 = vmatpush.bf16.msra.mxu0 %v6407_v26  ;;  %v9720_v26 = vld [vmem:[#allocation11 + $0x7dc] sm:$0xf0]  ;;  %v7035_v47 = vor.u32 %v9584_v34, %v7034_v33 }
  0x61   :  { %718 = vmatpush.bf16.msra.mxu1 %v6535_v29  ;;  %693 = vmatpush.bf16.msrb.mxu3 %v6515_v37  ;;  %v9656_v29 = vld [vmem:[#allocation11 + $0x5dc] sm:$0xf0]  ;;  %v7579_v39 = vor.u32 %v9720_v26, %v7578_v25 }
  0x62   :  { %v6778_v37 = vld [vmem:[#allocation11 + $0x180] sm:$0xf] }
  0x63   :  { %681 = vmatpush.bf16.msrb.mxu2 %v6371_v45  ;;  %v9648_v44 = vld [vmem:[#allocation11 + $0x59c] sm:$0xf0] }
  0x64   :  { %706 = vmatpush.bf16.msra.mxu0 %v6391_v38  ;;  %v9520_v38 = vld [vmem:[#allocation11 + $0x19c] sm:$0xf0]  ;;  %v7291_v55 = vor.u32 %v9648_v44, %v7290_v43 }
  0x65   :  { %719 = vmatpush.bf16.msra.mxu1 %v6519_v41  ;;  %694 = vmatpush.bf16.msrb.mxu3 %v6499_v49  ;;  %v7323_v41 = vor.u32 %v9656_v29, %v7322_v28  ;;  %v7002_v48 = vld [vmem:[#allocation11 + $0x340] sm:$0xf] }
  0x66   :  { %v9576_v49 = vld [vmem:[#allocation11 + $0x35c] sm:$0xf0] }
  0x67   :  { %682 = vmatpush.bf16.msrb.mxu2 %v6355_v58  ;;  %v6746_v51 = vld [vmem:[#allocation11 + $0x140] sm:$0xf]  ;;  %v7003_v59 = vor.u32 %v9576_v49, %v7002_v48 }
  0x68   :  { %707 = vmatpush.bf16.msra.mxu0 %v6375_v50  ;;  %v6779_v50 = vor.u32 %v9520_v38, %v6778_v37  ;;  %v9512_v52 = vld [vmem:[#allocation11 + $0x15c] sm:$0xf0] }
  0x69   :  { %720 = vmatpush.bf16.msra.mxu1 %v6503_v54  ;;  %695 = vmatpush.bf16.msrb.mxu3 %v6483_v62  ;;  %v7514_v54 = vld [vmem:[#allocation11 + $0x740] sm:$0xf]  ;;  %v6747_v62 = vor.u32 %v9512_v52, %v6746_v51  ;;  %v7068_v52 = vld [vmem:[#allocation11 + $0x3e0] sm:$0xf0] }
  0x6a   :  { %v9704_v56 = vld [vmem:[#allocation11 + $0x75c] sm:$0xf0] }
  0x6b   :  { %683 = vmatpush.bf16.msrb.mxu2 %v6339_v10  ;;  %v7258_v57 = vld [vmem:[#allocation11 + $0x540] sm:$0xf]  ;;  %v7515_v1 = vor.u32 %v9704_v56, %v7514_v54  ;;  %v6812_v54 = vld [vmem:[#allocation11 + $0x1e0] sm:$0xf0] }
  0x6c   :  { %708 = vmatpush.bf16.msra.mxu0 %v6359_v63  ;;  %v9640_v58 = vld [vmem:[#allocation11 + $0x55c] sm:$0xf0] }
  0x6d   :  { %721 = vmatpush.bf16.msra.mxu1 %v6487_v3  ;;  %696 = vmatpush.bf16.msrb.mxu3 %v6467_v11  ;;  %v6970_v60 = vld [vmem:[#allocation11 + $0x300] sm:$0xf]  ;;  %v7259_v3 = vor.u32 %v9640_v58, %v7258_v57 }
  0x6e   :  { %v9568_v61 = vld [vmem:[#allocation11 + $0x31c] sm:$0xf0] }
  0x6f   :  { %v6714_v63 = vld [vmem:[#allocation11 + $0x100] sm:$0xf]  ;;  %v6971_v7 = vor.u32 %v9568_v61, %v6970_v60  ;;  %v7580_v60 = vld [vmem:[#allocation11 + $0x7e0] sm:$0xf0] }
  0x70   :  { %709 = vmatpush.bf16.msra.mxu0 %v6343_v12  ;;  %v9504_v0 = vld [vmem:[#allocation11 + $0x11c] sm:$0xf0] }
  0x71   :  { %722 = vmatpush.bf16.msra.mxu1 %v6471_v13  ;;  %v7482_v2 = vld [vmem:[#allocation11 + $0x700] sm:$0xf]  ;;  %v6715_v10 = vor.u32 %v9504_v0, %v6714_v63  ;;  %v7036_v0 = vld [vmem:[#allocation11 + $0x3a0] sm:$0xf0] }
  0x72   :  { %v9696_v4 = vld [vmem:[#allocation11 + $0x71c] sm:$0xf0] }
  0x73   :  { %v7226_v5 = vld [vmem:[#allocation11 + $0x500] sm:$0xf]  ;;  %v7483_v13 = vor.u32 %v9696_v4, %v7482_v2  ;;  %v6780_v2 = vld [vmem:[#allocation11 + $0x1a0] sm:$0xf0] }
  0x74   :  { %v9632_v6 = vld [vmem:[#allocation11 + $0x51c] sm:$0xf0] }
  0x75   :  { %v6938_v8 = vld [vmem:[#allocation11 + $0x2c0] sm:$0xf] }
  0x76   :  { %v9560_v9 = vld [vmem:[#allocation11 + $0x2dc] sm:$0xf0] }
  0x77   :  { %v6682_v11 = vld [vmem:[#allocation11 + $0xc0] sm:$0xf] }
  0x78   :  { %v9496_v12 = vld [vmem:[#allocation11 + $0xdc] sm:$0xf0] }
  0x79   :  { %v7450_v14 = vld [vmem:[#allocation11 + $0x6c0] sm:$0xf]  ;;  %v6683_v22 = vor.u32 %v9496_v12, %v6682_v11  ;;  %v9564_v12 = vld [vmem:[#allocation11 + $0x304] sm:$0xf] }
  0x7a   :  { %v6906_v20 = vld [vmem:[#allocation11 + $0x280] sm:$0xf] }
  0x7b   :  { %v9552_v21 = vld [vmem:[#allocation11 + $0x29c] sm:$0xf0] }
  0x7c   :  { %v9488_v24 = vld [vmem:[#allocation11 + $0x9c] sm:$0xf0] }
  0x7d   :  { %v7418_v26 = vld [vmem:[#allocation11 + $0x680] sm:$0xf] }
  0x7e   :  { %v9680_v28 = vld [vmem:[#allocation11 + $0x69c] sm:$0xf0] }
  0x7f   :  { %v7162_v29 = vld [vmem:[#allocation11 + $0x480] sm:$0xf] }
  0x80   :  { %v6874_v33 = vld [vmem:[#allocation11 + $0x240] sm:$0xf] }
  0x81   :  { %v9544_v34 = vld [vmem:[#allocation11 + $0x25c] sm:$0xf0] }
  0x82   :  { %v6618_v37 = vld [vmem:[#allocation11 + $0x40] sm:$0xf]  ;;  %v6875_v44 = vor.u32 %v9544_v34, %v6874_v33  ;;  %v6684_v33 = vld [vmem:[#allocation11 + $0xe0] sm:$0xf0] }
  0x83   :  { %v9480_v38 = vld [vmem:[#allocation11 + $0x5c] sm:$0xf0]  ;;  %v9652_v34 = vld [vmem:[#allocation11 + $0x5c4] sm:$0xf] }
  0x84   :  { %v7386_v40 = vld [vmem:[#allocation11 + $0x640] sm:$0xf] }
  0x85   :  { %v7130_v42 = vld [vmem:[#allocation11 + $0x440] sm:$0xf] }
  0x86   :  { %v9608_v43 = vld [vmem:[#allocation11 + $0x45c] sm:$0xf0] }
  0x87   :  { %v6586_v48 = vld [vmem:[#allocation11] sm:$0xf]  ;;  %v7131_v51 = vor.u32 %v9608_v43, %v7130_v42  ;;  %v7516_v42 = vld [vmem:[#allocation11 + $0x760] sm:$0xf0] }
  0x88   :  { %v9472_v49 = vld [vmem:[#allocation11 + $0x1c] sm:$0xf0] }
  0x89   :  { %v9664_v56 = vld [vmem:[#allocation11 + $0x61c] sm:$0xf0]  ;;  %v6587_v58 = vor.u32 %v9472_v49, %v6586_v48  ;;  %v9532_v49 = vld [vmem:[#allocation11 + $0x204] sm:$0xf] }
  0xb0   :  { %v209_v17 = vpop.f32.mrf.mxu0 }
  0xb1   :  { %v210_v18 = vadd.f32 %v209_v17, %v172_v15  ;;  %v222_v19 = vpop.f32.mrf.mxu1  ;;  %v7227_v15 = vor.u32 %v9632_v6, %v7226_v5  ;;  %v7194_v17 = vld [vmem:[#allocation11 + $0x4c0] sm:$0xf]  ;;  %v9572_v6 = vld [vmem:[#allocation11 + $0x344] sm:$0xf] }
  0xb2   :  { %v223_v23 = vadd.f32 %v222_v19, %v173_v16  ;;  %v9688_v16 = vld [vmem:[#allocation11 + $0x6dc] sm:$0xf0]  ;;  %v6939_v19 = vor.u32 %v9560_v9, %v6938_v8  ;;  %v7004_v8 = vld [vmem:[#allocation11 + $0x360] sm:$0xf0] }
  0xb3   :  { %v226_v27 = vmax.f32 %v210_v18, 0.0  ;;  %v9624_v18 = vld [vmem:[#allocation11 + $0x4dc] sm:$0xf0]  ;;  %v7451_v25 = vor.u32 %v9688_v16, %v7450_v14  ;;  %v9508_v9 = vld [vmem:[#allocation11 + $0x144] sm:$0xf]  ;;  %v7007_v11 = vor.u32 %v9572_v6, %v7004_v8 }
  0xb4   :  { %v227_v30 = vmax.f32 %v223_v23, 0.0  ;;  %v6650_v23 = vld [vmem:[#allocation11 + $0x80] sm:$0xf]  ;;  %v6972_v14 = vld [vmem:[#allocation11 + $0x320] sm:$0xf0] }
  0xb5   :  { %v10542_v31 = vpack.c.bf16 %v226_v27, %v226_v27  ;;  %v7195_v27 = vor.u32 %v9624_v18, %v7194_v17  ;;  %v6716_v16 = vld [vmem:[#allocation11 + $0x120] sm:$0xf0]  ;;  %v6975_v17 = vor.u32 %v9564_v12, %v6972_v14 }
  0xb6   :  { %v10544_v36 = vpack.c.bf16 %v227_v30, %v227_v30  ;;  %v9616_v30 = vld [vmem:[#allocation11 + $0x49c] sm:$0xf0]  ;;  %v9676_v6 = vld [vmem:[#allocation11 + $0x684] sm:$0xf] }
  0xb7   :  { %632 = vmatmul.bf16.vlgmr.msra.gmra.mxu2 %v10542_v31  ;;  %658 = vmatmul.bf16.vlgmr.msrb.gmra.mxu0 %v10542_v31  ;;  %v9668_v12 = vld [vmem:[#allocation11 + $0x644] sm:$0xf] }
  0xb8   :  { %645 = vmatmul.bf16.vlgmr.msra.gmra.mxu3 %v10544_v36  ;;  %671 = vmatmul.bf16.vlgmr.msrb.gmra.mxu1 %v10544_v36  ;;  %v211_v45 = vpop.f32.mrf.mxu0 }
  0xb9   :  { %v224_v46 = vpop.f32.mrf.mxu1  ;;  %2303 = vmatpush.bf16.msra.mxu3 %v7067_v32  ;;  %2290 = vmatpush.bf16.msra.mxu2 %v6811_v35  ;;  %v6907_v32 = vor.u32 %v9552_v21, %v6906_v20  ;;  %v6651_v35 = vor.u32 %v9488_v24, %v6650_v23  ;;  %v9536_v45 = vld [vmem:[#allocation11 + $0x21c] sm:$0xf0]  ;;  %v6940_v20 = vld [vmem:[#allocation11 + $0x2e0] sm:$0xf0] }
  0xba   :  { %2329 = vmatpush.bf16.msrb.mxu1 %v7579_v39  ;;  %2316 = vmatpush.bf16.msrb.mxu0 %v7323_v41  ;;  %v7419_v39 = vor.u32 %v9680_v28, %v7418_v26  ;;  %v9672_v41 = vld [vmem:[#allocation11 + $0x65c] sm:$0xf0]  ;;  %v6619_v46 = vor.u32 %v9480_v38, %v6618_v37  ;;  %v6908_v23 = vld [vmem:[#allocation11 + $0x2a0] sm:$0xf0] }
  0xbb   :  { %v9708_v24 = vld [vmem:[#allocation11 + $0x784] sm:$0xf]  ;;  %v9600_v28 = vld [vmem:[#allocation11 + $0x41c] sm:$0xf0] }
  0xbc   :  { %v7548_v26 = vld [vmem:[#allocation11 + $0x7a0] sm:$0xf0] }
  0xbd   :  { %2304 = vmatpush.bf16.msra.mxu3 %v7035_v47  ;;  %2291 = vmatpush.bf16.msra.mxu2 %v6779_v50  ;;  %v9588_v47 = vld [vmem:[#allocation11 + $0x3c4] sm:$0xf]  ;;  %v7387_v50 = vor.u32 %v9672_v41, %v7386_v40 }
  0xbe   :  { %2330 = vmatpush.bf16.msrb.mxu1 %v7547_v53  ;;  %2317 = vmatpush.bf16.msrb.mxu0 %v7291_v55  ;;  %v9524_v53 = vld [vmem:[#allocation11 + $0x1c4] sm:$0xf]  ;;  %v7354_v55 = vld [vmem:[#allocation11 + $0x600] sm:$0xf]  ;;  %v7071_v61 = vor.u32 %v9588_v47, %v7068_v52 }
  0xbf   :  { %v6815_v63 = vor.u32 %v9524_v53, %v6812_v54  ;;  %v7324_v37 = vld [vmem:[#allocation11 + $0x5e0] sm:$0xf0] }
  0xc0   :  { %v7327_v38 = vor.u32 %v9652_v34, %v7324_v37  ;;  %v6876_v40 = vld [vmem:[#allocation11 + $0x260] sm:$0xf0]  ;;  %v9593_v37 = vld [vmem:[#allocation11 + $0x3e4] sm:$0xf0] }
  0xc1   :  { %2305 = vmatpush.bf16.msra.mxu3 %v7003_v59  ;;  %2292 = vmatpush.bf16.msra.mxu2 %v6747_v62  ;;  %v9716_v59 = vld [vmem:[#allocation11 + $0x7c4] sm:$0xf] }
  0xc2   :  { %2331 = vmatpush.bf16.msrb.mxu1 %v7515_v1  ;;  %2318 = vmatpush.bf16.msrb.mxu0 %v7259_v3  ;;  %v9580_v62 = vld [vmem:[#allocation11 + $0x384] sm:$0xf]  ;;  %v7355_v3 = vor.u32 %v9664_v56, %v7354_v55  ;;  %v7583_v4 = vor.u32 %v9716_v59, %v7580_v60 }
  0xc3   :  { %v9516_v1 = vld [vmem:[#allocation11 + $0x184] sm:$0xf]  ;;  %v7039_v5 = vor.u32 %v9580_v62, %v7036_v0 }
  0xc4   :  { %v7292_v47 = vld [vmem:[#allocation11 + $0x5a0] sm:$0xf0] }
  0xc5   :  { %2306 = vmatpush.bf16.msra.mxu3 %v6971_v7  ;;  %2293 = vmatpush.bf16.msra.mxu2 %v6715_v10  ;;  %v6783_v7 = vor.u32 %v9516_v1, %v6780_v2  ;;  %v6748_v10 = vld [vmem:[#allocation11 + $0x160] sm:$0xf0] }
  0xc6   :  { %2332 = vmatpush.bf16.msrb.mxu1 %v7483_v13  ;;  %2319 = vmatpush.bf16.msrb.mxu0 %v7227_v15  ;;  %v6751_v13 = vor.u32 %v9508_v9, %v6748_v10  ;;  %v9500_v15 = vld [vmem:[#allocation11 + $0x104] sm:$0xf] }
  0xc7   :  { %684 = vmatmul.bf16.vlgmr.msrb.gmra.mxu2 %v10542_v31  ;;  %710 = vmatmul.bf16.vlgmr.msra.gmra.mxu0 %v10542_v31  ;;  %v7163_v31 = vor.u32 %v9616_v30, %v7162_v29  ;;  %v6719_v18 = vor.u32 %v9500_v15, %v6716_v16  ;;  %v7551_v29 = vor.u32 %v9708_v24, %v7548_v26  ;;  %v9692_v52 = vld [vmem:[#allocation11 + $0x704] sm:$0xf]  ;;  %v10554_v24 = vld [vmem:[#allocation10] sm:$0xf] }
  0xc8   :  { %697 = vmatmul.bf16.vlgmr.msrb.gmra.mxu3 %v10544_v36  ;;  %723 = vmatmul.bf16.vlgmr.msra.gmra.mxu1 %v10544_v36  ;;  %v6842_v36 = vld [vmem:[#allocation11 + $0x200] sm:$0xf]  ;;  %v7484_v53 = vld [vmem:[#allocation11 + $0x720] sm:$0xf0]  ;;  %v296_v34 = vperm.slane %v10554_v24, 0 }
  0xc9   :  { %2307 = vmatpush.bf16.msra.mxu3 %v6939_v19  ;;  %2294 = vmatpush.bf16.msra.mxu2 %v6683_v22  ;;  %v6843_v57 = vor.u32 %v9536_v45, %v6842_v36  ;;  %v9556_v19 = vld [vmem:[#allocation11 + $0x2c4] sm:$0xf]  ;;  %v7487_v54 = vor.u32 %v9692_v52, %v7484_v53  ;;  %v9577_v52 = vld [vmem:[#allocation11 + $0x364] sm:$0xf0] }
  0xca   :  { %2333 = vmatpush.bf16.msrb.mxu1 %v7451_v25  ;;  %2320 = vmatpush.bf16.msrb.mxu0 %v7195_v27  ;;  %v6943_v21 = vor.u32 %v9556_v19, %v6940_v20  ;;  %v9548_v22 = vld [vmem:[#allocation11 + $0x284] sm:$0xf]  ;;  %v7098_v27 = vld [vmem:[#allocation11 + $0x400] sm:$0xf] }
  0xcb   :  { %v6911_v25 = vor.u32 %v9548_v22, %v6908_v23  ;;  %v7099_v30 = vor.u32 %v9600_v28, %v7098_v27  ;;  %v6652_v36 = vld [vmem:[#allocation11 + $0xa0] sm:$0xf0]  ;;  %v297_v27 = vperm.slane %v10554_v24, 1 }
  0xcc   :  { %v9644_v45 = vld [vmem:[#allocation11 + $0x584] sm:$0xf] }
  0xcd   :  { %2308 = vmatpush.bf16.msra.mxu3 %v6907_v32  ;;  %2295 = vmatpush.bf16.msra.mxu2 %v6651_v35  ;;  %v9492_v32 = vld [vmem:[#allocation11 + $0xc4] sm:$0xf]  ;;  %v7295_v48 = vor.u32 %v9644_v45, %v7292_v47  ;;  %v6818_v47 = vld [vmem:[#allocation11 + $0x1c8] sm:$0xf] }
  0xce   :  { %2334 = vmatpush.bf16.msrb.mxu1 %v7419_v39  ;;  %2321 = vmatpush.bf16.msrb.mxu0 %v7163_v31  ;;  %v6687_v35 = vor.u32 %v9492_v32, %v6684_v33  ;;  %v9540_v39 = vld [vmem:[#allocation11 + $0x244] sm:$0xf] }
  0xcf   :  { %v9700_v31 = vld [vmem:[#allocation11 + $0x744] sm:$0xf]  ;;  %v6879_v41 = vor.u32 %v9540_v39, %v6876_v40 }
  0xd0   :  { %v7519_v43 = vor.u32 %v9700_v31, %v7516_v42  ;;  %v9476_v55 = vld [vmem:[#allocation11 + $0x44] sm:$0xf] }
  0xd1   :  { %2309 = vmatpush.bf16.msra.mxu3 %v6875_v44  ;;  %2296 = vmatpush.bf16.msra.mxu2 %v6619_v46  ;;  %v9484_v44 = vld [vmem:[#allocation11 + $0x84] sm:$0xf] }
  0xd2   :  { %2335 = vmatpush.bf16.msrb.mxu1 %v7387_v50  ;;  %2322 = vmatpush.bf16.msrb.mxu0 %v7131_v51  ;;  %v6655_v46 = vor.u32 %v9484_v44, %v6652_v36  ;;  %v6844_v50 = vld [vmem:[#allocation11 + $0x220] sm:$0xf0]  ;;  %v9585_v44 = vld [vmem:[#allocation11 + $0x3a4] sm:$0xf0] }
  0xd3   :  { %v6847_v51 = vor.u32 %v9532_v49, %v6844_v50  ;;  %v6620_v56 = vld [vmem:[#allocation11 + $0x60] sm:$0xf0] }
  0xd4   :  { %v7260_v59 = vld [vmem:[#allocation11 + $0x560] sm:$0xf0] }
  0xd5   :  { %2310 = vmatpush.bf16.msra.mxu3 %v6843_v57  ;;  %2297 = vmatpush.bf16.msra.mxu2 %v6587_v58  ;;  %v6623_v57 = vor.u32 %v9476_v55, %v6620_v56  ;;  %v9636_v58 = vld [vmem:[#allocation11 + $0x544] sm:$0xf]  ;;  %v299_v55 = vperm.slane %v10554_v24, 3  ;;  %v6786_v56 = vld [vmem:[#allocation11 + $0x188] sm:$0xf] }
  0xd6   :  { %2336 = vmatpush.bf16.msrb.mxu1 %v7355_v3  ;;  %2323 = vmatpush.bf16.msrb.mxu0 %v7099_v30  ;;  %v7263_v60 = vor.u32 %v9636_v58, %v7260_v59  ;;  %v7452_v62 = vld [vmem:[#allocation11 + $0x6e0] sm:$0xf0] }
  0xd7   :  { %v9468_v0 = vld [vmem:[#allocation11 + $0x4] sm:$0xf] }
  0xd8   :  { %v6588_v1 = vld [vmem:[#allocation11 + $0x20] sm:$0xf0] }
  0xd9   :  { %2355 = vmatpush.bf16.msrb.mxu3 %v7071_v61  ;;  %2342 = vmatpush.bf16.msrb.mxu2 %v6815_v63  ;;  %v9684_v61 = vld [vmem:[#allocation11 + $0x6c4] sm:$0xf]  ;;  %v6591_v3 = vor.u32 %v9468_v0, %v6588_v1 }
  0xda   :  { %2381 = vmatpush.bf16.msra.mxu1 %v7583_v4  ;;  %2368 = vmatpush.bf16.msra.mxu0 %v7327_v38  ;;  %v7455_v63 = vor.u32 %v9684_v61, %v7452_v62  ;;  %v9628_v2 = vld [vmem:[#allocation11 + $0x504] sm:$0xf]  ;;  %v6978_v61 = vld [vmem:[#allocation11 + $0x308] sm:$0xf] }
  0xdb   :  { %v7228_v4 = vld [vmem:[#allocation11 + $0x520] sm:$0xf0]  ;;  %v9569_v62 = vld [vmem:[#allocation11 + $0x324] sm:$0xf0] }
  0xdc   :  { %v9620_v9 = vld [vmem:[#allocation11 + $0x4c4] sm:$0xf] }
  0xdd   :  { %2356 = vmatpush.bf16.msrb.mxu3 %v7039_v5  ;;  %2343 = vmatpush.bf16.msrb.mxu2 %v6783_v7  ;;  %v7231_v5 = vor.u32 %v9628_v2, %v7228_v4  ;;  %v7420_v7 = vld [vmem:[#allocation11 + $0x6a0] sm:$0xf0]  ;;  %v9513_v4 = vld [vmem:[#allocation11 + $0x164] sm:$0xf0] }
  0xde   :  { %2382 = vmatpush.bf16.msra.mxu1 %v7551_v29  ;;  %2369 = vmatpush.bf16.msra.mxu0 %v7295_v48  ;;  %v7423_v8 = vor.u32 %v9676_v6, %v7420_v7  ;;  %v7196_v10 = vld [vmem:[#allocation11 + $0x4e0] sm:$0xf0]  ;;  %v9529_v48 = vld [vmem:[#allocation11 + $0x1e4] sm:$0xf0]  ;;  %v298_v6 = vperm.slane %v10554_v24, 2 }
  0xdf   :  { %v9612_v15 = vld [vmem:[#allocation11 + $0x484] sm:$0xf]  ;;  %v6819_v53 = vor.u32 %v9529_v48, %v6818_v47  ;;  %v6946_v7 = vld [vmem:[#allocation11 + $0x2c8] sm:$0xf] }
  0xe0   :  { %v7164_v16 = vld [vmem:[#allocation11 + $0x4a0] sm:$0xf0]  ;;  %v7554_v24 = vld [vmem:[#allocation11 + $0x788] sm:$0xf] }
  0xe1   :  { %2357 = vmatpush.bf16.msrb.mxu3 %v7007_v11  ;;  %2344 = vmatpush.bf16.msrb.mxu2 %v6751_v13  ;;  %v7199_v11 = vor.u32 %v9620_v9, %v7196_v10  ;;  %v7388_v13 = vld [vmem:[#allocation11 + $0x660] sm:$0xf0]  ;;  %v9561_v9 = vld [vmem:[#allocation11 + $0x2e4] sm:$0xf0] }
  0xe2   :  { %2383 = vmatpush.bf16.msra.mxu1 %v7519_v43  ;;  %2370 = vmatpush.bf16.msra.mxu0 %v7263_v60  ;;  %v7391_v14 = vor.u32 %v9668_v12, %v7388_v13  ;;  %v7356_v19 = vld [vmem:[#allocation11 + $0x620] sm:$0xf0]  ;;  %v7042_v43 = vld [vmem:[#allocation11 + $0x388] sm:$0xf] }
  0xe3   :  { %v7132_v22 = vld [vmem:[#allocation11 + $0x460] sm:$0xf0]  ;;  %v7043_v49 = vor.u32 %v9585_v44, %v7042_v43  ;;  %v7586_v10 = vld [vmem:[#allocation11 + $0x7c8] sm:$0xf] }
  0xe4   :  { %v7100_v26 = vld [vmem:[#allocation11 + $0x420] sm:$0xf0]  ;;  %v7298_v47 = vld [vmem:[#allocation11 + $0x588] sm:$0xf] }
  0xe5   :  { %2358 = vmatpush.bf16.msrb.mxu3 %v6975_v17  ;;  %2345 = vmatpush.bf16.msrb.mxu2 %v6719_v18  ;;  %v7167_v17 = vor.u32 %v9612_v15, %v7164_v16  ;;  %v9660_v18 = vld [vmem:[#allocation11 + $0x604] sm:$0xf]  ;;  %v9505_v15 = vld [vmem:[#allocation11 + $0x124] sm:$0xf0] }
  0xe6   :  { %2384 = vmatpush.bf16.msra.mxu1 %v7487_v54  ;;  %2371 = vmatpush.bf16.msra.mxu0 %v7231_v5  ;;  %v7359_v20 = vor.u32 %v9660_v18, %v7356_v19  ;;  %v6979_v5 = vor.u32 %v9569_v62, %v6978_v61  ;;  %v6914_v19 = vld [vmem:[#allocation11 + $0x288] sm:$0xf]  ;;  %v7076_v61 = vld [vmem:[#allocation11 + $0x3e8] sm:$0xf0] }
  0xe7   :  { %v9649_v48 = vld [vmem:[#allocation11 + $0x5a4] sm:$0xf0] }
  0xe8   :  { %v6626_v62 = vld [vmem:[#allocation11 + $0x48] sm:$0xf] }
  0xe9   :  { %2359 = vmatpush.bf16.msrb.mxu3 %v6943_v21  ;;  %2346 = vmatpush.bf16.msrb.mxu2 %v6687_v35  ;;  %v9604_v21 = vld [vmem:[#allocation11 + $0x444] sm:$0xf]  ;;  %v7074_v35 = vld [vmem:[#allocation11 + $0x3c8] sm:$0xf] }
  0xea   :  { %2385 = vmatpush.bf16.msra.mxu1 %v7455_v63  ;;  %2372 = vmatpush.bf16.msra.mxu0 %v7199_v11  ;;  %v7135_v23 = vor.u32 %v9604_v21, %v7132_v22  ;;  %v7075_v40 = vor.u32 %v9593_v37, %v7074_v35  ;;  %v9721_v11 = vld [vmem:[#allocation11 + $0x7e4] sm:$0xf0] }
  0xeb   :  { %v7587_v18 = vor.u32 %v9721_v11, %v7586_v10  ;;  %v7044_v10 = vld [vmem:[#allocation11 + $0x3a8] sm:$0xf0]  ;;  %v6594_v11 = vld [vmem:[#allocation11 + $0x8] sm:$0xf] }
  0xed   :  { %2360 = vmatpush.bf16.msrb.mxu3 %v6911_v25  ;;  %2347 = vmatpush.bf16.msrb.mxu2 %v6655_v46  ;;  %v9596_v25 = vld [vmem:[#allocation11 + $0x404] sm:$0xf] }
  0xee   :  { %2386 = vmatpush.bf16.msra.mxu1 %v7423_v8  ;;  %2373 = vmatpush.bf16.msra.mxu0 %v7167_v17  ;;  %v7103_v28 = vor.u32 %v9596_v25, %v7100_v26  ;;  %v6947_v17 = vor.u32 %v9561_v9, %v6946_v7  ;;  %v9713_v25 = vld [vmem:[#allocation11 + $0x7a4] sm:$0xf0]  ;;  %v9581_v9 = vld [vmem:[#allocation11 + $0x38c] sm:$0xf] }
  0xef   :  { %v7555_v37 = vor.u32 %v9713_v25, %v7554_v24  ;;  %v9573_v24 = vld [vmem:[#allocation11 + $0x34c] sm:$0xf] }
  0xf0   :  { %v7012_v25 = vld [vmem:[#allocation11 + $0x368] sm:$0xf0] }
  0xf1   :  { %2361 = vmatpush.bf16.msrb.mxu3 %v6879_v41  ;;  %2348 = vmatpush.bf16.msrb.mxu2 %v6623_v57  ;;  %v9521_v57 = vld [vmem:[#allocation11 + $0x1a4] sm:$0xf0] }
  0xf2   :  { %2387 = vmatpush.bf16.msra.mxu1 %v7391_v14  ;;  %2374 = vmatpush.bf16.msra.mxu0 %v7135_v23  ;;  %v6787_v0 = vor.u32 %v9521_v57, %v6786_v56  ;;  %v6722_v14 = vld [vmem:[#allocation11 + $0x108] sm:$0xf] }
  0xf3   :  { %v9553_v23 = vld [vmem:[#allocation11 + $0x2a4] sm:$0xf0] }
  0xf4   :  { %v6915_v35 = vor.u32 %v9553_v23, %v6914_v19  ;;  %v7490_v56 = vld [vmem:[#allocation11 + $0x708] sm:$0xf] }
  0xf5   :  { %2362 = vmatpush.bf16.msrb.mxu3 %v6847_v51  ;;  %2349 = vmatpush.bf16.msrb.mxu2 %v6591_v3  ;;  %v7010_v51 = vld [vmem:[#allocation11 + $0x348] sm:$0xf] }
  0xf6   :  { %2388 = vmatpush.bf16.msra.mxu1 %v7359_v20  ;;  %2375 = vmatpush.bf16.msra.mxu0 %v7103_v28  ;;  %v7011_v59 = vor.u32 %v9577_v52, %v7010_v51  ;;  %v6754_v3 = vld [vmem:[#allocation11 + $0x148] sm:$0xf] }
  0xf7   :  { %v6755_v12 = vor.u32 %v9513_v4, %v6754_v3  ;;  %v6690_v28 = vld [vmem:[#allocation11 + $0xc8] sm:$0xf] }
  0xf8   :  { %v6850_v52 = vld [vmem:[#allocation11 + $0x208] sm:$0xf] }
  0xf9   :  { %v9697_v57 = vld [vmem:[#allocation11 + $0x724] sm:$0xf0] }
  0xfa   :  { %v7491_v3 = vor.u32 %v9697_v57, %v7490_v56  ;;  %v7426_v19 = vld [vmem:[#allocation11 + $0x688] sm:$0xf] }
  0xfb   :  { %v7138_v56 = vld [vmem:[#allocation11 + $0x448] sm:$0xf] }
  0xfc   :  { %v9609_v57 = vld [vmem:[#allocation11 + $0x464] sm:$0xf0] }
 0x134   :  { %v659_v29 = vpop.f32.mrf.mxu0 }
 0x135   :  { %v660_v30 = vadd.f32 %v659_v29, %v297_v27  ;;  %v672_v32 = vpop.f32.mrf.mxu1  ;;  %v6723_v27 = vor.u32 %v9505_v15, %v6722_v14  ;;  %v9633_v14 = vld [vmem:[#allocation11 + $0x524] sm:$0xf0] }
 0x137   :  { %v673_v33 = vadd.f32 %v672_v32, %v660_v30  ;;  %v9497_v32 = vld [vmem:[#allocation11 + $0xe4] sm:$0xf0] }
 0x138   :  { %v6691_v43 = vor.u32 %v9497_v32, %v6690_v28  ;;  %v9625_v28 = vld [vmem:[#allocation11 + $0x4e4] sm:$0xf0]  ;;  %v6788_v32 = vld [vmem:[#allocation11 + $0x1a8] sm:$0xf0] }
 0x139   :  { %v729_v38 = vmax.f32 %v673_v33, 0.0  ;;  %v7330_v33 = vld [vmem:[#allocation11 + $0x5c8] sm:$0xf] }
 0x13a   :  { %v633_v39 = vpop.f32.mrf.mxu2 }
 0x13b   :  { %v10558_v31 = vpack.c.bf16 %v729_v38, %v729_v38  ;;  %v634_v41 = vadd.f32 %v633_v39, %v296_v34  ;;  %v646_v42 = vpop.f32.mrf.mxu3  ;;  %v9657_v34 = vld [vmem:[#allocation11 + $0x5e4] sm:$0xf0] }
 0x13c   :  { %v661_v36 = vpop.f32.mrf.mxu0  ;;  %v6882_v38 = vld [vmem:[#allocation11 + $0x248] sm:$0xf]  ;;  %v7331_v44 = vor.u32 %v9657_v34, %v7330_v33  ;;  %v7015_v33 = vor.u32 %v9573_v24, %v7012_v25  ;;  %v7300_v24 = vld [vmem:[#allocation11 + $0x5a8] sm:$0xf0] }
 0x13d   :  { %v647_v45 = vadd.f32 %v646_v42, %v634_v41  ;;  %v674_v46 = vpop.f32.mrf.mxu1  ;;  %2311 = vmatmul.bf16.vlgmr.msra.gmra.mxu3 %v10558_v31  ;;  %v9545_v39 = vld [vmem:[#allocation11 + $0x264] sm:$0xf0] }
 0x13e   :  { %2407 = vmatpush.bf16.msra.mxu3 %v7075_v40  ;;  %v7522_v41 = vld [vmem:[#allocation11 + $0x748] sm:$0xf] }
 0x13f   :  { %v728_v50 = vmax.f32 %v647_v45, 0.0  ;;  %v9705_v42 = vld [vmem:[#allocation11 + $0x764] sm:$0xf0] }
 0x140   :  { %v6658_v36 = vld [vmem:[#allocation11 + $0x88] sm:$0xf]  ;;  %v7523_v51 = vor.u32 %v9705_v42, %v7522_v41 }
 0x141   :  { %v10561_v54 = vpack.c.bf16 %v728_v50, %v728_v50  ;;  %v9489_v46 = vld [vmem:[#allocation11 + $0xa4] sm:$0xf0]  ;;  %v6883_v50 = vor.u32 %v9545_v39, %v6882_v38  ;;  %v9565_v38 = vld [vmem:[#allocation11 + $0x30c] sm:$0xf] }
 0x142   :  { %2408 = vmatpush.bf16.msra.mxu3 %v7043_v49  ;;  %v635_v58 = vpop.f32.mrf.mxu2  ;;  %v7394_v34 = vld [vmem:[#allocation11 + $0x648] sm:$0xf]  ;;  %v6980_v39 = vld [vmem:[#allocation11 + $0x328] sm:$0xf0] }
 0x143   :  { %v648_v60 = vpop.f32.mrf.mxu3  ;;  %2298 = vmatmul.bf16.vlgmr.msra.gmra.mxu2 %v10561_v54  ;;  %v6659_v58 = vor.u32 %v9489_v46, %v6658_v36  ;;  %v7170_v41 = vld [vmem:[#allocation11 + $0x488] sm:$0xf]  ;;  %v6756_v36 = vld [vmem:[#allocation11 + $0x168] sm:$0xf0]  ;;  %v6983_v46 = vor.u32 %v9565_v38, %v6980_v39 }
 0x144   :  { %2394 = vmatpush.bf16.msra.mxu2 %v6819_v53  ;;  %v711_v63 = vpop.f32.mrf.mxu0  ;;  %v9589_v60 = vld [vmem:[#allocation11 + $0x3cc] sm:$0xf]  ;;  %v9617_v42 = vld [vmem:[#allocation11 + $0x4a4] sm:$0xf0] }
 0x145   :  { %v712_v1 = vadd.f32 %v711_v63, %v299_v55  ;;  %v724_v2 = vpop.f32.mrf.mxu1  ;;  %v9537_v55 = vld [vmem:[#allocation11 + $0x224] sm:$0xf0]  ;;  %v7079_v4 = vor.u32 %v9589_v60, %v7076_v61  ;;  %v6724_v60 = vld [vmem:[#allocation11 + $0x128] sm:$0xf0] }
 0x146   :  { %2409 = vmatpush.bf16.msra.mxu3 %v7011_v59  ;;  %v7299_v59 = vor.u32 %v9649_v48, %v7298_v47  ;;  %v9481_v63 = vld [vmem:[#allocation11 + $0x64] sm:$0xf0]  ;;  %v6628_v38 = vld [vmem:[#allocation11 + $0x68] sm:$0xf0] }
 0x147   :  { %v725_v8 = vadd.f32 %v724_v2, %v712_v1  ;;  %v9641_v1 = vld [vmem:[#allocation11 + $0x564] sm:$0xf0]  ;;  %v6851_v2 = vor.u32 %v9537_v55, %v6850_v52  ;;  %v6627_v7 = vor.u32 %v9481_v63, %v6626_v62  ;;  %v9717_v52 = vld [vmem:[#allocation11 + $0x7cc] sm:$0xf] }
 0x148   :  { %2395 = vmatpush.bf16.msra.mxu2 %v6787_v0  ;;  %v7266_v0 = vld [vmem:[#allocation11 + $0x548] sm:$0xf]  ;;  %v9549_v63 = vld [vmem:[#allocation11 + $0x28c] sm:$0xf] }
 0x149   :  { %v731_v13 = vmax.f32 %v725_v8, 0.0  ;;  %v7267_v8 = vor.u32 %v9641_v1, %v7266_v0  ;;  %v7362_v47 = vld [vmem:[#allocation11 + $0x608] sm:$0xf]  ;;  %v7139_v0 = vor.u32 %v9609_v57, %v7138_v56  ;;  %v6916_v1 = vld [vmem:[#allocation11 + $0x2a8] sm:$0xf0] }
 0x14a   :  { %2410 = vmatpush.bf16.msra.mxu3 %v6979_v5  ;;  %v685_v16 = vpop.f32.mrf.mxu2  ;;  %v7458_v5 = vld [vmem:[#allocation11 + $0x6c8] sm:$0xf]  ;;  %v9637_v39 = vld [vmem:[#allocation11 + $0x54c] sm:$0xf]  ;;  %v6826_v56 = vld [vmem:[#allocation11 + $0x1d0] sm:$0xf] }
 0x14b   :  { %v10566_v20 = vpack.c.bf16 %v731_v13, %v731_v13  ;;  %v686_v21 = vadd.f32 %v685_v16, %v298_v6  ;;  %v698_v22 = vpop.f32.mrf.mxu3  ;;  %v9689_v6 = vld [vmem:[#allocation11 + $0x6e4] sm:$0xf0]  ;;  %v9525_v16 = vld [vmem:[#allocation11 + $0x1cc] sm:$0xf]  ;;  %v9530_v57 = vld [vmem:[#allocation11 + $0x1ec] sm:$0xf0] }
 0x14c   :  { %2396 = vmatpush.bf16.msra.mxu2 %v6755_v12  ;;  %v713_v26 = vpop.f32.mrf.mxu0  ;;  %v9473_v12 = vld [vmem:[#allocation11 + $0x24] sm:$0xf0]  ;;  %v7459_v15 = vor.u32 %v9689_v6, %v7458_v5 }
 0x14d   :  { %v699_v29 = vadd.f32 %v698_v22, %v686_v21  ;;  %v726_v30 = vpop.f32.mrf.mxu1  ;;  %2337 = vmatmul.bf16.vlgmr.msrb.gmra.mxu1 %v10566_v20  ;;  %2363 = vmatmul.bf16.vlgmr.msrb.gmra.mxu3 %v10558_v31  ;;  %v7234_v13 = vld [vmem:[#allocation11 + $0x508] sm:$0xf]  ;;  %v6595_v22 = vor.u32 %v9473_v12, %v6594_v11  ;;  %v6919_v11 = vor.u32 %v9549_v63, %v6916_v1  ;;  %v7018_v63 = vld [vmem:[#allocation11 + $0x350] sm:$0xf] }
 0x14e   :  { %2411 = vmatpush.bf16.msra.mxu3 %v6947_v17  ;;  %2433 = vmatpush.bf16.msrb.mxu1 %v7587_v18  ;;  %v6820_v17 = vld [vmem:[#allocation11 + $0x1e8] sm:$0xf0]  ;;  %v7047_v18 = vor.u32 %v9581_v9, %v7044_v10  ;;  %v9681_v21 = vld [vmem:[#allocation11 + $0x6a4] sm:$0xf0]  ;;  %v7235_v23 = vor.u32 %v9633_v14, %v7234_v13  ;;  %v6827_v1 = vor.u32 %v9530_v57, %v6826_v56 }
 0x14f   :  { %v730_v40 = vmax.f32 %v699_v29, 0.0  ;;  %v6823_v26 = vor.u32 %v9525_v16, %v6820_v17  ;;  %v7427_v29 = vor.u32 %v9681_v21, %v7426_v19  ;;  %v9517_v30 = vld [vmem:[#allocation11 + $0x18c] sm:$0xf]  ;;  %v9665_v48 = vld [vmem:[#allocation11 + $0x624] sm:$0xf0] }
 0x150   :  { %2397 = vmatpush.bf16.msra.mxu2 %v6723_v27  ;;  %v7202_v27 = vld [vmem:[#allocation11 + $0x4c8] sm:$0xf]  ;;  %v9653_v9 = vld [vmem:[#allocation11 + $0x5cc] sm:$0xf] }
 0x151   :  { %v10570_v45 = vpack.c.bf16 %v730_v40, %v730_v40  ;;  %v6791_v40 = vor.u32 %v9517_v30, %v6788_v32  ;;  %v7106_v5 = vld [vmem:[#allocation11 + $0x408] sm:$0xf]  ;;  %v7332_v10 = vld [vmem:[#allocation11 + $0x5e8] sm:$0xf0] }
 0x152   :  { %2412 = vmatpush.bf16.msra.mxu3 %v6915_v35  ;;  %2434 = vmatpush.bf16.msrb.mxu1 %v7555_v37  ;;  %v687_v49 = vpop.f32.mrf.mxu2  ;;  %v9673_v35 = vld [vmem:[#allocation11 + $0x664] sm:$0xf0]  ;;  %v7203_v37 = vor.u32 %v9625_v28, %v7202_v27  ;;  %v9541_v13 = vld [vmem:[#allocation11 + $0x24c] sm:$0xf]  ;;  %v7335_v19 = vor.u32 %v9653_v9, %v7332_v10 }
 0x153   :  { %v700_v53 = vpop.f32.mrf.mxu3  ;;  %2324 = vmatmul.bf16.vlgmr.msrb.gmra.mxu0 %v10570_v45  ;;  %2350 = vmatmul.bf16.vlgmr.msrb.gmra.mxu2 %v10561_v54  ;;  %v9557_v49 = vld [vmem:[#allocation11 + $0x2cc] sm:$0xf]  ;;  %v9601_v6 = vld [vmem:[#allocation11 + $0x424] sm:$0xf0] }
 0x154   :  { %2398 = vmatpush.bf16.msra.mxu2 %v6691_v43  ;;  %2420 = vmatpush.bf16.msrb.mxu0 %v7331_v44  ;;  %v7395_v43 = vor.u32 %v9673_v35, %v7394_v34  ;;  %v9509_v44 = vld [vmem:[#allocation11 + $0x14c] sm:$0xf]  ;;  %v7107_v14 = vor.u32 %v9601_v6, %v7106_v5  ;;  %v7082_v34 = vld [vmem:[#allocation11 + $0x3d0] sm:$0xf] }
 0x155   :  { %v7588_v53 = vld [vmem:[#allocation11 + $0x7e8] sm:$0xf0]  ;;  %v6759_v55 = vor.u32 %v9509_v44, %v6756_v36  ;;  %v9594_v35 = vld [vmem:[#allocation11 + $0x3ec] sm:$0xf0] }
 0x156   :  { %2413 = vmatpush.bf16.msra.mxu3 %v6883_v50  ;;  %2435 = vmatpush.bf16.msrb.mxu1 %v7523_v51  ;;  %v7171_v50 = vor.u32 %v9617_v42, %v7170_v41  ;;  %v6948_v51 = vld [vmem:[#allocation11 + $0x2e8] sm:$0xf0]  ;;  %v7591_v62 = vor.u32 %v9717_v52, %v7588_v53  ;;  %v6794_v5 = vld [vmem:[#allocation11 + $0x190] sm:$0xf] }
 0x157   :  { %v6951_v61 = vor.u32 %v9557_v49, %v6948_v51  ;;  %v9701_v16 = vld [vmem:[#allocation11 + $0x74c] sm:$0xf]  ;;  %v9586_v49 = vld [vmem:[#allocation11 + $0x3ac] sm:$0xf0] }
 0x158   :  { %2399 = vmatpush.bf16.msra.mxu2 %v6659_v58  ;;  %2421 = vmatpush.bf16.msrb.mxu0 %v7299_v59  ;;  %v7363_v58 = vor.u32 %v9665_v48, %v7362_v47  ;;  %v9501_v59 = vld [vmem:[#allocation11 + $0x10c] sm:$0xf]  ;;  %v7050_v48 = vld [vmem:[#allocation11 + $0x390] sm:$0xf] }
 0x159   :  { %v7524_v17 = vld [vmem:[#allocation11 + $0x768] sm:$0xf0]  ;;  %v9522_v6 = vld [vmem:[#allocation11 + $0x1ac] sm:$0xf0] }
 0x15a   :  { %2414 = vmatpush.bf16.msra.mxu3 %v6851_v2  ;;  %2436 = vmatpush.bf16.msrb.mxu1 %v7491_v3  ;;  %v9709_v2 = vld [vmem:[#allocation11 + $0x78c] sm:$0xf] }
 0x15b   :  { %v7556_v3 = vld [vmem:[#allocation11 + $0x7a8] sm:$0xf0] }
 0x15c   :  { %2400 = vmatpush.bf16.msra.mxu2 %v6627_v7  ;;  %2422 = vmatpush.bf16.msrb.mxu0 %v7267_v8  ;;  %v9493_v7 = vld [vmem:[#allocation11 + $0xcc] sm:$0xf]  ;;  %v7559_v12 = vor.u32 %v9709_v2, %v7556_v3 }
 0x15d   :  { %2389 = vmatmul.bf16.vlgmr.msra.gmra.mxu1 %v10566_v20  ;;  %2415 = vmatmul.bf16.vlgmr.msra.gmra.mxu3 %v10558_v31  ;;  %v6692_v8 = vld [vmem:[#allocation11 + $0xe8] sm:$0xf0] }
 0x15e   :  { %2459 = vmatpush.bf16.msrb.mxu3 %v7079_v4  ;;  %2437 = vmatpush.bf16.msrb.mxu1 %v7459_v15  ;;  %v6727_v4 = vor.u32 %v9501_v59, %v6724_v60  ;;  %v6884_v15 = vld [vmem:[#allocation11 + $0x268] sm:$0xf0] }
 0x15f   :  { %v9485_v21 = vld [vmem:[#allocation11 + $0x8c] sm:$0xf]  ;;  %v6887_v25 = vor.u32 %v9541_v13, %v6884_v15  ;;  %v6795_v13 = vor.u32 %v9522_v6, %v6794_v5  ;;  %v9698_v5 = vld [vmem:[#allocation11 + $0x72c] sm:$0xf0] }
 0x160   :  { %2401 = vmatpush.bf16.msra.mxu2 %v6595_v22  ;;  %2423 = vmatpush.bf16.msrb.mxu0 %v7235_v23  ;;  %v6660_v22 = vld [vmem:[#allocation11 + $0xa8] sm:$0xf0] }
 0x161   :  { %v9645_v23 = vld [vmem:[#allocation11 + $0x58c] sm:$0xf]  ;;  %v6663_v32 = vor.u32 %v9485_v21, %v6660_v22 }
 0x162   :  { %2460 = vmatpush.bf16.msrb.mxu3 %v7047_v18  ;;  %2438 = vmatpush.bf16.msrb.mxu1 %v7427_v29  ;;  %v6695_v18 = vor.u32 %v9493_v7, %v6692_v8  ;;  %v9533_v27 = vld [vmem:[#allocation11 + $0x20c] sm:$0xf] }
 0x163   :  { %2376 = vmatmul.bf16.vlgmr.msra.gmra.mxu0 %v10570_v45  ;;  %2402 = vmatmul.bf16.vlgmr.msra.gmra.mxu2 %v10561_v54  ;;  %v6852_v28 = vld [vmem:[#allocation11 + $0x228] sm:$0xf0] }
 0x164   :  { %2446 = vmatpush.bf16.msrb.mxu2 %v6823_v26  ;;  %2424 = vmatpush.bf16.msrb.mxu0 %v7203_v37  ;;  %v7527_v26 = vor.u32 %v9701_v16, %v7524_v17  ;;  %v9693_v29 = vld [vmem:[#allocation11 + $0x70c] sm:$0xf]  ;;  %v6855_v41 = vor.u32 %v9533_v27, %v6852_v28  ;;  %v6762_v17 = vld [vmem:[#allocation11 + $0x150] sm:$0xf] }
 0x165   :  { %v7492_v30 = vld [vmem:[#allocation11 + $0x728] sm:$0xf0]  ;;  %v9722_v27 = vld [vmem:[#allocation11 + $0x7ec] sm:$0xf0] }
 0x166   :  { %2461 = vmatpush.bf16.msrb.mxu3 %v7015_v33  ;;  %2439 = vmatpush.bf16.msrb.mxu1 %v7395_v43  ;;  %v7303_v33 = vor.u32 %v9645_v23, %v7300_v24  ;;  %v9477_v37 = vld [vmem:[#allocation11 + $0x4c] sm:$0xf]  ;;  %v7495_v42 = vor.u32 %v9693_v29, %v7492_v30  ;;  %v7083_v43 = vor.u32 %v9594_v35, %v7082_v34  ;;  %v6954_v23 = vld [vmem:[#allocation11 + $0x2d0] sm:$0xf] }
 0x167   :  { %v9685_v44 = vld [vmem:[#allocation11 + $0x6cc] sm:$0xf]  ;;  %v9506_v34 = vld [vmem:[#allocation11 + $0x12c] sm:$0xf0] }
 0x168   :  { %2447 = vmatpush.bf16.msrb.mxu2 %v6791_v40  ;;  %2425 = vmatpush.bf16.msrb.mxu0 %v7171_v50  ;;  %v7268_v40 = vld [vmem:[#allocation11 + $0x568] sm:$0xf0] }
 0x169   :  { %v7460_v36 = vld [vmem:[#allocation11 + $0x6e8] sm:$0xf0]  ;;  %v7271_v47 = vor.u32 %v9637_v39, %v7268_v40  ;;  %v9554_v40 = vld [vmem:[#allocation11 + $0x2ac] sm:$0xf0] }
 0x16a   :  { %2462 = vmatpush.bf16.msrb.mxu3 %v6983_v46  ;;  %2440 = vmatpush.bf16.msrb.mxu1 %v7363_v58  ;;  %v6631_v46 = vor.u32 %v9477_v37, %v6628_v38  ;;  %v9469_v50 = vld [vmem:[#allocation11 + $0xc] sm:$0xf]  ;;  %v7051_v58 = vor.u32 %v9586_v49, %v7050_v48  ;;  %v6922_v38 = vld [vmem:[#allocation11 + $0x290] sm:$0xf] }
 0x16b   :  { %v6596_v51 = vld [vmem:[#allocation11 + $0x28] sm:$0xf0]  ;;  %v7338_v48 = vld [vmem:[#allocation11 + $0x5d0] sm:$0xf] }
 0x16c   :  { %2448 = vmatpush.bf16.msrb.mxu2 %v6759_v55  ;;  %2426 = vmatpush.bf16.msrb.mxu0 %v7139_v0  ;;  %v9629_v52 = vld [vmem:[#allocation11 + $0x50c] sm:$0xf]  ;;  %v7463_v55 = vor.u32 %v9685_v44, %v7460_v36  ;;  %v9578_v0 = vld [vmem:[#allocation11 + $0x36c] sm:$0xf0] }
 0x16d   :  { %2441 = vmatmul.bf16.vlgmr.msrb.gmra.mxu1 %v10566_v20  ;;  %v7236_v53 = vld [vmem:[#allocation11 + $0x528] sm:$0xf0]  ;;  %v7019_v7 = vor.u32 %v9578_v0, %v7018_v63  ;;  %v9658_v49 = vld [vmem:[#allocation11 + $0x5ec] sm:$0xf0] }
 0x16e   :  { %2463 = vmatpush.bf16.msrb.mxu3 %v6951_v61  ;;  %2485 = vmatpush.bf16.msra.mxu1 %v7591_v62  ;;  %v9677_v59 = vld [vmem:[#allocation11 + $0x68c] sm:$0xf]  ;;  %v6599_v61 = vor.u32 %v9469_v50, %v6596_v51  ;;  %v7239_v62 = vor.u32 %v9629_v52, %v7236_v53  ;;  %v6923_v50 = vor.u32 %v9554_v40, %v6922_v38  ;;  %v6890_v53 = vld [vmem:[#allocation11 + $0x250] sm:$0xf]  ;;  %v9574_v38 = vld [vmem:[#allocation11 + $0x354] sm:$0xf] }
 0x16f   :  { %v7428_v60 = vld [vmem:[#allocation11 + $0x6a8] sm:$0xf0]  ;;  %v7339_v57 = vor.u32 %v9658_v49, %v7338_v48  ;;  %v9650_v63 = vld [vmem:[#allocation11 + $0x5ac] sm:$0xf0]  ;;  %v7020_v40 = vld [vmem:[#allocation11 + $0x370] sm:$0xf0] }
 0x170   :  { %2449 = vmatpush.bf16.msrb.mxu2 %v6727_v4  ;;  %2427 = vmatpush.bf16.msrb.mxu0 %v7107_v14  ;;  %v9621_v2 = vld [vmem:[#allocation11 + $0x4cc] sm:$0xf]  ;;  %v7431_v4 = vor.u32 %v9677_v59, %v7428_v60  ;;  %v9706_v59 = vld [vmem:[#allocation11 + $0x76c] sm:$0xf0] }
 0x171   :  { %v7204_v3 = vld [vmem:[#allocation11 + $0x4e8] sm:$0xf0]  ;;  %v6666_v60 = vld [vmem:[#allocation11 + $0x90] sm:$0xf] }
 0x172   :  { %2464 = vmatpush.bf16.msrb.mxu3 %v6919_v11  ;;  %2486 = vmatpush.bf16.msra.mxu1 %v7559_v12  ;;  %v9669_v8 = vld [vmem:[#allocation11 + $0x64c] sm:$0xf]  ;;  %v7207_v10 = vor.u32 %v9621_v2, %v7204_v3  ;;  %v6986_v11 = vld [vmem:[#allocation11 + $0x310] sm:$0xf] }
 0x173   :  { %2428 = vmatmul.bf16.vlgmr.msrb.gmra.mxu0 %v10570_v45  ;;  %v7396_v9 = vld [vmem:[#allocation11 + $0x668] sm:$0xf0]  ;;  %v9570_v12 = vld [vmem:[#allocation11 + $0x32c] sm:$0xf0] }
 0x174   :  { %2450 = vmatpush.bf16.msrb.mxu2 %v6695_v18  ;;  %2472 = vmatpush.bf16.msra.mxu0 %v7335_v19  ;;  %v9613_v14 = vld [vmem:[#allocation11 + $0x48c] sm:$0xf]  ;;  %v7399_v16 = vor.u32 %v9669_v8, %v7396_v9  ;;  %v9514_v18 = vld [vmem:[#allocation11 + $0x16c] sm:$0xf0]  ;;  %v6987_v19 = vor.u32 %v9570_v12, %v6986_v11  ;;  %v9590_v8 = vld [vmem:[#allocation11 + $0x3d4] sm:$0xf] }
 0x175   :  { %v7172_v15 = vld [vmem:[#allocation11 + $0x4a8] sm:$0xf0]  ;;  %v6763_v28 = vor.u32 %v9514_v18, %v6762_v17  ;;  %v9538_v3 = vld [vmem:[#allocation11 + $0x22c] sm:$0xf0]  ;;  %v7084_v9 = vld [vmem:[#allocation11 + $0x3f0] sm:$0xf0] }
 0x176   :  { %2465 = vmatpush.bf16.msrb.mxu3 %v6887_v25  ;;  %2487 = vmatpush.bf16.msra.mxu1 %v7527_v26  ;;  %v9661_v21 = vld [vmem:[#allocation11 + $0x60c] sm:$0xf]  ;;  %v7175_v24 = vor.u32 %v9613_v14, %v7172_v15  ;;  %v9562_v25 = vld [vmem:[#allocation11 + $0x2ec] sm:$0xf0] }
 0x177   :  { %v7364_v22 = vld [vmem:[#allocation11 + $0x628] sm:$0xf0]  ;;  %v7594_v26 = vld [vmem:[#allocation11 + $0x7d0] sm:$0xf]  ;;  %v6955_v35 = vor.u32 %v9562_v25, %v6954_v23  ;;  %v7052_v23 = vld [vmem:[#allocation11 + $0x3b0] sm:$0xf0] }
 0x178   :  { %2451 = vmatpush.bf16.msrb.mxu2 %v6663_v32  ;;  %2473 = vmatpush.bf16.msra.mxu0 %v7303_v33  ;;  %v9605_v29 = vld [vmem:[#allocation11 + $0x44c] sm:$0xf]  ;;  %v7367_v32 = vor.u32 %v9661_v21, %v7364_v22  ;;  %v6730_v33 = vld [vmem:[#allocation11 + $0x110] sm:$0xf]  ;;  %v7595_v37 = vor.u32 %v9722_v27, %v7594_v26  ;;  %v9582_v22 = vld [vmem:[#allocation11 + $0x394] sm:$0xf] }
 0x179   :  { %v7140_v30 = vld [vmem:[#allocation11 + $0x468] sm:$0xf0]  ;;  %v9482_v11 = vld [vmem:[#allocation11 + $0x6c] sm:$0xf0] }
 0x17a   :  { %2466 = vmatpush.bf16.msrb.mxu3 %v6855_v41  ;;  %2488 = vmatpush.bf16.msra.mxu1 %v7495_v42  ;;  %v7143_v39 = vor.u32 %v9605_v29, %v7140_v30  ;;  %v7562_v41 = vld [vmem:[#allocation11 + $0x790] sm:$0xf]  ;;  %v9597_v44 = vld [vmem:[#allocation11 + $0x40c] sm:$0xf]  ;;  %v6828_v29 = vld [vmem:[#allocation11 + $0x1f0] sm:$0xf0] }
 0x17b   :  { %v9714_v42 = vld [vmem:[#allocation11 + $0x7ac] sm:$0xf0]  ;;  %v7108_v36 = vld [vmem:[#allocation11 + $0x428] sm:$0xf0] }
 0x17c   :  { %2452 = vmatpush.bf16.msrb.mxu2 %v6631_v46  ;;  %2474 = vmatpush.bf16.msra.mxu0 %v7271_v47  ;;  %v6698_v46 = vld [vmem:[#allocation11 + $0xd0] sm:$0xf]  ;;  %v7563_v51 = vor.u32 %v9714_v42, %v7562_v41  ;;  %v7111_v52 = vor.u32 %v9597_v44, %v7108_v36  ;;  %v6796_v44 = vld [vmem:[#allocation11 + $0x1b0] sm:$0xf0] }
 0x17d   :  { %2467 = vmatmul.bf16.vlgmr.msrb.gmra.mxu3 %v10558_v31  ;;  %v9498_v47 = vld [vmem:[#allocation11 + $0xec] sm:$0xf0] }
 0x17e   :  { %2511 = vmatpush.bf16.msra.mxu3 %v7083_v43  ;;  %2489 = vmatpush.bf16.msra.mxu1 %v7463_v55  ;;  %v6731_v43 = vor.u32 %v9506_v34, %v6730_v33  ;;  %v9546_v55 = vld [vmem:[#allocation11 + $0x26c] sm:$0xf0]  ;;  %v6699_v56 = vor.u32 %v9498_v47, %v6698_v46  ;;  %v7023_v46 = vor.u32 %v9574_v38, %v7020_v40  ;;  %v7308_v38 = vld [vmem:[#allocation11 + $0x5b0] sm:$0xf0] }
 0x17f   :  { %v6891_v0 = vor.u32 %v9546_v55, %v6890_v53  ;;  %v7274_v12 = vld [vmem:[#allocation11 + $0x550] sm:$0xf]  ;;  %v9534_v40 = vld [vmem:[#allocation11 + $0x214] sm:$0xf] }
 0x180   :  { %2453 = vmatpush.bf16.msrb.mxu2 %v6599_v61  ;;  %2475 = vmatpush.bf16.msra.mxu0 %v7239_v62  ;;  %v9490_v61 = vld [vmem:[#allocation11 + $0xac] sm:$0xf0] }
 0x181   :  { %v7306_v62 = vld [vmem:[#allocation11 + $0x590] sm:$0xf]  ;;  %v6667_v6 = vor.u32 %v9490_v61, %v6666_v60 }
 0x182   :  { %2512 = vmatpush.bf16.msra.mxu3 %v7051_v58  ;;  %2490 = vmatpush.bf16.msra.mxu1 %v7431_v4  ;;  %v7530_v58 = vld [vmem:[#allocation11 + $0x750] sm:$0xf] }
 0x183   :  { %2454 = vmatmul.bf16.vlgmr.msrb.gmra.mxu2 %v10561_v54  ;;  %v7531_v2 = vor.u32 %v9706_v59, %v7530_v58  ;;  %v7498_v4 = vld [vmem:[#allocation11 + $0x710] sm:$0xf] }
 0x184   :  { %2498 = vmatpush.bf16.msra.mxu2 %v6827_v1  ;;  %2476 = vmatpush.bf16.msra.mxu0 %v7207_v10  ;;  %v6858_v1 = vld [vmem:[#allocation11 + $0x210] sm:$0xf]  ;;  %v7499_v15 = vor.u32 %v9698_v5, %v7498_v4 }
 0x185   :  { %v6634_v10 = vld [vmem:[#allocation11 + $0x50] sm:$0xf]  ;;  %v6859_v14 = vor.u32 %v9538_v3, %v6858_v1  ;;  %v7596_v3 = vld [vmem:[#allocation11 + $0x7f0] sm:$0xf0] }
 0x186   :  { %2513 = vmatpush.bf16.msra.mxu3 %v7019_v7  ;;  %2491 = vmatpush.bf16.msra.mxu1 %v7399_v16  ;;  %v7307_v7 = vor.u32 %v9650_v63, %v7306_v62  ;;  %v7087_v16 = vor.u32 %v9590_v8, %v7084_v9  ;;  %v7466_v17 = vld [vmem:[#allocation11 + $0x6d0] sm:$0xf]  ;;  %v9558_v63 = vld [vmem:[#allocation11 + $0x2d4] sm:$0xf] }
 0x187   :  { %v9690_v18 = vld [vmem:[#allocation11 + $0x6ec] sm:$0xf0] }
 0x188   :  { %2499 = vmatpush.bf16.msra.mxu2 %v6795_v13  ;;  %2477 = vmatpush.bf16.msra.mxu0 %v7175_v24  ;;  %v9642_v13 = vld [vmem:[#allocation11 + $0x56c] sm:$0xf0]  ;;  %v7467_v30 = vor.u32 %v9690_v18, %v7466_v17 }
 0x189   :  { %v7275_v21 = vor.u32 %v9642_v13, %v7274_v12  ;;  %v6602_v24 = vld [vmem:[#allocation11 + $0x10] sm:$0xf]  ;;  %v6924_v12 = vld [vmem:[#allocation11 + $0x2b0] sm:$0xf0] }
 0x18a   :  { %2514 = vmatpush.bf16.msra.mxu3 %v6987_v19  ;;  %2492 = vmatpush.bf16.msra.mxu1 %v7367_v32  ;;  %v6635_v19 = vor.u32 %v9482_v11, %v6634_v10  ;;  %v9474_v25 = vld [vmem:[#allocation11 + $0x2c] sm:$0xf0]  ;;  %v7055_v32 = vor.u32 %v9582_v22, %v7052_v23  ;;  %v9550_v11 = vld [vmem:[#allocation11 + $0x294] sm:$0xf] }
 0x18b   :  { %v7242_v26 = vld [vmem:[#allocation11 + $0x510] sm:$0xf]  ;;  %v6603_v33 = vor.u32 %v9474_v25, %v6602_v24  ;;  %v9654_v22 = vld [vmem:[#allocation11 + $0x5d4] sm:$0xf]  ;;  %v6927_v24 = vor.u32 %v9550_v11, %v6924_v12  ;;  %v7026_v11 = vld [vmem:[#allocation11 + $0x358] sm:$0xf] }
 0x18c   :  { %2500 = vmatpush.bf16.msra.mxu2 %v6763_v28  ;;  %2478 = vmatpush.bf16.msra.mxu0 %v7143_v39  ;;  %v9634_v27 = vld [vmem:[#allocation11 + $0x52c] sm:$0xf0]  ;;  %v9526_v28 = vld [vmem:[#allocation11 + $0x1d4] sm:$0xf] }
 0x18d   :  { %2493 = vmatmul.bf16.vlgmr.msra.gmra.mxu1 %v10566_v20  ;;  %v7243_v34 = vor.u32 %v9634_v27, %v7242_v26  ;;  %v6831_v39 = vor.u32 %v9526_v28, %v6828_v29  ;;  %v7210_v41 = vld [vmem:[#allocation11 + $0x4d0] sm:$0xf]  ;;  %v7340_v23 = vld [vmem:[#allocation11 + $0x5f0] sm:$0xf0] }
 0x18e   :  { %2515 = vmatpush.bf16.msra.mxu3 %v6955_v35  ;;  %2537 = vmatpush.bf16.msrb.mxu1 %v7595_v37  ;;  %v7434_v35 = vld [vmem:[#allocation11 + $0x690] sm:$0xf]  ;;  %v9542_v28 = vld [vmem:[#allocation11 + $0x254] sm:$0xf] }
 0x18f   :  { %v9682_v37 = vld [vmem:[#allocation11 + $0x6ac] sm:$0xf0]  ;;  %v6892_v29 = vld [vmem:[#allocation11 + $0x270] sm:$0xf0] }
 0x190   :  { %2501 = vmatpush.bf16.msra.mxu2 %v6731_v43  ;;  %2479 = vmatpush.bf16.msra.mxu0 %v7111_v52  ;;  %v9626_v42 = vld [vmem:[#allocation11 + $0x4ec] sm:$0xf0]  ;;  %v9518_v43 = vld [vmem:[#allocation11 + $0x194] sm:$0xf]  ;;  %v7435_v36 = vor.u32 %v9682_v37, %v7434_v35 }
 0x191   :  { %v7211_v47 = vor.u32 %v9626_v42, %v7210_v41  ;;  %v7402_v48 = vld [vmem:[#allocation11 + $0x650] sm:$0xf]  ;;  %v6988_v52 = vld [vmem:[#allocation11 + $0x330] sm:$0xf0] }
 0x192   :  { %2516 = vmatpush.bf16.msra.mxu3 %v6923_v50  ;;  %2538 = vmatpush.bf16.msrb.mxu1 %v7563_v51  ;;  %v9674_v49 = vld [vmem:[#allocation11 + $0x66c] sm:$0xf0]  ;;  %v9566_v50 = vld [vmem:[#allocation11 + $0x314] sm:$0xf]  ;;  %v6799_v51 = vor.u32 %v9518_v43, %v6796_v44 }
 0x193   :  { %2480 = vmatmul.bf16.vlgmr.msra.gmra.mxu0 %v10570_v45  ;;  %v7178_v53 = vld [vmem:[#allocation11 + $0x490] sm:$0xf]  ;;  %v7403_v58 = vor.u32 %v9674_v49, %v7402_v48  ;;  %v6991_v60 = vor.u32 %v9566_v50, %v6988_v52  ;;  %v6668_v35 = vld [vmem:[#allocation11 + $0xb0] sm:$0xf0]  ;;  %v9595_v48 = vld [vmem:[#allocation11 + $0x3f4] sm:$0xf0] }
 0x194   :  { %2502 = vmatpush.bf16.msra.mxu2 %v6699_v56  ;;  %2524 = vmatpush.bf16.msrb.mxu0 %v7339_v57  ;;  %v9618_v55 = vld [vmem:[#allocation11 + $0x4ac] sm:$0xf0]  ;;  %v9510_v56 = vld [vmem:[#allocation11 + $0x154] sm:$0xf] }
 0x195   :  { %v6764_v57 = vld [vmem:[#allocation11 + $0x170] sm:$0xf0]  ;;  %v7370_v59 = vld [vmem:[#allocation11 + $0x610] sm:$0xf]  ;;  %v7179_v61 = vor.u32 %v9618_v55, %v7178_v53 }
 0x196   :  { %2517 = vmatpush.bf16.msra.mxu3 %v6891_v0  ;;  %2539 = vmatpush.bf16.msrb.mxu1 %v7531_v2  ;;  %v9666_v62 = vld [vmem:[#allocation11 + $0x62c] sm:$0xf0]  ;;  %v6956_v0 = vld [vmem:[#allocation11 + $0x2f0] sm:$0xf0]  ;;  %v6767_v1 = vor.u32 %v9510_v56, %v6764_v57 }
 0x197   :  { %v9718_v2 = vld [vmem:[#allocation11 + $0x7d4] sm:$0xf]  ;;  %v7146_v4 = vld [vmem:[#allocation11 + $0x450] sm:$0xf]  ;;  %v7371_v8 = vor.u32 %v9666_v62, %v7370_v59  ;;  %v6959_v9 = vor.u32 %v9558_v63, %v6956_v0  ;;  %v9587_v62 = vld [vmem:[#allocation11 + $0x3b4] sm:$0xf0] }
 0x198   :  { %2503 = vmatpush.bf16.msra.mxu2 %v6667_v6  ;;  %2525 = vmatpush.bf16.msrb.mxu0 %v7307_v7  ;;  %v9610_v5 = vld [vmem:[#allocation11 + $0x46c] sm:$0xf0]  ;;  %v9502_v6 = vld [vmem:[#allocation11 + $0x114] sm:$0xf]  ;;  %v7599_v10 = vor.u32 %v9718_v2, %v7596_v3  ;;  %v6834_v3 = vld [vmem:[#allocation11 + $0x1d8] sm:$0xf] }
 0x199   :  { %v6732_v7 = vld [vmem:[#allocation11 + $0x130] sm:$0xf0]  ;;  %v7147_v13 = vor.u32 %v9610_v5, %v7146_v4  ;;  %v7114_v17 = vld [vmem:[#allocation11 + $0x410] sm:$0xf]  ;;  %v9531_v4 = vld [vmem:[#allocation11 + $0x1f4] sm:$0xf0] }
 0x19a   :  { %2518 = vmatpush.bf16.msra.mxu3 %v6859_v14  ;;  %2540 = vmatpush.bf16.msrb.mxu1 %v7499_v15  ;;  %v6735_v14 = vor.u32 %v9502_v6, %v6732_v7  ;;  %v9710_v15 = vld [vmem:[#allocation11 + $0x794] sm:$0xf]  ;;  %v9602_v18 = vld [vmem:[#allocation11 + $0x42c] sm:$0xf0]  ;;  %v6835_v12 = vor.u32 %v9531_v4, %v6834_v3 }
 0x19b   :  { %v7115_v26 = vor.u32 %v9602_v18, %v7114_v17  ;;  %v9646_v37 = vld [vmem:[#allocation11 + $0x594] sm:$0xf]  ;;  %v9523_v17 = vld [vmem:[#allocation11 + $0x1b4] sm:$0xf0] }
 0x19c   :  { %2504 = vmatpush.bf16.msra.mxu2 %v6635_v19  ;;  %2526 = vmatpush.bf16.msrb.mxu0 %v7275_v21  ;;  %v9494_v19 = vld [vmem:[#allocation11 + $0xd4] sm:$0xf] }
 0x19d   :  { %2519 = vmatmul.bf16.vlgmr.msra.gmra.mxu3 %v10558_v31  ;;  %v6700_v21 = vld [vmem:[#allocation11 + $0xf0] sm:$0xf0] }
 0x19e   :  { %2563 = vmatpush.bf16.msrb.mxu3 %v7087_v16  ;;  %2541 = vmatpush.bf16.msrb.mxu1 %v7467_v30  ;;  %v7564_v16 = vld [vmem:[#allocation11 + $0x7b0] sm:$0xf0]  ;;  %v6703_v27 = vor.u32 %v9494_v19, %v6700_v21 }
 0x19f   :  { %v7567_v25 = vor.u32 %v9710_v15, %v7564_v16  ;;  %v9702_v30 = vld [vmem:[#allocation11 + $0x754] sm:$0xf]  ;;  %v6802_v16 = vld [vmem:[#allocation11 + $0x198] sm:$0xf] }
 0x1a0   :  { %2505 = vmatpush.bf16.msra.mxu2 %v6603_v33  ;;  %2527 = vmatpush.bf16.msrb.mxu0 %v7243_v34  ;;  %v7532_v33 = vld [vmem:[#allocation11 + $0x770] sm:$0xf0] }
 0x1a1   :  { %v9486_v34 = vld [vmem:[#allocation11 + $0x94] sm:$0xf]  ;;  %v7535_v41 = vor.u32 %v9702_v30, %v7532_v33  ;;  %v9515_v30 = vld [vmem:[#allocation11 + $0x174] sm:$0xf0] }
 0x1a2   :  { %2564 = vmatpush.bf16.msrb.mxu3 %v7055_v32  ;;  %2542 = vmatpush.bf16.msrb.mxu1 %v7435_v36  ;;  %v7343_v32 = vor.u32 %v9654_v22, %v7340_v23  ;;  %v6671_v42 = vor.u32 %v9486_v34, %v6668_v35  ;;  %v6860_v43 = vld [vmem:[#allocation11 + $0x230] sm:$0xf0] }
 0x1a3   :  { %2506 = vmatmul.bf16.vlgmr.msra.gmra.mxu2 %v10561_v54  ;;  %v9694_v44 = vld [vmem:[#allocation11 + $0x714] sm:$0xf]  ;;  %v6863_v53 = vor.u32 %v9534_v40, %v6860_v43 }
 0x1a4   :  { %2550 = vmatpush.bf16.msrb.mxu2 %v6831_v39  ;;  %2528 = vmatpush.bf16.msrb.mxu0 %v7211_v47  ;;  %v6895_v39 = vor.u32 %v9542_v28, %v6892_v29  ;;  %v7500_v36 = vld [vmem:[#allocation11 + $0x730] sm:$0xf0]  ;;  %v7090_v47 = vld [vmem:[#allocation11 + $0x3d8] sm:$0xf] }
 0x1a5   :  { %v9478_v49 = vld [vmem:[#allocation11 + $0x54] sm:$0xf]  ;;  %v7503_v55 = vor.u32 %v9694_v44, %v7500_v36  ;;  %v7091_v56 = vor.u32 %v9595_v48, %v7090_v47  ;;  %v6770_v29 = vld [vmem:[#allocation11 + $0x158] sm:$0xf] }
 0x1a6   :  { %2565 = vmatpush.bf16.msrb.mxu3 %v7023_v46  ;;  %2543 = vmatpush.bf16.msrb.mxu1 %v7403_v58  ;;  %v7311_v46 = vor.u32 %v9646_v37, %v7308_v38  ;;  %v6636_v50 = vld [vmem:[#allocation11 + $0x70] sm:$0xf0]  ;;  %v6962_v38 = vld [vmem:[#allocation11 + $0x2d8] sm:$0xf]  ;;  %v6771_v40 = vor.u32 %v9515_v30, %v6770_v29  ;;  %v9591_v29 = vld [vmem:[#allocation11 + $0x3dc] sm:$0xf] }
 0x1a7   :  { %v7276_v52 = vld [vmem:[#allocation11 + $0x570] sm:$0xf0]  ;;  %v6639_v59 = vor.u32 %v9478_v49, %v6636_v50  ;;  %v6738_v36 = vld [vmem:[#allocation11 + $0x118] sm:$0xf]  ;;  %v7092_v30 = vld [vmem:[#allocation11 + $0x3f8] sm:$0xf0] }
 0x1a8   :  { %2551 = vmatpush.bf16.msrb.mxu2 %v6799_v51  ;;  %2529 = vmatpush.bf16.msrb.mxu0 %v7179_v61  ;;  %v9638_v51 = vld [vmem:[#allocation11 + $0x554] sm:$0xf]  ;;  %v7058_v61 = vld [vmem:[#allocation11 + $0x398] sm:$0xf] }
 0x1a9   :  { %v9686_v57 = vld [vmem:[#allocation11 + $0x6d4] sm:$0xf]  ;;  %v7059_v6 = vor.u32 %v9587_v62, %v7058_v61  ;;  %v6706_v61 = vld [vmem:[#allocation11 + $0xd8] sm:$0xf] }
 0x1aa   :  { %2566 = vmatpush.bf16.msrb.mxu3 %v6991_v60  ;;  %2544 = vmatpush.bf16.msrb.mxu1 %v7371_v8  ;;  %v7468_v58 = vld [vmem:[#allocation11 + $0x6f0] sm:$0xf0]  ;;  %v7279_v60 = vor.u32 %v9638_v51, %v7276_v52  ;;  %v6930_v51 = vld [vmem:[#allocation11 + $0x298] sm:$0xf] }
 0x1ab   :  { %v9470_v63 = vld [vmem:[#allocation11 + $0x14] sm:$0xf]  ;;  %v7471_v5 = vor.u32 %v9686_v57, %v7468_v58  ;;  %v9555_v52 = vld [vmem:[#allocation11 + $0x2b4] sm:$0xf0] }
 0x1ac   :  { %2552 = vmatpush.bf16.msrb.mxu2 %v6767_v1  ;;  %2530 = vmatpush.bf16.msrb.mxu0 %v7147_v13  ;;  %v6604_v0 = vld [vmem:[#allocation11 + $0x30] sm:$0xf0]  ;;  %v9579_v13 = vld [vmem:[#allocation11 + $0x374] sm:$0xf0] }
 0x1ad   :  { %2545 = vmatmul.bf16.vlgmr.msrb.gmra.mxu1 %v10566_v20  ;;  %v9630_v1 = vld [vmem:[#allocation11 + $0x514] sm:$0xf]  ;;  %v6607_v7 = vor.u32 %v9470_v63, %v6604_v0  ;;  %v7027_v19 = vor.u32 %v9579_v13, %v7026_v11  ;;  %v7570_v57 = vld [vmem:[#allocation11 + $0x798] sm:$0xf] }
 0x1ae   :  { %2567 = vmatpush.bf16.msrb.mxu3 %v6959_v9  ;;  %2589 = vmatpush.bf16.msra.mxu1 %v7599_v10  ;;  %v7244_v2 = vld [vmem:[#allocation11 + $0x530] sm:$0xf0]  ;;  %v9715_v58 = vld [vmem:[#allocation11 + $0x7b4] sm:$0xf0] }
 0x1af   :  { %v7247_v8 = vor.u32 %v9630_v1, %v7244_v2  ;;  %v9678_v9 = vld [vmem:[#allocation11 + $0x694] sm:$0xf]  ;;  %v9499_v62 = vld [vmem:[#allocation11 + $0xf4] sm:$0xf0]  ;;  %v6931_v2 = vor.u32 %v9555_v52, %v6930_v51  ;;  %v7571_v3 = vor.u32 %v9715_v58, %v7570_v57 }
 0x1b0   :  { %2553 = vmatpush.bf16.msrb.mxu2 %v6735_v14  ;;  %2531 = vmatpush.bf16.msrb.mxu0 %v7115_v26  ;;  %v7436_v10 = vld [vmem:[#allocation11 + $0x6b0] sm:$0xf0]  ;;  %v9571_v26 = vld [vmem:[#allocation11 + $0x334] sm:$0xf0] }
 0x1b1   :  { %v9622_v14 = vld [vmem:[#allocation11 + $0x4d4] sm:$0xf]  ;;  %v7439_v18 = vor.u32 %v9678_v9, %v7436_v10  ;;  %v7346_v0 = vld [vmem:[#allocation11 + $0x5d8] sm:$0xf] }
 0x1b2   :  { %2568 = vmatpush.bf16.msrb.mxu3 %v6927_v24  ;;  %2590 = vmatpush.bf16.msra.mxu1 %v7567_v25  ;;  %v7212_v15 = vld [vmem:[#allocation11 + $0x4f0] sm:$0xf0]  ;;  %v6994_v24 = vld [vmem:[#allocation11 + $0x318] sm:$0xf]  ;;  %v6803_v25 = vor.u32 %v9523_v17, %v6802_v16 }
 0x1b3   :  { %2532 = vmatmul.bf16.vlgmr.msrb.gmra.mxu0 %v10570_v45  ;;  %v7215_v21 = vor.u32 %v9622_v14, %v7212_v15  ;;  %v9670_v22 = vld [vmem:[#allocation11 + $0x654] sm:$0xf]  ;;  %v6995_v34 = vor.u32 %v9571_v26, %v6994_v24  ;;  %v9659_v1 = vld [vmem:[#allocation11 + $0x5f4] sm:$0xf0] }
 0x1b4   :  { %2554 = vmatpush.bf16.msrb.mxu2 %v6703_v27  ;;  %2576 = vmatpush.bf16.msra.mxu0 %v7343_v32  ;;  %v7404_v23 = vld [vmem:[#allocation11 + $0x670] sm:$0xf0]  ;;  %v7347_v10 = vor.u32 %v9659_v1, %v7346_v0  ;;  %v9707_v11 = vld [vmem:[#allocation11 + $0x774] sm:$0xf0]  ;;  %v9575_v1 = vld [vmem:[#allocation11 + $0x35c] sm:$0xf] }
 0x1b5   :  { %v9614_v27 = vld [vmem:[#allocation11 + $0x494] sm:$0xf]  ;;  %v7407_v32 = vor.u32 %v9670_v22, %v7404_v23  ;;  %v9491_v13 = vld [vmem:[#allocation11 + $0xb4] sm:$0xf0] }
 0x1b6   :  { %2569 = vmatpush.bf16.msrb.mxu3 %v6895_v39  ;;  %2591 = vmatpush.bf16.msra.mxu1 %v7535_v41  ;;  %v7180_v28 = vld [vmem:[#allocation11 + $0x4b0] sm:$0xf0]  ;;  %v9563_v39 = vld [vmem:[#allocation11 + $0x2f4] sm:$0xf0] }
 0x1b7   :  { %v9662_v33 = vld [vmem:[#allocation11 + $0x614] sm:$0xf]  ;;  %v7183_v35 = vor.u32 %v9614_v27, %v7180_v28  ;;  %v7602_v41 = vld [vmem:[#allocation11 + $0x7d8] sm:$0xf]  ;;  %v6963_v49 = vor.u32 %v9563_v39, %v6962_v38  ;;  %v7095_v39 = vor.u32 %v9591_v29, %v7092_v30 }
 0x1b8   :  { %2555 = vmatpush.bf16.msrb.mxu2 %v6671_v42  ;;  %2577 = vmatpush.bf16.msra.mxu0 %v7311_v46  ;;  %v7372_v37 = vld [vmem:[#allocation11 + $0x630] sm:$0xf0]  ;;  %v9723_v42 = vld [vmem:[#allocation11 + $0x7f4] sm:$0xf0] }
 0x1b9   :  { %v9606_v43 = vld [vmem:[#allocation11 + $0x454] sm:$0xf]  ;;  %v9507_v46 = vld [vmem:[#allocation11 + $0x134] sm:$0xf0]  ;;  %v7375_v47 = vor.u32 %v9662_v33, %v7372_v37  ;;  %v7603_v50 = vor.u32 %v9723_v42, %v7602_v41 }
 0x1ba   :  { %2570 = vmatpush.bf16.msrb.mxu3 %v6863_v53  ;;  %2592 = vmatpush.bf16.msra.mxu1 %v7503_v55  ;;  %v7148_v44 = vld [vmem:[#allocation11 + $0x470] sm:$0xf0]  ;;  %v10590_v53 = vld [vmem:[#allocation13] sm:$0xff]  ;;  %v7314_v15 = vld [vmem:[#allocation11 + $0x598] sm:$0xf] }
 0x1bb   :  { %v7151_v55 = vor.u32 %v9606_v43, %v7148_v44  ;;  %v994_v63 = vperm.slane %v10590_v53, 0  ;;  %v9651_v16 = vld [vmem:[#allocation11 + $0x5b4] sm:$0xf0] }
 0x1bc   :  { %2556 = vmatpush.bf16.msrb.mxu2 %v6639_v59  ;;  %2578 = vmatpush.bf16.msra.mxu0 %v7279_v60  ;;  %v9598_v59 = vld [vmem:[#allocation11 + $0x414] sm:$0xf]  ;;  %v9539_v23 = vld [vmem:[#allocation11 + $0x234] sm:$0xf0]  ;;  %v7315_v28 = vor.u32 %v9651_v16, %v7314_v15  ;;  %v9567_v15 = vld [vmem:[#allocation11 + $0x31c] sm:$0xf] }
 0x1bd   :  { %2571 = vmatmul.bf16.vlgmr.msrb.gmra.mxu3 %v10558_v31  ;;  %v7116_v60 = vld [vmem:[#allocation11 + $0x430] sm:$0xf0]  ;;  %v7506_v24 = vld [vmem:[#allocation11 + $0x718] sm:$0xf] }
 0x1be   :  { %2615 = vmatpush.bf16.msra.mxu3 %v7091_v56  ;;  %2593 = vmatpush.bf16.msra.mxu1 %v7471_v5  ;;  %v6739_v56 = vor.u32 %v9507_v46, %v6738_v36  ;;  %v7119_v4 = vor.u32 %v9598_v59, %v7116_v60  ;;  %v6707_v5 = vor.u32 %v9499_v62, %v6706_v61  ;;  %v9483_v33 = vld [vmem:[#allocation11 + $0x74] sm:$0xf0]  ;;  %v9583_v36 = vld [vmem:[#allocation11 + $0x39c] sm:$0xf] }
 0x1bf   :  { %v9691_v41 = vld [vmem:[#allocation11 + $0x6f4] sm:$0xf0]  ;;  %v7060_v46 = vld [vmem:[#allocation11 + $0x3b8] sm:$0xf0] }
 0x1c0   :  { %2557 = vmatpush.bf16.msrb.mxu2 %v6607_v7  ;;  %2579 = vmatpush.bf16.msra.mxu0 %v7247_v8  ;;  %v2312_v48 = vpop.f32.mrf.mxu3  ;;  %v9547_v7 = vld [vmem:[#allocation11 + $0x274] sm:$0xf0]  ;;  %v7063_v59 = vor.u32 %v9583_v36, %v7060_v46  ;;  %v9551_v46 = vld [vmem:[#allocation11 + $0x29c] sm:$0xf] }
 0x1c1   :  { %v7538_v8 = vld [vmem:[#allocation11 + $0x758] sm:$0xf] }
 0x1c2   :  { %2616 = vmatpush.bf16.msra.mxu3 %v7059_v6  ;;  %2594 = vmatpush.bf16.msra.mxu1 %v7439_v18  ;;  %v6898_v6 = vld [vmem:[#allocation11 + $0x258] sm:$0xf] }
 0x1c3   :  { %2558 = vmatmul.bf16.vlgmr.msrb.gmra.mxu2 %v10561_v54  ;;  %v6899_v18 = vor.u32 %v9547_v7, %v6898_v6  ;;  %v9683_v0 = vld [vmem:[#allocation11 + $0x6b4] sm:$0xf0]  ;;  %v9519_v7 = vld [vmem:[#allocation11 + $0x19c] sm:$0xf] }
 0x1c4   :  { %2602 = vmatpush.bf16.msra.mxu2 %v6835_v12  ;;  %2580 = vmatpush.bf16.msra.mxu0 %v7215_v21  ;;  %v6674_v12 = vld [vmem:[#allocation11 + $0x98] sm:$0xf]  ;;  %v7539_v21 = vor.u32 %v9707_v11, %v7538_v8  ;;  %v6804_v8 = vld [vmem:[#allocation11 + $0x1b8] sm:$0xf0] }
 0x1c5   :  { %v6675_v22 = vor.u32 %v9491_v13, %v6674_v12  ;;  %v9627_v6 = vld [vmem:[#allocation11 + $0x4f4] sm:$0xf0]  ;;  %v6807_v16 = vor.u32 %v9519_v7, %v6804_v8  ;;  %v9703_v7 = vld [vmem:[#allocation11 + $0x75c] sm:$0xf] }
 0x1c6   :  { %2617 = vmatpush.bf16.msra.mxu3 %v7027_v19  ;;  %2595 = vmatpush.bf16.msra.mxu1 %v7407_v32  ;;  %v2299_v9 = vpop.f32.mrf.mxu2  ;;  %v6866_v19 = vld [vmem:[#allocation11 + $0x218] sm:$0xf] }
 0x1c7   :  { %v2300_v14 = vadd.f32 %v2299_v9, %v994_v63  ;;  %v6642_v32 = vld [vmem:[#allocation11 + $0x58] sm:$0xf]  ;;  %v6867_v37 = vor.u32 %v9539_v23, %v6866_v19  ;;  %v9511_v23 = vld [vmem:[#allocation11 + $0x15c] sm:$0xf] }
 0x1c8   :  { %2603 = vmatpush.bf16.msra.mxu2 %v6803_v25  ;;  %2581 = vmatpush.bf16.msra.mxu0 %v7183_v35  ;;  %v2314_v17 = vpop.f32.mrf.mxu3  ;;  %v9699_v25 = vld [vmem:[#allocation11 + $0x734] sm:$0xf0]  ;;  %v6643_v43 = vor.u32 %v9483_v33, %v6642_v32  ;;  %v9559_v32 = vld [vmem:[#allocation11 + $0x2dc] sm:$0xf] }
 0x1c9   :  { %v2313_v26 = vadd.f32 %v2312_v48, %v2300_v14  ;;  %v9643_v35 = vld [vmem:[#allocation11 + $0x574] sm:$0xf0]  ;;  %v7507_v38 = vor.u32 %v9699_v25, %v7506_v24  ;;  %v6996_v17 = vld [vmem:[#allocation11 + $0x338] sm:$0xf0] }
 0x1ca   :  { %2618 = vmatpush.bf16.msra.mxu3 %v6995_v34  ;;  %2596 = vmatpush.bf16.msra.mxu1 %v7375_v47  ;;  %v2338_v27 = vpop.f32.mrf.mxu1  ;;  %v7282_v34 = vld [vmem:[#allocation11 + $0x558] sm:$0xf]  ;;  %v6772_v24 = vld [vmem:[#allocation11 + $0x178] sm:$0xf0] }
 0x1cb   :  { %v7283_v44 = vor.u32 %v9643_v35, %v7282_v34  ;;  %v6610_v47 = vld [vmem:[#allocation11 + $0x18] sm:$0xf]  ;;  %v6964_v33 = vld [vmem:[#allocation11 + $0x2f8] sm:$0xf0]  ;;  %v6775_v34 = vor.u32 %v9511_v23, %v6772_v24 }
 0x1cc   :  { %2604 = vmatpush.bf16.msra.mxu2 %v6771_v40  ;;  %2582 = vmatpush.bf16.msra.mxu0 %v7151_v55  ;;  %v7474_v40 = vld [vmem:[#allocation11 + $0x6d8] sm:$0xf]  ;;  %v9527_v55 = vld [vmem:[#allocation11 + $0x1dc] sm:$0xf] }
 0x1cd   :  { %2597 = vmatmul.bf16.vlgmr.msra.gmra.mxu1 %v10566_v20  ;;  %v9475_v48 = vld [vmem:[#allocation11 + $0x34] sm:$0xf0]  ;;  %v7475_v58 = vor.u32 %v9691_v41, %v7474_v40  ;;  %v9719_v35 = vld [vmem:[#allocation11 + $0x7dc] sm:$0xf] }
 0x1ce   :  { %2619 = vmatpush.bf16.msra.mxu3 %v6963_v49  ;;  %2641 = vmatpush.bf16.msrb.mxu1 %v7603_v50  ;;  %v2301_v42 = vpop.f32.mrf.mxu2  ;;  %v7250_v49 = vld [vmem:[#allocation11 + $0x518] sm:$0xf]  ;;  %v6611_v61 = vor.u32 %v9475_v48, %v6610_v47  ;;  %v9503_v40 = vld [vmem:[#allocation11 + $0x11c] sm:$0xf] }
 0x1cf   :  { %v9635_v50 = vld [vmem:[#allocation11 + $0x534] sm:$0xf0]  ;;  %v6740_v41 = vld [vmem:[#allocation11 + $0x138] sm:$0xf0] }
 0x1d0   :  { %2605 = vmatpush.bf16.msra.mxu2 %v6739_v56  ;;  %2583 = vmatpush.bf16.msra.mxu0 %v7119_v4  ;;  %v2325_v51 = vpop.f32.mrf.mxu0  ;;  %v10595_v52 = vpop.f32.mrf.mxu3  ;;  %v6836_v56 = vld [vmem:[#allocation11 + $0x1f8] sm:$0xf0]  ;;  %v7251_v62 = vor.u32 %v9635_v50, %v7250_v49  ;;  %v7442_v63 = vld [vmem:[#allocation11 + $0x698] sm:$0xf]  ;;  %v6743_v49 = vor.u32 %v9503_v40, %v6740_v41 }
 0x1d1   :  { %v2326_v57 = vadd.f32 %v2325_v51, %v2313_v26  ;;  %v7028_v4 = vld [vmem:[#allocation11 + $0x378] sm:$0xf0]  ;;  %v7443_v9 = vor.u32 %v9683_v0, %v7442_v63  ;;  %v7410_v13 = vld [vmem:[#allocation11 + $0x658] sm:$0xf] }
 0x1d2   :  { %2620 = vmatpush.bf16.msra.mxu3 %v6931_v2  ;;  %2642 = vmatpush.bf16.msrb.mxu1 %v7571_v3  ;;  %v2340_v60 = vpop.f32.mrf.mxu1  ;;  %v6839_v3 = vor.u32 %v9527_v55, %v6836_v56  ;;  %v7031_v11 = vor.u32 %v9575_v1, %v7028_v4  ;;  %v9675_v14 = vld [vmem:[#allocation11 + $0x674] sm:$0xf0]  ;;  %v6932_v47 = vld [vmem:[#allocation11 + $0x2b8] sm:$0xf0] }
 0x1d3   :  { %2584 = vmatmul.bf16.vlgmr.msra.gmra.mxu0 %v10570_v45  ;;  %v10597_v2 = vadd.f32 %v2338_v27, %v2326_v57  ;;  %v9619_v19 = vld [vmem:[#allocation11 + $0x4b4] sm:$0xf0]  ;;  %v7411_v25 = vor.u32 %v9675_v14, %v7410_v13  ;;  %v9711_v50 = vld [vmem:[#allocation11 + $0x79c] sm:$0xf]  ;;  %v6935_v0 = vor.u32 %v9551_v46, %v6932_v47 }
 0x1d4   :  { %2606 = vmatpush.bf16.msra.mxu2 %v6707_v5  ;;  %2628 = vmatpush.bf16.msrb.mxu0 %v7347_v10  ;;  %v7218_v5 = vld [vmem:[#allocation11 + $0x4d8] sm:$0xf]  ;;  %v7572_v51 = vld [vmem:[#allocation11 + $0x7b8] sm:$0xf0] }
 0x1d5   :  { %v7219_v12 = vor.u32 %v9627_v6, %v7218_v5  ;;  %v7378_v26 = vld [vmem:[#allocation11 + $0x618] sm:$0xf]  ;;  %v6708_v60 = vld [vmem:[#allocation11 + $0xf8] sm:$0xf0]  ;;  %v7575_v1 = vor.u32 %v9711_v50, %v7572_v51  ;;  %v7806_v50 = vld [vmem:[#allocation14 + $0x188] sm:$0xf] }
 0x1d6   :  { %2621 = vmatpush.bf16.msra.mxu3 %v6899_v18  ;;  %2643 = vmatpush.bf16.msrb.mxu1 %v7539_v21  ;;  %v10600_v10 = vpop.f32.mrf.mxu2  ;;  %v7186_v18 = vld [vmem:[#allocation11 + $0x498] sm:$0xf]  ;;  %v9543_v5 = vld [vmem:[#allocation11 + $0x25c] sm:$0xf]  ;;  %v9776_v51 = vld [vmem:[#allocation14 + $0x1a0] sm:$0xf0] }
 0x1d7   :  { %v7187_v29 = vor.u32 %v9619_v19, %v7186_v18  ;;  %v9667_v30 = vld [vmem:[#allocation11 + $0x634] sm:$0xf0]  ;;  %v6900_v6 = vld [vmem:[#allocation11 + $0x278] sm:$0xf0] }
 0x1d8   :  { %2607 = vmatpush.bf16.msra.mxu2 %v6675_v22  ;;  %2629 = vmatpush.bf16.msrb.mxu0 %v7315_v28  ;;  %v2327_v21 = vpop.f32.mrf.mxu0  ;;  %v2366_v22 = vpop.f32.mrf.mxu3  ;;  %v6999_v28 = vor.u32 %v9567_v15, %v6996_v17  ;;  %v7379_v42 = vor.u32 %v9667_v30, %v7378_v26  ;;  %v7122_v55 = vld [vmem:[#allocation11 + $0x418] sm:$0xf]  ;;  %v9647_v13 = vld [vmem:[#allocation11 + $0x59c] sm:$0xf]  ;;  %v6903_v15 = vor.u32 %v9543_v5, %v6900_v6 }
 0x1d9   :  { %v7316_v14 = vld [vmem:[#allocation11 + $0x5b8] sm:$0xf0] }
 0x1da   :  { %2622 = vmatpush.bf16.msra.mxu3 %v6867_v37  ;;  %2644 = vmatpush.bf16.msrb.mxu1 %v7507_v38  ;;  %v10603_v27 = vpop.f32.mrf.mxu1  ;;  %v7604_v37 = vld [vmem:[#allocation11 + $0x7f8] sm:$0xf0]  ;;  %v7154_v38 = vld [vmem:[#allocation11 + $0x458] sm:$0xf]  ;;  %v7319_v26 = vor.u32 %v9647_v13, %v7316_v14 }
 0x1db   :  { %v7607_v36 = vor.u32 %v9719_v35, %v7604_v37  ;;  %v6868_v21 = vld [vmem:[#allocation11 + $0x238] sm:$0xf0] }
 0x1dc   :  { %2608 = vmatpush.bf16.msra.mxu2 %v6643_v43  ;;  %2630 = vmatpush.bf16.msrb.mxu0 %v7283_v44  ;;  %v6967_v44 = vor.u32 %v9559_v32, %v6964_v33  ;;  %v9695_v22 = vld [vmem:[#allocation11 + $0x71c] sm:$0xf] }
 0x1dd   :  { %2623 = vmatmul.bf16.vlgmr.msra.gmra.mxu3 %v10558_v31  ;;  %v7508_v23 = vld [vmem:[#allocation11 + $0x738] sm:$0xf0] }
 0x1de   :  { %2667 = vmatpush.bf16.msrb.mxu3 %v7095_v39  ;;  %2645 = vmatpush.bf16.msrb.mxu1 %v7475_v58  ;;  %v9611_v39 = vld [vmem:[#allocation11 + $0x474] sm:$0xf0]  ;;  %v2353_v43 = vpop.f32.mrf.mxu2  ;;  %v9479_v30 = vld [vmem:[#allocation11 + $0x5c] sm:$0xf] }
 0x1df   :  { %v7155_v48 = vor.u32 %v9611_v39, %v7154_v38  ;;  %v9603_v58 = vld [vmem:[#allocation11 + $0x434] sm:$0xf0]  ;;  %v6644_v32 = vld [vmem:[#allocation11 + $0x78] sm:$0xf0]  ;;  %v7511_v38 = vor.u32 %v9695_v22, %v7508_v23  ;;  %v7750_v22 = vld [vmem:[#allocation14 + $0x118] sm:$0xf] }
 0x1e0   :  { %2609 = vmatpush.bf16.msra.mxu2 %v6611_v61  ;;  %2631 = vmatpush.bf16.msrb.mxu0 %v7251_v62  ;;  %v10605_v56 = vpop.f32.mrf.mxu0  ;;  %v10607_v57 = vpop.f32.mrf.mxu3  ;;  %v9655_v61 = vld [vmem:[#allocation11 + $0x5dc] sm:$0xf] }
 0x1e1   :  { %v7348_v62 = vld [vmem:[#allocation11 + $0x5f8] sm:$0xf0] }
 0x1e2   :  { %2668 = vmatpush.bf16.msrb.mxu3 %v7063_v59  ;;  %2646 = vmatpush.bf16.msrb.mxu1 %v7443_v9  ;;  %v9495_v59 = vld [vmem:[#allocation11 + $0xdc] sm:$0xf]  ;;  %v2392_v63 = vpop.f32.mrf.mxu1  ;;  %v7351_v8 = vor.u32 %v9655_v61, %v7348_v62 }
 0x1e3   :  { %2610 = vmatmul.bf16.vlgmr.msra.gmra.mxu2 %v10561_v54  ;;  %v6711_v4 = vor.u32 %v9495_v59, %v6708_v60  ;;  %v7540_v9 = vld [vmem:[#allocation11 + $0x778] sm:$0xf0] }
 0x1e4   :  { %2654 = vmatpush.bf16.msrb.mxu2 %v6839_v3  ;;  %2632 = vmatpush.bf16.msrb.mxu0 %v7219_v12  ;;  %v7123_v3 = vor.u32 %v9603_v58, %v7122_v55  ;;  %v6676_v12 = vld [vmem:[#allocation11 + $0xb8] sm:$0xf0]  ;;  %v7543_v18 = vor.u32 %v9703_v7, %v7540_v9  ;;  %v9769_v9 = vld [vmem:[#allocation14 + $0x168] sm:$0xf0] }
 0x1e5   :  { %v9639_v33 = vld [vmem:[#allocation11 + $0x55c] sm:$0xf] }
 0x1e6   :  { %2669 = vmatpush.bf16.msrb.mxu3 %v7031_v11  ;;  %2647 = vmatpush.bf16.msrb.mxu1 %v7411_v25  ;;  %v9487_v11 = vld [vmem:[#allocation11 + $0x9c] sm:$0xf]  ;;  %v10610_v17 = vpop.f32.mrf.mxu2 }
 0x1e7   :  { %v6679_v19 = vor.u32 %v9487_v11, %v6676_v12  ;;  %v9687_v40 = vld [vmem:[#allocation11 + $0x6dc] sm:$0xf] }
 0x1e8   :  { %2655 = vmatpush.bf16.msrb.mxu2 %v6807_v16  ;;  %2633 = vmatpush.bf16.msrb.mxu0 %v7187_v29  ;;  %v9535_v16 = vld [vmem:[#allocation11 + $0x21c] sm:$0xf]  ;;  %v2379_v24 = vpop.f32.mrf.mxu0  ;;  %v2418_v25 = vpop.f32.mrf.mxu3  ;;  %v9832_v29 = vld [vmem:[#allocation14 + $0x360] sm:$0xf0] }
 0x1e9   :  { %v6871_v37 = vor.u32 %v9535_v16, %v6868_v21  ;;  %v7476_v41 = vld [vmem:[#allocation11 + $0x6f8] sm:$0xf0]  ;;  %v7946_v16 = vld [vmem:[#allocation14 + $0x2a0] sm:$0xf]  ;;  %v995_v24 = vperm.slane %v10590_v53, 1 }
 0x1ea   :  { %2670 = vmatpush.bf16.msrb.mxu3 %v6999_v28  ;;  %2648 = vmatpush.bf16.msrb.mxu1 %v7379_v42  ;;  %v8030_v28 = vld [vmem:[#allocation14 + $0x348] sm:$0xf]  ;;  %v10613_v35 = vpop.f32.mrf.mxu1  ;;  %v6647_v42 = vor.u32 %v9479_v30, %v6644_v32  ;;  %v9471_v46 = vld [vmem:[#allocation11 + $0x1c] sm:$0xf]  ;;  %v7479_v58 = vor.u32 %v9687_v40, %v7476_v41 }
 0x1eb   :  { %v8031_v39 = vor.u32 %v9832_v29, %v8030_v28  ;;  %v6612_v47 = vld [vmem:[#allocation11 + $0x38] sm:$0xf0]  ;;  %v7918_v32 = vld [vmem:[#allocation14 + $0x268] sm:$0xf] }
 0x1ec   :  { %2656 = vmatpush.bf16.msrb.mxu2 %v6775_v34  ;;  %2634 = vmatpush.bf16.msrb.mxu0 %v7155_v48  ;;  %v7284_v34 = vld [vmem:[#allocation11 + $0x578] sm:$0xf0]  ;;  %v6615_v60 = vor.u32 %v9471_v46, %v6612_v47  ;;  %v7890_v47 = vld [vmem:[#allocation14 + $0x230] sm:$0xf] }
 0x1ed   :  { %2649 = vmatmul.bf16.vlgmr.msrb.gmra.mxu1 %v10566_v20  ;;  %v7287_v43 = vor.u32 %v9639_v33, %v7284_v34  ;;  %v9631_v48 = vld [vmem:[#allocation11 + $0x51c] sm:$0xf]  ;;  %v9804_v33 = vld [vmem:[#allocation14 + $0x280] sm:$0xf0] }
 0x1ee   :  { %2671 = vmatpush.bf16.msrb.mxu3 %v6967_v44  ;;  %2693 = vmatpush.bf16.msra.mxu1 %v7607_v36  ;;  %v8002_v44 = vld [vmem:[#allocation14 + $0x310] sm:$0xf]  ;;  %v9825_v36 = vld [vmem:[#allocation14 + $0x328] sm:$0xf0]  ;;  %v2405_v55 = vpop.f32.mrf.mxu2  ;;  %v9679_v62 = vld [vmem:[#allocation11 + $0x69c] sm:$0xf] }
 0x1ef   :  { %v8003_v59 = vor.u32 %v9825_v36, %v8002_v44  ;;  %v7444_v63 = vld [vmem:[#allocation11 + $0x6b8] sm:$0xf0]  ;;  %v7919_v36 = vor.u32 %v9804_v33, %v7918_v32  ;;  %v8450_v55 = vld [vmem:[#allocation14 + $0x690] sm:$0xf] }
 0x1f0   :  { %2657 = vmatpush.bf16.msrb.mxu2 %v6743_v49  ;;  %2635 = vmatpush.bf16.msrb.mxu0 %v7123_v3  ;;  %v7252_v49 = vld [vmem:[#allocation11 + $0x538] sm:$0xf0]  ;;  %v7807_v3 = vor.u32 %v9776_v51, %v7806_v50  ;;  %v7447_v11 = vor.u32 %v9679_v62, %v7444_v63  ;;  %v9748_v62 = vld [vmem:[#allocation14 + $0xc0] sm:$0xf0]  ;;  %v8254_v63 = vld [vmem:[#allocation14 + $0x508] sm:$0xf] }
 0x1f1   :  { %v7255_v61 = vor.u32 %v9631_v48, %v7252_v49  ;;  %v9623_v5 = vld [vmem:[#allocation11 + $0x4dc] sm:$0xf]  ;;  %v9797_v48 = vld [vmem:[#allocation14 + $0x248] sm:$0xf0] }
 0x1f2   :  { %2672 = vmatpush.bf16.msrb.mxu3 %v6935_v0  ;;  %2694 = vmatpush.bf16.msra.mxu1 %v7575_v1  ;;  %v7974_v0 = vld [vmem:[#allocation14 + $0x2d8] sm:$0xf]  ;;  %v10616_v1 = vpop.f32.mrf.mxu0  ;;  %v7220_v6 = vld [vmem:[#allocation11 + $0x4f8] sm:$0xf0]  ;;  %v2444_v7 = vpop.f32.mrf.mxu1 }
 0x1f3   :  { %2636 = vmatmul.bf16.vlgmr.msrb.gmra.mxu0 %v10570_v45  ;;  %v7223_v13 = vor.u32 %v9623_v5, %v7220_v6  ;;  %v9671_v14 = vld [vmem:[#allocation11 + $0x65c] sm:$0xf] }
 0x1f4   :  { %2658 = vmatpush.bf16.msrb.mxu2 %v6711_v4  ;;  %2680 = vmatpush.bf16.msra.mxu0 %v7351_v8  ;;  %v9818_v4 = vld [vmem:[#allocation14 + $0x2f0] sm:$0xf0]  ;;  %v7778_v8 = vld [vmem:[#allocation14 + $0x150] sm:$0xf] }
 0x1f5   :  { %v7975_v12 = vor.u32 %v9818_v4, %v7974_v0  ;;  %v7188_v21 = vld [vmem:[#allocation11 + $0x4b8] sm:$0xf0]  ;;  %v9888_v0 = vld [vmem:[#allocation14 + $0x520] sm:$0xf0] }
 0x1f6   :  { %2673 = vmatpush.bf16.msrb.mxu3 %v6903_v15  ;;  %2695 = vmatpush.bf16.msra.mxu1 %v7543_v18  ;;  %v7412_v15 = vld [vmem:[#allocation11 + $0x678] sm:$0xf0]  ;;  %v9811_v18 = vld [vmem:[#allocation14 + $0x2b8] sm:$0xf0] }
 0x1f7   :  { %v9762_v23 = vld [vmem:[#allocation14 + $0x130] sm:$0xf0]  ;;  %v7415_v25 = vor.u32 %v9671_v14, %v7412_v15  ;;  %v7947_v28 = vor.u32 %v9811_v18, %v7946_v16  ;;  %v9741_v14 = vld [vmem:[#allocation14 + $0x88] sm:$0xf0]  ;;  %v8226_v16 = vld [vmem:[#allocation14 + $0x4d0] sm:$0xf] }
 0x1f8   :  { %2659 = vmatpush.bf16.msrb.mxu2 %v6679_v19  ;;  %2681 = vmatpush.bf16.msra.mxu0 %v7319_v26  ;;  %v9615_v19 = vld [vmem:[#allocation11 + $0x49c] sm:$0xf] }
 0x1f9   :  { %v9663_v26 = vld [vmem:[#allocation11 + $0x61c] sm:$0xf]  ;;  %v7191_v29 = vor.u32 %v9615_v19, %v7188_v21 }
 0x1fa   :  { %2674 = vmatpush.bf16.msrb.mxu3 %v6871_v37  ;;  %2696 = vmatpush.bf16.msra.mxu1 %v7511_v38  ;;  %v7380_v30 = vld [vmem:[#allocation11 + $0x638] sm:$0xf0]  ;;  %v2431_v34 = vpop.f32.mrf.mxu0  ;;  %v7751_v37 = vor.u32 %v9762_v23, %v7750_v22  ;;  %v8478_v38 = vld [vmem:[#allocation14 + $0x6c8] sm:$0xf] }
 0x1fb   :  { %v9607_v40 = vld [vmem:[#allocation11 + $0x45c] sm:$0xf]  ;;  %v7383_v44 = vor.u32 %v9663_v26, %v7380_v30  ;;  %v8198_v30 = vld [vmem:[#allocation14 + $0x498] sm:$0xf]  ;;  %v8926_v34 = vld [vmem:[#allocation14 + $0xa48] sm:$0xf] }
 0x1fc   :  { %2660 = vmatpush.bf16.msrb.mxu2 %v6647_v42  ;;  %2682 = vmatpush.bf16.msra.mxu0 %v7287_v43  ;;  %v7156_v41 = vld [vmem:[#allocation11 + $0x478] sm:$0xf0]  ;;  %v7722_v42 = vld [vmem:[#allocation14 + $0xe0] sm:$0xf]  ;;  %v9755_v43 = vld [vmem:[#allocation14 + $0xf8] sm:$0xf0] }
 0x1fd   :  { %2675 = vmatmul.bf16.vlgmr.msrb.gmra.mxu3 %v10558_v31  ;;  %v7779_v31 = vor.u32 %v9769_v9, %v7778_v8  ;;  %v7159_v50 = vor.u32 %v9607_v40, %v7156_v41  ;;  %v7723_v51 = vor.u32 %v9755_v43, %v7722_v42  ;;  %v7862_v8 = vld [vmem:[#allocation14 + $0x1f8] sm:$0xf]  ;;  %v9790_v9 = vld [vmem:[#allocation14 + $0x210] sm:$0xf0]  ;;  %v996_v40 = vperm.slane %v10590_v53, 2 }
 0x1fe   :  { %5567 = vmatpush.bf16.msra.mxu3 %v8031_v39  ;;  %2697 = vmatpush.bf16.msra.mxu1 %v7479_v58  ;;  %v9944_v39 = vld [vmem:[#allocation14 + $0x6e0] sm:$0xf0]  ;;  %v9937_v58 = vld [vmem:[#allocation14 + $0x6a8] sm:$0xf0]  ;;  %v7863_v18 = vor.u32 %v9790_v9, %v7862_v8  ;;  %v9874_v33 = vld [vmem:[#allocation14 + $0x4b0] sm:$0xf0] }
 0x1ff   :  { %v8479_v46 = vor.u32 %v9944_v39, %v8478_v38  ;;  %v8451_v4 = vor.u32 %v9937_v58, %v8450_v55  ;;  %v8366_v43 = vld [vmem:[#allocation14 + $0x5e8] sm:$0xf]  ;;  %v10000_v55 = vld [vmem:[#allocation14 + $0x8a0] sm:$0xf0]  ;;  %v2404_v8 = vadd.f32 %v10610_v17, %v996_v40  ;;  %v9846_v40 = vld [vmem:[#allocation14 + $0x3d0] sm:$0xf0] }
 0x200   :  { %2661 = vmatpush.bf16.msrb.mxu2 %v6615_v60  ;;  %2683 = vmatpush.bf16.msra.mxu0 %v7255_v61  ;;  %v10621_v49 = vpop.f32.mrf.mxu3  ;;  %v7124_v60 = vld [vmem:[#allocation11 + $0x438] sm:$0xf0]  ;;  %v7694_v61 = vld [vmem:[#allocation14 + $0xa8] sm:$0xf] }
 0x201   :  { %v7695_v7 = vor.u32 %v9748_v62, %v7694_v61  ;;  %v2706_v61 = vmax.f32 %v10597_v2, 0.0  ;;  %v9860_v2 = vld [vmem:[#allocation14 + $0x440] sm:$0xf0] }
 0x202   :  { %5568 = vmatpush.bf16.msra.mxu3 %v8003_v59  ;;  %2698 = vmatpush.bf16.msra.mxu1 %v7447_v11  ;;  %v9599_v59 = vld [vmem:[#allocation11 + $0x41c] sm:$0xf]  ;;  %v8422_v11 = vld [vmem:[#allocation14 + $0x658] sm:$0xf] }
 0x203   :  { %2662 = vmatmul.bf16.vlgmr.msrb.gmra.mxu2 %v10561_v54  ;;  %v2352_v54 = vadd.f32 %v10600_v10, %v995_v24  ;;  %v7127_v6 = vor.u32 %v9599_v59, %v7124_v60  ;;  %v9783_v24 = vld [vmem:[#allocation14 + $0x1d8] sm:$0xf0]  ;;  %v8898_v59 = vld [vmem:[#allocation14 + $0xa10] sm:$0xf]  ;;  %v10049_v60 = vld [vmem:[#allocation14 + $0xa28] sm:$0xf0] }
 0x204   :  { %5554 = vmatpush.bf16.msra.mxu2 %v7807_v3  ;;  %2684 = vmatpush.bf16.msra.mxu0 %v7223_v13  ;;  %v7891_v3 = vor.u32 %v9797_v48, %v7890_v47  ;;  %v7666_v13 = vld [vmem:[#allocation14 + $0x70] sm:$0xf]  ;;  %v8170_v47 = vld [vmem:[#allocation14 + $0x460] sm:$0xf] }
 0x205   :  { %v2365_v10 = vadd.f32 %v10595_v52, %v2352_v54  ;;  %v9930_v52 = vld [vmem:[#allocation14 + $0x670] sm:$0xf0]  ;;  %v7667_v23 = vor.u32 %v9741_v14, %v7666_v13  ;;  %v9916_v54 = vld [vmem:[#allocation14 + $0x600] sm:$0xf0]  ;;  %v8870_v14 = vld [vmem:[#allocation14 + $0x9d8] sm:$0xf] }
 0x206   :  { %5569 = vmatpush.bf16.msra.mxu3 %v7975_v12  ;;  %2699 = vmatpush.bf16.msra.mxu1 %v7415_v25  ;;  %v8255_v12 = vor.u32 %v9888_v0, %v8254_v63  ;;  %v2455_v15 = vpop.f32.mrf.mxu2  ;;  %v8423_v21 = vor.u32 %v9930_v52, %v8422_v11  ;;  %v9923_v25 = vld [vmem:[#allocation14 + $0x638] sm:$0xf0]  ;;  %v8674_v11 = vld [vmem:[#allocation14 + $0x850] sm:$0xf]  ;;  %v8899_v52 = vor.u32 %v10049_v60, %v8898_v59  ;;  %v10021_v60 = vld [vmem:[#allocation14 + $0x948] sm:$0xf0] }
 0x207   :  { %v2378_v5 = vadd.f32 %v10605_v56, %v2365_v10  ;;  %v7834_v56 = vld [vmem:[#allocation14 + $0x1c0] sm:$0xf]  ;;  %v8367_v10 = vor.u32 %v9916_v54, %v8366_v43  ;;  %v8814_v54 = vld [vmem:[#allocation14 + $0x968] sm:$0xf]  ;;  %v8786_v59 = vld [vmem:[#allocation14 + $0x930] sm:$0xf] }
 0x208   :  { %5555 = vmatpush.bf16.msra.mxu2 %v7779_v31  ;;  %2685 = vmatpush.bf16.msra.mxu0 %v7191_v29  ;;  %v9881_v31 = vld [vmem:[#allocation14 + $0x4e8] sm:$0xf0]  ;;  %v2470_v22 = vpop.f32.mrf.mxu3  ;;  %v9734_v29 = vld [vmem:[#allocation14 + $0x50] sm:$0xf0]  ;;  %v7835_v38 = vor.u32 %v9783_v24, %v7834_v56 }
 0x209   :  { %v2391_v19 = vadd.f32 %v10603_v27, %v2378_v5  ;;  %v8227_v26 = vor.u32 %v9881_v31, %v8226_v16  ;;  %v997_v27 = vperm.slane %v10590_v53, 3  ;;  %v8338_v5 = vld [vmem:[#allocation14 + $0x5b0] sm:$0xf]  ;;  %v10638_v16 = vpack.c.bf16 %v2706_v61, %v2706_v61  ;;  %v9853_v24 = vld [vmem:[#allocation14 + $0x408] sm:$0xf0] }
 0x20a   :  { %5570 = vmatpush.bf16.msra.mxu3 %v7947_v28  ;;  %2700 = vmatpush.bf16.msra.mxu1 %v7383_v44  ;;  %v7638_v28 = vld [vmem:[#allocation14 + $0x38] sm:$0xf]  ;;  %v10627_v32 = vpop.f32.mrf.mxu1  ;;  %v8199_v44 = vor.u32 %v9874_v33, %v8198_v30  ;;  %v8114_v22 = vld [vmem:[#allocation14 + $0x3f0] sm:$0xf]  ;;  %v9150_v61 = vld [vmem:[#allocation14 + $0xc08] sm:$0xf] }
 0x20b   :  { %v2707_v39 = vmax.f32 %v2391_v19, 0.0  ;;  %v7639_v42 = vor.u32 %v9734_v29, %v7638_v28  ;;  %v2456_v58 = vadd.f32 %v2455_v15, %v997_v27  ;;  %v10042_v15 = vld [vmem:[#allocation14 + $0x9f0] sm:$0xf0]  ;;  %v8310_v19 = vld [vmem:[#allocation14 + $0x578] sm:$0xf] }
 0x20c   :  { %5556 = vmatpush.bf16.msra.mxu2 %v7751_v37  ;;  %2686 = vmatpush.bf16.msra.mxu0 %v7159_v50  ;;  %v10056_v37 = vld [vmem:[#allocation14 + $0xa60] sm:$0xf0]  ;;  %v10035_v28 = vld [vmem:[#allocation14 + $0x9b8] sm:$0xf0]  ;;  %v8282_v27 = vld [vmem:[#allocation14 + $0x540] sm:$0xf] }
 0x20d   :  { %2701 = vmatmul.bf16.vlgmr.msra.gmra.mxu1 %v10566_v20  ;;  %v8394_v20 = vld [vmem:[#allocation14 + $0x620] sm:$0xf]  ;;  %v8927_v48 = vor.u32 %v10056_v37, %v8926_v34  ;;  %v10633_v62 = vpack.c.bf16 %v2707_v39, %v2707_v39  ;;  %v2469_v13 = vadd.f32 %v10621_v49, %v2456_v58  ;;  %v9986_v49 = vld [vmem:[#allocation14 + $0x830] sm:$0xf0]  ;;  %v8115_v37 = vor.u32 %v9853_v24, %v8114_v22  ;;  %v8086_v39 = vld [vmem:[#allocation14 + $0x3b8] sm:$0xf] }
 0x20e   :  { %5571 = vmatpush.bf16.msra.mxu3 %v7919_v36  ;;  %5593 = vmatpush.bf16.msrb.mxu1 %v8479_v46  ;;  %v8395_v41 = vor.u32 %v9923_v25, %v8394_v20  ;;  %v7610_v36 = vld [vmem:[#allocation14] sm:$0xf]  ;;  %v9727_v46 = vld [vmem:[#allocation14 + $0x18] sm:$0xf0]  ;;  %v2457_v50 = vpop.f32.mrf.mxu2  ;;  %v8646_v20 = vld [vmem:[#allocation14 + $0x818] sm:$0xf]  ;;  %v8871_v25 = vor.u32 %v10042_v15, %v8870_v14 }
 0x20f   :  { %v7611_v0 = vor.u32 %v9727_v46, %v7610_v36  ;;  %v8058_v50 = vld [vmem:[#allocation14 + $0x380] sm:$0xf]  ;;  %v9094_v22 = vld [vmem:[#allocation14 + $0xb98] sm:$0xf] }
 0x210   :  { %5557 = vmatpush.bf16.msra.mxu2 %v7723_v51  ;;  %2687 = vmatpush.bf16.msra.mxu0 %v7127_v6  ;;  %v9867_v51 = vld [vmem:[#allocation14 + $0x478] sm:$0xf0]  ;;  %v2481_v63 = vpop.f32.mrf.mxu0  ;;  %v9909_v6 = vld [vmem:[#allocation14 + $0x5c8] sm:$0xf0] }
 0x211   :  { %v8339_v31 = vor.u32 %v9909_v6, %v8338_v5  ;;  %v9965_v5 = vld [vmem:[#allocation14 + $0x788] sm:$0xf0]  ;;  %v8787_v6 = vor.u32 %v10021_v60, %v8786_v59  ;;  %v9759_v59 = vld [vmem:[#allocation14 + $0x11c] sm:$0xf]  ;;  %v7752_v60 = vld [vmem:[#allocation14 + $0x134] sm:$0xf0] }
 0x212   :  { %5572 = vmatpush.bf16.msra.mxu3 %v7891_v3  ;;  %5594 = vmatpush.bf16.msrb.mxu1 %v8451_v4  ;;  %v8171_v3 = vor.u32 %v9867_v51, %v8170_v47  ;;  %v2496_v9 = vpop.f32.mrf.mxu1  ;;  %v8087_v47 = vor.u32 %v9846_v40, %v8086_v39  ;;  %v9839_v51 = vld [vmem:[#allocation14 + $0x398] sm:$0xf0]  ;;  %v9822_v39 = vld [vmem:[#allocation14 + $0x314] sm:$0xf]  ;;  %v8004_v40 = vld [vmem:[#allocation14 + $0x32c] sm:$0xf0] }
 0x213   :  { %2688 = vmatmul.bf16.vlgmr.msra.gmra.mxu0 %v10570_v45  ;;  %v8702_v45 = vld [vmem:[#allocation14 + $0x888] sm:$0xf] }
 0x214   :  { %5558 = vmatpush.bf16.msra.mxu2 %v7695_v7  ;;  %5580 = vmatpush.bf16.msrb.mxu0 %v8255_v12  ;;  %v8703_v4 = vor.u32 %v10000_v55, %v8702_v45  ;;  %v8142_v7 = vld [vmem:[#allocation14 + $0x428] sm:$0xf]  ;;  %v9993_v12 = vld [vmem:[#allocation14 + $0x868] sm:$0xf0]  ;;  %v9972_v55 = vld [vmem:[#allocation14 + $0x7c0] sm:$0xf0] }
 0x215   :  { %v8143_v17 = vor.u32 %v9860_v2, %v8142_v7  ;;  %v8675_v56 = vor.u32 %v9993_v12, %v8674_v11  ;;  %v8590_v45 = vld [vmem:[#allocation14 + $0x7a8] sm:$0xf]  ;;  %v8758_v7 = vld [vmem:[#allocation14 + $0x8f8] sm:$0xf]  ;;  %v10014_v2 = vld [vmem:[#allocation14 + $0x910] sm:$0xf0] }
 0x216   :  { %5573 = vmatpush.bf16.msra.mxu3 %v7863_v18  ;;  %5595 = vmatpush.bf16.msrb.mxu1 %v8423_v21  ;;  %v2482_v18 = vadd.f32 %v2481_v63, %v2469_v13  ;;  %v9902_v21 = vld [vmem:[#allocation14 + $0x590] sm:$0xf0]  ;;  %v9122_v11 = vld [vmem:[#allocation14 + $0xbd0] sm:$0xf]  ;;  %v10105_v12 = vld [vmem:[#allocation14 + $0xbe8] sm:$0xf0] }
 0x217   :  { %v8311_v30 = vor.u32 %v9902_v21, %v8310_v19  ;;  %v9123_v19 = vor.u32 %v10105_v12, %v9122_v11  ;;  %v10007_v21 = vld [vmem:[#allocation14 + $0x8d8] sm:$0xf0]  ;;  %v9752_v11 = vld [vmem:[#allocation14 + $0xe4] sm:$0xf] }
 0x218   :  { %5559 = vmatpush.bf16.msra.mxu2 %v7667_v23  ;;  %5581 = vmatpush.bf16.msrb.mxu0 %v8227_v26  ;;  %v2417_v23 = vadd.f32 %v10607_v57, %v2404_v8  ;;  %v8842_v26 = vld [vmem:[#allocation14 + $0x9a0] sm:$0xf]  ;;  %v2483_v33 = vpop.f32.mrf.mxu0  ;;  %v2495_v34 = vadd.f32 %v10627_v32, %v2482_v18  ;;  %v8647_v57 = vor.u32 %v9986_v49, %v8646_v20  ;;  %v9958_v18 = vld [vmem:[#allocation14 + $0x750] sm:$0xf0]  ;;  %v9829_v20 = vld [vmem:[#allocation14 + $0x34c] sm:$0xf] }
 0x219   :  { %v8843_v43 = vor.u32 %v10035_v28, %v8842_v26  ;;  %v8032_v49 = vld [vmem:[#allocation14 + $0x364] sm:$0xf0]  ;;  %v8506_v26 = vld [vmem:[#allocation14 + $0x700] sm:$0xf]  ;;  %v9951_v28 = vld [vmem:[#allocation14 + $0x718] sm:$0xf0] }
 0x21a   :  { %5574 = vmatpush.bf16.msra.mxu3 %v7835_v38  ;;  %5596 = vmatpush.bf16.msrb.mxu1 %v8395_v41  ;;  %v2430_v29 = vadd.f32 %v10616_v1, %v2417_v23  ;;  %v9895_v38 = vld [vmem:[#allocation14 + $0x558] sm:$0xf0]  ;;  %v8618_v41 = vld [vmem:[#allocation14 + $0x7e0] sm:$0xf]  ;;  %v2709_v46 = vmax.f32 %v2495_v34, 0.0 }
 0x21b   :  { %v8283_v1 = vor.u32 %v9895_v38, %v8282_v27  ;;  %v10098_v23 = vld [vmem:[#allocation14 + $0xbb0] sm:$0xf0]  ;;  %v9066_v27 = vld [vmem:[#allocation14 + $0xb60] sm:$0xf]  ;;  %v10091_v38 = vld [vmem:[#allocation14 + $0xb78] sm:$0xf0] }
 0x21c   :  { %5560 = vmatpush.bf16.msra.mxu2 %v7639_v42  ;;  %5582 = vmatpush.bf16.msrb.mxu0 %v8199_v44  ;;  %v9979_v42 = vld [vmem:[#allocation14 + $0x7f8] sm:$0xf0]  ;;  %v10028_v44 = vld [vmem:[#allocation14 + $0x980] sm:$0xf0]  ;;  %v2443_v36 = vadd.f32 %v10613_v35, %v2430_v29  ;;  %v10647_v35 = vpack.c.bf16 %v2709_v46, %v2709_v46  ;;  %v9773_v29 = vld [vmem:[#allocation14 + $0x18c] sm:$0xf]  ;;  %v9095_v33 = vor.u32 %v10098_v23, %v9094_v22 }
 0x21d   :  { %5575 = vmatmul.bf16.vlgmr.msra.gmra.mxu3 %v10633_v62  ;;  %v8815_v58 = vor.u32 %v10028_v44, %v8814_v54  ;;  %v9766_v44 = vld [vmem:[#allocation14 + $0x154] sm:$0xf]  ;;  %v7780_v46 = vld [vmem:[#allocation14 + $0x16c] sm:$0xf0]  ;;  %v10161_v22 = vld [vmem:[#allocation14 + $0xda8] sm:$0xf0] }
 0x21e   :  { %5619 = vmatpush.bf16.msrb.mxu3 %v8927_v48  ;;  %5597 = vmatpush.bf16.msrb.mxu1 %v8367_v10  ;;  %v8619_v48 = vor.u32 %v9979_v42, %v8618_v41  ;;  %v10112_v10 = vld [vmem:[#allocation14 + $0xc20] sm:$0xf0]  ;;  %v2708_v63 = vmax.f32 %v2443_v36, 0.0  ;;  %v8507_v42 = vor.u32 %v9951_v28, %v8506_v26 }
 0x21f   :  { %v9151_v8 = vor.u32 %v10112_v10, %v9150_v61 }
 0x220   :  { %5561 = vmatpush.bf16.msra.mxu2 %v7611_v0  ;;  %5583 = vmatpush.bf16.msrb.mxu0 %v8171_v3  ;;  %v10645_v32 = vpop.f32.mrf.mxu3  ;;  %v8059_v0 = vor.u32 %v9839_v51, %v8058_v50  ;;  %v8591_v3 = vor.u32 %v9972_v55, %v8590_v45  ;;  %v10651_v15 = vpack.c.bf16 %v2708_v63, %v2708_v63  ;;  %v10084_v50 = vld [vmem:[#allocation14 + $0xb40] sm:$0xf0]  ;;  %v9815_v45 = vld [vmem:[#allocation14 + $0x2dc] sm:$0xf]  ;;  %v7976_v55 = vld [vmem:[#allocation14 + $0x2f4] sm:$0xf0] }
 0x221   :  { %v7979_v63 = vor.u32 %v9815_v45, %v7976_v55  ;;  %v9731_v55 = vld [vmem:[#allocation14 + $0x3c] sm:$0xf] }
 0x222   :  { %5620 = vmatpush.bf16.msrb.mxu3 %v8899_v52  ;;  %5598 = vmatpush.bf16.msrb.mxu1 %v8339_v31  ;;  %v998_v52 = vperm.slane %v10590_v53, 4  ;;  %v8534_v31 = vld [vmem:[#allocation14 + $0x738] sm:$0xf] }
 0x223   :  { %5562 = vmatmul.bf16.vlgmr.msra.gmra.mxu2 %v10638_v16 }
 0x224   :  { %5606 = vmatpush.bf16.msrb.mxu2 %v8703_v4  ;;  %5584 = vmatpush.bf16.msrb.mxu0 %v8143_v17  ;;  %v8562_v4 = vld [vmem:[#allocation14 + $0x770] sm:$0xf]  ;;  %v8759_v17 = vor.u32 %v10014_v2, %v8758_v7  ;;  %v9374_v7 = vld [vmem:[#allocation14 + $0xdc8] sm:$0xf]  ;;  %v7755_v2 = vor.u32 %v9759_v59, %v7752_v60 }
 0x225   :  { %v8563_v14 = vor.u32 %v9965_v5, %v8562_v4  ;;  %v9808_v4 = vld [vmem:[#allocation14 + $0x2a4] sm:$0xf]  ;;  %v7948_v5 = vld [vmem:[#allocation14 + $0x2bc] sm:$0xf0] }
 0x226   :  { %5621 = vmatpush.bf16.msrb.mxu3 %v8871_v25  ;;  %5599 = vmatpush.bf16.msrb.mxu1 %v8311_v30  ;;  %v2507_v9 = vpop.f32.mrf.mxu2  ;;  %v8535_v25 = vor.u32 %v9958_v18, %v8534_v31  ;;  %v8982_v31 = vld [vmem:[#allocation14 + $0xab8] sm:$0xf]  ;;  %v10070_v18 = vld [vmem:[#allocation14 + $0xad0] sm:$0xf0] }
 0x227   :  { %v2508_v53 = vadd.f32 %v2507_v9, %v998_v52 }
 0x228   :  { %5607 = vmatpush.bf16.msrb.mxu2 %v8675_v56  ;;  %5585 = vmatpush.bf16.msrb.mxu0 %v8115_v37  ;;  %v2522_v13 = vpop.f32.mrf.mxu3  ;;  %v8730_v56 = vld [vmem:[#allocation14 + $0x8c0] sm:$0xf]  ;;  %v7808_v37 = vld [vmem:[#allocation14 + $0x1a4] sm:$0xf0] }
 0x229   :  { %v8731_v30 = vor.u32 %v10007_v21, %v8730_v56  ;;  %v2521_v41 = vadd.f32 %v10645_v32, %v2508_v53  ;;  %v7811_v54 = vor.u32 %v9773_v29, %v7808_v37  ;;  %v7783_v32 = vor.u32 %v9766_v44, %v7780_v46  ;;  %v7724_v13 = vld [vmem:[#allocation14 + $0xfc] sm:$0xf0]  ;;  %v7920_v56 = vld [vmem:[#allocation14 + $0x284] sm:$0xf0]  ;;  %v9346_v21 = vld [vmem:[#allocation14 + $0xd90] sm:$0xf] }
 0x22a   :  { %5622 = vmatpush.bf16.msrb.mxu3 %v8843_v43  ;;  %5600 = vmatpush.bf16.msrb.mxu1 %v8283_v1  ;;  %v2546_v24 = vpop.f32.mrf.mxu1  ;;  %v9067_v1 = vor.u32 %v10091_v38, %v9066_v27  ;;  %v7727_v23 = vor.u32 %v9752_v11, %v7724_v13  ;;  %v8983_v53 = vor.u32 %v10070_v18, %v8982_v31  ;;  %v8954_v29 = vld [vmem:[#allocation14 + $0xa80] sm:$0xf]  ;;  %v8256_v37 = vld [vmem:[#allocation14 + $0x524] sm:$0xf0]  ;;  %v7864_v44 = vld [vmem:[#allocation14 + $0x214] sm:$0xf0] }
 0x22b   :  { %v9724_v11 = vld [vmem:[#allocation14 + $0x4] sm:$0xf]  ;;  %v8704_v31 = vld [vmem:[#allocation14 + $0x8a4] sm:$0xf0] }
 0x22c   :  { %5608 = vmatpush.bf16.msrb.mxu2 %v8647_v57  ;;  %5586 = vmatpush.bf16.msrb.mxu0 %v8087_v47  ;;  %v8035_v57 = vor.u32 %v9829_v20, %v8032_v49  ;;  %v8007_v47 = vor.u32 %v9822_v39, %v8004_v40  ;;  %v9794_v20 = vld [vmem:[#allocation14 + $0x234] sm:$0xf]  ;;  %v7892_v49 = vld [vmem:[#allocation14 + $0x24c] sm:$0xf0]  ;;  %v9864_v18 = vld [vmem:[#allocation14 + $0x464] sm:$0xf] }
 0x22d   :  { %5601 = vmatmul.bf16.vlgmr.msrb.gmra.mxu1 %v10647_v35  ;;  %v9738_v40 = vld [vmem:[#allocation14 + $0x74] sm:$0xf] }
 0x22e   :  { %5623 = vmatpush.bf16.msrb.mxu3 %v8815_v58  ;;  %v2509_v34 = vpop.f32.mrf.mxu2 }
 0x22f   :  { %v9885_v34 = vld [vmem:[#allocation14 + $0x50c] sm:$0xf] }
 0x230   :  { %5609 = vmatpush.bf16.msrb.mxu2 %v8619_v48  ;;  %5587 = vmatpush.bf16.msrb.mxu0 %v8059_v0  ;;  %v2533_v43 = vpop.f32.mrf.mxu0  ;;  %v9038_v48 = vld [vmem:[#allocation14 + $0xb28] sm:$0xf]  ;;  %v9010_v0 = vld [vmem:[#allocation14 + $0xaf0] sm:$0xf] }
 0x231   :  { %v2534_v36 = vadd.f32 %v2533_v43, %v2521_v41  ;;  %v9039_v61 = vor.u32 %v10084_v50, %v9038_v48  ;;  %v7668_v41 = vld [vmem:[#allocation14 + $0x8c] sm:$0xf0]  ;;  %v9787_v43 = vld [vmem:[#allocation14 + $0x1fc] sm:$0xf] }
 0x232   :  { %5624 = vmatpush.bf16.msrb.mxu3 %v8787_v6  ;;  %v2548_v51 = vpop.f32.mrf.mxu1  ;;  %v10147_v48 = vld [vmem:[#allocation14 + $0xd38] sm:$0xf0]  ;;  %v7671_v45 = vor.u32 %v9738_v40, %v7668_v41  ;;  %v7867_v60 = vor.u32 %v9787_v43, %v7864_v44  ;;  %v8928_v40 = vld [vmem:[#allocation14 + $0xa64] sm:$0xf0]  ;;  %v8648_v43 = vld [vmem:[#allocation14 + $0x834] sm:$0xf0] }
 0x233   :  { %5588 = vmatmul.bf16.vlgmr.msrb.gmra.mxu0 %v10651_v15  ;;  %v2547_v58 = vadd.f32 %v2546_v24, %v2534_v36  ;;  %v7696_v24 = vld [vmem:[#allocation14 + $0xc4] sm:$0xf0]  ;;  %v8228_v36 = vld [vmem:[#allocation14 + $0x4ec] sm:$0xf0]  ;;  %v10660_v50 = vld [vmem:[#allocation13] sm:$0xff] }
 0x234   :  { %5610 = vmatpush.bf16.msrb.mxu2 %v8591_v3  ;;  %5632 = vmatpush.bf16.msra.mxu0 %v9151_v8  ;;  %v10077_v3 = vld [vmem:[#allocation14 + $0xb08] sm:$0xf0]  ;;  %v10168_v8 = vld [vmem:[#allocation14 + $0xde0] sm:$0xf0]  ;;  %v999_v51 = vperm.slane %v10660_v50, 5 }
 0x235   :  { %v2710_v10 = vmax.f32 %v2547_v58, 0.0  ;;  %v9011_v12 = vor.u32 %v10077_v3, %v9010_v0  ;;  %v9375_v52 = vor.u32 %v10168_v8, %v9374_v7  ;;  %v7640_v58 = vld [vmem:[#allocation14 + $0x54] sm:$0xf0]  ;;  %v9871_v0 = vld [vmem:[#allocation14 + $0x49c] sm:$0xf] }
 0x236   :  { %5625 = vmatpush.bf16.msrb.mxu3 %v8759_v17  ;;  %v9801_v17 = vld [vmem:[#allocation14 + $0x26c] sm:$0xf]  ;;  %v8200_v3 = vld [vmem:[#allocation14 + $0x4b4] sm:$0xf0]  ;;  %v9983_v41 = vld [vmem:[#allocation14 + $0x81c] sm:$0xf] }
 0x237   :  { %v10655_v6 = vpack.c.bf16 %v2710_v10, %v2710_v10  ;;  %5645 = vmatpush.bf16.msra.mxu1 %v9375_v52  ;;  %v7923_v28 = vor.u32 %v9801_v17, %v7920_v56  ;;  %v7836_v10 = vld [vmem:[#allocation14 + $0x1dc] sm:$0xf0]  ;;  %v9997_v52 = vld [vmem:[#allocation14 + $0x88c] sm:$0xf]  ;;  %v8116_v44 = vld [vmem:[#allocation14 + $0x40c] sm:$0xf0] }
 0x238   :  { %5611 = vmatpush.bf16.msrb.mxu2 %v8563_v14  ;;  %5633 = vmatpush.bf16.msra.mxu0 %v9123_v19  ;;  %v2535_v9 = vpop.f32.mrf.mxu0  ;;  %v7951_v14 = vor.u32 %v9808_v4, %v7948_v5  ;;  %v9745_v19 = vld [vmem:[#allocation14 + $0xac] sm:$0xf]  ;;  %v9262_v4 = vld [vmem:[#allocation14 + $0xce8] sm:$0xf]  ;;  %v10140_v5 = vld [vmem:[#allocation14 + $0xd00] sm:$0xf0] }
 0x239   :  { %v7699_v38 = vor.u32 %v9745_v19, %v7696_v24  ;;  %v9263_v7 = vor.u32 %v10140_v5, %v9262_v4  ;;  %v7643_v9 = vor.u32 %v9731_v55, %v7640_v58  ;;  %v8172_v17 = vld [vmem:[#allocation14 + $0x47c] sm:$0xf0]  ;;  %v9234_v19 = vld [vmem:[#allocation14 + $0xcb0] sm:$0xf]  ;;  %v8651_v58 = vor.u32 %v9983_v41, %v8648_v43  ;;  %v8368_v43 = vld [vmem:[#allocation14 + $0x604] sm:$0xf0] }
 0x23a   :  { %5626 = vmatpush.bf16.msrb.mxu3 %v8731_v30  ;;  %v10063_v30 = vld [vmem:[#allocation14 + $0xa98] sm:$0xf0] }
 0x23b   :  { %v8955_v39 = vor.u32 %v10063_v30, %v8954_v29  ;;  %v9857_v29 = vld [vmem:[#allocation14 + $0x42c] sm:$0xf]  ;;  %v8144_v30 = vld [vmem:[#allocation14 + $0x444] sm:$0xf0] }
 0x23c   :  { %5612 = vmatpush.bf16.msrb.mxu2 %v8535_v25  ;;  %5634 = vmatpush.bf16.msra.mxu0 %v9095_v33  ;;  %v9347_v25 = vor.u32 %v10161_v22, %v9346_v21  ;;  %v9318_v33 = vld [vmem:[#allocation14 + $0xd58] sm:$0xf]  ;;  %v10133_v21 = vld [vmem:[#allocation14 + $0xcc8] sm:$0xf0] }
 0x23e   :  { %5671 = vmatpush.bf16.msra.mxu3 %v8035_v57  ;;  %5646 = vmatpush.bf16.msra.mxu1 %v9347_v25  ;;  %v10154_v57 = vld [vmem:[#allocation14 + $0xd70] sm:$0xf0] }
 0x23f   :  { %v9319_v27 = vor.u32 %v10154_v57, %v9318_v33 }
 0x240   :  { %5613 = vmatpush.bf16.msrb.mxu2 %v8507_v42  ;;  %5635 = vmatpush.bf16.msra.mxu0 %v9067_v1  ;;  %v10658_v26 = vpop.f32.mrf.mxu3  ;;  %v7895_v42 = vor.u32 %v9794_v20, %v7892_v49  ;;  %v9878_v1 = vld [vmem:[#allocation14 + $0x4d4] sm:$0xf]  ;;  %v8707_v20 = vor.u32 %v9997_v52, %v8704_v31  ;;  %v8592_v52 = vld [vmem:[#allocation14 + $0x7c4] sm:$0xf0]  ;;  %v9836_v31 = vld [vmem:[#allocation14 + $0x384] sm:$0xf] }
 0x241   :  { %v9990_v49 = vld [vmem:[#allocation14 + $0x854] sm:$0xf] }
 0x242   :  { %5672 = vmatpush.bf16.msra.mxu3 %v8007_v47  ;;  %5647 = vmatpush.bf16.msra.mxu1 %v9319_v27  ;;  %v9290_v47 = vld [vmem:[#allocation14 + $0xd20] sm:$0xf] }
 0x243   :  { %5614 = vmatmul.bf16.vlgmr.msrb.gmra.mxu2 %v10655_v6 }
 0x244   :  { %5658 = vmatpush.bf16.msra.mxu2 %v7811_v54  ;;  %5636 = vmatpush.bf16.msra.mxu0 %v9039_v61  ;;  %v8259_v54 = vor.u32 %v9885_v34, %v8256_v37  ;;  %v9780_v61 = vld [vmem:[#allocation14 + $0x1c4] sm:$0xf]  ;;  %v9206_v34 = vld [vmem:[#allocation14 + $0xc78] sm:$0xf]  ;;  %v10126_v37 = vld [vmem:[#allocation14 + $0xc90] sm:$0xf0] }
 0x245   :  { %v7839_v13 = vor.u32 %v9780_v61, %v7836_v10  ;;  %v9207_v27 = vor.u32 %v10126_v37, %v9206_v34  ;;  %v8480_v61 = vld [vmem:[#allocation14 + $0x6e4] sm:$0xf0]  ;;  %v10025_v37 = vld [vmem:[#allocation14 + $0x96c] sm:$0xf] }
 0x246   :  { %5673 = vmatpush.bf16.msra.mxu3 %v7979_v63  ;;  %v2559_v46 = vpop.f32.mrf.mxu2  ;;  %v8231_v63 = vor.u32 %v9878_v1, %v8228_v36  ;;  %v9178_v36 = vld [vmem:[#allocation14 + $0xc40] sm:$0xf] }
 0x248   :  { %5659 = vmatpush.bf16.msra.mxu2 %v7783_v32  ;;  %5637 = vmatpush.bf16.msra.mxu0 %v9011_v12  ;;  %v9291_v32 = vor.u32 %v10147_v48, %v9290_v47  ;;  %v2574_v59 = vpop.f32.mrf.mxu3  ;;  %v7612_v12 = vld [vmem:[#allocation14 + $0x1c] sm:$0xf0]  ;;  %v10046_v48 = vld [vmem:[#allocation14 + $0xa14] sm:$0xf] }
 0x249   :  { %v7615_v22 = vor.u32 %v9724_v11, %v7612_v12  ;;  %v8872_v11 = vld [vmem:[#allocation14 + $0x9f4] sm:$0xf0]  ;;  %v9969_v12 = vld [vmem:[#allocation14 + $0x7ac] sm:$0xf] }
 0x24a   :  { %5674 = vmatpush.bf16.msra.mxu3 %v7951_v14  ;;  %5648 = vmatpush.bf16.msra.mxu1 %v9291_v32  ;;  %v2598_v8 = vpop.f32.mrf.mxu1  ;;  %v8203_v14 = vor.u32 %v9871_v0, %v8200_v3  ;;  %v9976_v32 = vld [vmem:[#allocation14 + $0x7e4] sm:$0xf]  ;;  %v9843_v0 = vld [vmem:[#allocation14 + $0x3bc] sm:$0xf]  ;;  %v8088_v3 = vld [vmem:[#allocation14 + $0x3d4] sm:$0xf0] }
 0x24c   :  { %5660 = vmatpush.bf16.msra.mxu2 %v7755_v2  ;;  %5638 = vmatpush.bf16.msra.mxu0 %v8983_v53  ;;  %v2560_v2 = vadd.f32 %v2559_v46, %v999_v51  ;;  %v8175_v53 = vor.u32 %v9864_v18, %v8172_v17  ;;  %v10119_v46 = vld [vmem:[#allocation14 + $0xc58] sm:$0xf0]  ;;  %v8900_v51 = vld [vmem:[#allocation14 + $0xa2c] sm:$0xf0]  ;;  %v8060_v18 = vld [vmem:[#allocation14 + $0x39c] sm:$0xf0] }
 0x24d   :  { %v8903_v5 = vor.u32 %v10046_v48, %v8900_v51  ;;  %v9927_v17 = vld [vmem:[#allocation14 + $0x65c] sm:$0xf]  ;;  %v8508_v48 = vld [vmem:[#allocation14 + $0x71c] sm:$0xf0] }
 0x24e   :  { %5675 = vmatpush.bf16.msra.mxu3 %v7923_v28  ;;  %5649 = vmatpush.bf16.msra.mxu1 %v9263_v7  ;;  %v2561_v56 = vpop.f32.mrf.mxu2  ;;  %v2573_v24 = vadd.f32 %v10658_v26, %v2560_v2  ;;  %v8676_v28 = vld [vmem:[#allocation14 + $0x86c] sm:$0xf0]  ;;  %v10053_v26 = vld [vmem:[#allocation14 + $0xa4c] sm:$0xf]  ;;  %v10039_v7 = vld [vmem:[#allocation14 + $0x9dc] sm:$0xf] }
 0x24f   :  { %v8931_v47 = vor.u32 %v10053_v26, %v8928_v40  ;;  %v1000_v26 = vperm.slane %v10660_v50, 6 }
 0x250   :  { %5661 = vmatpush.bf16.msra.mxu2 %v7727_v23  ;;  %5639 = vmatpush.bf16.msra.mxu0 %v8955_v39  ;;  %v9235_v23 = vor.u32 %v10133_v21, %v9234_v19  ;;  %v2585_v25 = vpop.f32.mrf.mxu0  ;;  %v8679_v39 = vor.u32 %v9990_v49, %v8676_v28  ;;  %v8424_v19 = vld [vmem:[#allocation14 + $0x674] sm:$0xf0]  ;;  %v8875_v21 = vor.u32 %v10039_v7, %v8872_v11  ;;  %v9899_v11 = vld [vmem:[#allocation14 + $0x57c] sm:$0xf] }
 0x251   :  { %v2586_v33 = vadd.f32 %v2585_v25, %v2573_v24  ;;  %v10032_v24 = vld [vmem:[#allocation14 + $0x9a4] sm:$0xf]  ;;  %v8063_v49 = vor.u32 %v9836_v31, %v8060_v18  ;;  %v8564_v25 = vld [vmem:[#allocation14 + $0x78c] sm:$0xf0]  ;;  %v7786_v7 = vld [vmem:[#allocation14 + $0x158] sm:$0xf] }
 0x252   :  { %5676 = vmatpush.bf16.msra.mxu3 %v7895_v42  ;;  %5650 = vmatpush.bf16.msra.mxu1 %v9235_v23  ;;  %v2600_v57 = vpop.f32.mrf.mxu1  ;;  %v8147_v42 = vor.u32 %v9857_v29, %v8144_v30  ;;  %v8595_v23 = vor.u32 %v9969_v12, %v8592_v52  ;;  %v9920_v29 = vld [vmem:[#allocation14 + $0x624] sm:$0xf]  ;;  %v8396_v30 = vld [vmem:[#allocation14 + $0x63c] sm:$0xf0]  ;;  %v8312_v12 = vld [vmem:[#allocation14 + $0x594] sm:$0xf0] }
 0x253   :  { %v8816_v57 = vld [vmem:[#allocation14 + $0x984] sm:$0xf0]  ;;  %v8315_v31 = vor.u32 %v9899_v11, %v8312_v12  ;;  %v7646_v12 = vld [vmem:[#allocation14 + $0x40] sm:$0xf] }
 0x254   :  { %5662 = vmatpush.bf16.msra.mxu2 %v7699_v38  ;;  %5684 = vmatpush.bf16.msrb.mxu0 %v8259_v54  ;;  %v2599_v38 = vadd.f32 %v2598_v8, %v2586_v33  ;;  %v9850_v54 = vld [vmem:[#allocation14 + $0x3f4] sm:$0xf]  ;;  %v8819_v41 = vor.u32 %v10025_v37, %v8816_v57  ;;  %v8010_v37 = vld [vmem:[#allocation14 + $0x318] sm:$0xf]  ;;  %v9040_v11 = vld [vmem:[#allocation14 + $0xb44] sm:$0xf0] }
 0x255   :  { %v8119_v59 = vor.u32 %v9850_v54, %v8116_v44  ;;  %v9934_v8 = vld [vmem:[#allocation14 + $0x694] sm:$0xf] }
 0x256   :  { %5677 = vmatpush.bf16.msra.mxu3 %v7867_v60  ;;  %5651 = vmatpush.bf16.msra.mxu1 %v9207_v27  ;;  %v2711_v1 = vmax.f32 %v2599_v38, 0.0  ;;  %v9941_v60 = vld [vmem:[#allocation14 + $0x6cc] sm:$0xf]  ;;  %v8399_v27 = vor.u32 %v9920_v29, %v8396_v30  ;;  %v9955_v38 = vld [vmem:[#allocation14 + $0x73c] sm:$0xf] }
 0x257   :  { %v8483_v4 = vor.u32 %v9941_v60, %v8480_v61  ;;  %v10018_v44 = vld [vmem:[#allocation14 + $0x934] sm:$0xf]  ;;  %v8340_v60 = vld [vmem:[#allocation14 + $0x5cc] sm:$0xf0] }
 0x258   :  { %5663 = vmatpush.bf16.msra.mxu2 %v7671_v45  ;;  %5685 = vmatpush.bf16.msrb.mxu0 %v8231_v63  ;;  %v9179_v45 = vor.u32 %v10119_v46, %v9178_v36  ;;  %v10665_v55 = vpack.c.bf16 %v2711_v1, %v2711_v1  ;;  %v2587_v10 = vpop.f32.mrf.mxu0  ;;  %v8620_v63 = vld [vmem:[#allocation14 + $0x7fc] sm:$0xf0]  ;;  %v8788_v1 = vld [vmem:[#allocation14 + $0x94c] sm:$0xf0]  ;;  %v9826_v57 = vld [vmem:[#allocation14 + $0x330] sm:$0xf0] }
 0x259   :  { %v8623_v2 = vor.u32 %v9976_v32, %v8620_v63  ;;  %v8791_v32 = vor.u32 %v10018_v44, %v8788_v1  ;;  %v10011_v63 = vld [vmem:[#allocation14 + $0x8fc] sm:$0xf]  ;;  %v7982_v1 = vld [vmem:[#allocation14 + $0x2e0] sm:$0xf] }
 0x25a   :  { %5678 = vmatpush.bf16.msra.mxu3 %v7839_v13  ;;  %5652 = vmatpush.bf16.msra.mxu1 %v9179_v45  ;;  %v8091_v13 = vor.u32 %v9843_v0, %v8088_v3  ;;  %v7814_v45 = vld [vmem:[#allocation14 + $0x190] sm:$0xf]  ;;  %v8760_v0 = vld [vmem:[#allocation14 + $0x914] sm:$0xf0]  ;;  %v10095_v44 = vld [vmem:[#allocation14 + $0xb9c] sm:$0xf] }
 0x25b   :  { %5627 = vmatmul.bf16.vlgmr.msrb.gmra.mxu3 %v10665_v55 }
 0x25c   :  { %5664 = vmatpush.bf16.msra.mxu2 %v7643_v9  ;;  %5686 = vmatpush.bf16.msrb.mxu0 %v8203_v14  ;;  %v8452_v9 = vld [vmem:[#allocation14 + $0x6ac] sm:$0xf0] }
 0x25d   :  { %v8455_v14 = vor.u32 %v9934_v8, %v8452_v9  ;;  %v9770_v8 = vld [vmem:[#allocation14 + $0x170] sm:$0xf0] }
 0x25e   :  { %5723 = vmatpush.bf16.msrb.mxu3 %v8931_v47  ;;  %5697 = vmatpush.bf16.msrb.mxu1 %v8483_v4  ;;  %v9948_v47 = vld [vmem:[#allocation14 + $0x704] sm:$0xf] }
 0x25f   :  { %v8511_v10 = vor.u32 %v9948_v47, %v8508_v48  ;;  %v7702_v47 = vld [vmem:[#allocation14 + $0xb0] sm:$0xf]  ;;  %v9749_v48 = vld [vmem:[#allocation14 + $0xc8] sm:$0xf0] }
 0x260   :  { %5665 = vmatpush.bf16.msra.mxu2 %v7615_v22  ;;  %5687 = vmatpush.bf16.msrb.mxu0 %v8175_v53  ;;  %v2624_v56 = vpop.f32.mrf.mxu3  ;;  %v8427_v22 = vor.u32 %v9927_v17, %v8424_v19  ;;  %v9962_v53 = vld [vmem:[#allocation14 + $0x774] sm:$0xf]  ;;  %v7787_v17 = vor.u32 %v9770_v8, %v7786_v7  ;;  %v10109_v19 = vld [vmem:[#allocation14 + $0xc0c] sm:$0xf]  ;;  %v7926_v8 = vld [vmem:[#allocation14 + $0x270] sm:$0xf] }
 0x261   :  { %v8567_v34 = vor.u32 %v9962_v53, %v8564_v25  ;;  %v9892_v53 = vld [vmem:[#allocation14 + $0x544] sm:$0xf]  ;;  %v8284_v25 = vld [vmem:[#allocation14 + $0x55c] sm:$0xf0]  ;;  %v10081_v7 = vld [vmem:[#allocation14 + $0xb2c] sm:$0xf] }
 0x262   :  { %5724 = vmatpush.bf16.msrb.mxu3 %v8903_v5  ;;  %5698 = vmatpush.bf16.msrb.mxu1 %v8455_v14  ;;  %v8732_v14 = vld [vmem:[#allocation14 + $0x8dc] sm:$0xf0] }
 0x263   :  { %5666 = vmatmul.bf16.vlgmr.msra.gmra.mxu2 %v10638_v16 }
 0x264   :  { %5710 = vmatpush.bf16.msrb.mxu2 %v8707_v20  ;;  %5688 = vmatpush.bf16.msrb.mxu0 %v8147_v42  ;;  %v8844_v20 = vld [vmem:[#allocation14 + $0x9bc] sm:$0xf0]  ;;  %v9913_v42 = vld [vmem:[#allocation14 + $0x5ec] sm:$0xf] }
 0x265   :  { %v8847_v28 = vor.u32 %v10032_v24, %v8844_v20  ;;  %v8371_v36 = vor.u32 %v9913_v42, %v8368_v43  ;;  %v7758_v24 = vld [vmem:[#allocation14 + $0x120] sm:$0xf]  ;;  %v9763_v20 = vld [vmem:[#allocation14 + $0x138] sm:$0xf0]  ;;  %v8011_v42 = vor.u32 %v9826_v57, %v8010_v37 }
 0x266   :  { %5725 = vmatpush.bf16.msrb.mxu3 %v8875_v21  ;;  %5699 = vmatpush.bf16.msrb.mxu1 %v8427_v22  ;;  %v2611_v33 = vpop.f32.mrf.mxu2  ;;  %v8038_v21 = vld [vmem:[#allocation14 + $0x350] sm:$0xf]  ;;  %v9833_v22 = vld [vmem:[#allocation14 + $0x368] sm:$0xf0]  ;;  %v10067_v57 = vld [vmem:[#allocation14 + $0xabc] sm:$0xf] }
 0x267   :  { %v2612_v51 = vadd.f32 %v2611_v33, %v1000_v26  ;;  %v8039_v29 = vor.u32 %v9833_v22, %v8038_v21  ;;  %v7759_v33 = vor.u32 %v9763_v20, %v7758_v24  ;;  %v9756_v26 = vld [vmem:[#allocation14 + $0x100] sm:$0xf0]  ;;  %v7898_v21 = vld [vmem:[#allocation14 + $0x238] sm:$0xf]  ;;  %v9798_v22 = vld [vmem:[#allocation14 + $0x250] sm:$0xf0] }
 0x268   :  { %5711 = vmatpush.bf16.msrb.mxu2 %v8679_v39  ;;  %5689 = vmatpush.bf16.msrb.mxu0 %v8119_v59  ;;  %v8536_v39 = vld [vmem:[#allocation14 + $0x754] sm:$0xf0]  ;;  %v2626_v40 = vpop.f32.mrf.mxu3  ;;  %v9906_v59 = vld [vmem:[#allocation14 + $0x5b4] sm:$0xf]  ;;  %v9728_v24 = vld [vmem:[#allocation14 + $0x20] sm:$0xf0] }
 0x269   :  { %v8539_v54 = vor.u32 %v9955_v38, %v8536_v39  ;;  %v8343_v3 = vor.u32 %v9906_v59, %v8340_v60  ;;  %v2625_v5 = vadd.f32 %v2624_v56, %v2612_v51  ;;  %v9124_v38 = vld [vmem:[#allocation14 + $0xbec] sm:$0xf0]  ;;  %v7730_v39 = vld [vmem:[#allocation14 + $0xe8] sm:$0xf]  ;;  %v8287_v40 = vor.u32 %v9892_v53, %v8284_v25  ;;  %v10088_v59 = vld [vmem:[#allocation14 + $0xb64] sm:$0xf] }
 0x26a   :  { %5726 = vmatpush.bf16.msrb.mxu3 %v8847_v28  ;;  %5700 = vmatpush.bf16.msrb.mxu1 %v8399_v27  ;;  %v2650_v46 = vpop.f32.mrf.mxu1  ;;  %v7954_v60 = vld [vmem:[#allocation14 + $0x2a8] sm:$0xf]  ;;  %v10001_v53 = vld [vmem:[#allocation14 + $0x8a8] sm:$0xf0] }
 0x26b   :  { %5679 = vmatmul.bf16.vlgmr.msra.gmra.mxu3 %v10633_v62 }
 0x26c   :  { %5712 = vmatpush.bf16.msrb.mxu2 %v8651_v58  ;;  %5690 = vmatpush.bf16.msrb.mxu0 %v8091_v13  ;;  %v9777_v58 = vld [vmem:[#allocation14 + $0x1a8] sm:$0xf0]  ;;  %v10004_v13 = vld [vmem:[#allocation14 + $0x8c4] sm:$0xf] }
 0x26d   :  { %v7815_v4 = vor.u32 %v9777_v58, %v7814_v45 }
 0x26e   :  { %5727 = vmatpush.bf16.msrb.mxu3 %v8819_v41  ;;  %5701 = vmatpush.bf16.msrb.mxu1 %v8371_v36  ;;  %v2613_v61 = vpop.f32.mrf.mxu2  ;;  %v9819_v36 = vld [vmem:[#allocation14 + $0x2f8] sm:$0xf0] }
 0x26f   :  { %v7983_v45 = vor.u32 %v9819_v36, %v7982_v1  ;;  %v9812_v61 = vld [vmem:[#allocation14 + $0x2c0] sm:$0xf0] }
 0x270   :  { %5713 = vmatpush.bf16.msrb.mxu2 %v8623_v2  ;;  %5691 = vmatpush.bf16.msrb.mxu0 %v8063_v49  ;;  %v2637_v9 = vpop.f32.mrf.mxu0  ;;  %v8763_v2 = vor.u32 %v10011_v63, %v8760_v0  ;;  %v8735_v49 = vor.u32 %v10004_v13, %v8732_v14  ;;  %v7674_v63 = vld [vmem:[#allocation14 + $0x78] sm:$0xf]  ;;  %v9742_v0 = vld [vmem:[#allocation14 + $0x90] sm:$0xf0]  ;;  %v1001_v13 = vperm.slane %v10660_v50, 7  ;;  %v7899_v50 = vor.u32 %v9798_v22, %v7898_v21 }
 0x271   :  { %v2638_v52 = vadd.f32 %v2637_v9, %v2625_v5  ;;  %v7675_v5 = vor.u32 %v9742_v0, %v7674_v63  ;;  %v9805_v9 = vld [vmem:[#allocation14 + $0x288] sm:$0xf0]  ;;  %v9784_v1 = vld [vmem:[#allocation14 + $0x1e0] sm:$0xf0]  ;;  %v8654_v63 = vld [vmem:[#allocation14 + $0x820] sm:$0xf] }
 0x272   :  { %5728 = vmatpush.bf16.msrb.mxu3 %v8791_v32  ;;  %5702 = vmatpush.bf16.msrb.mxu1 %v8343_v3  ;;  %v2652_v18 = vpop.f32.mrf.mxu1  ;;  %v7703_v32 = vor.u32 %v9749_v48, %v7702_v47  ;;  %v7955_v3 = vor.u32 %v9812_v61, %v7954_v60  ;;  %v8956_v47 = vld [vmem:[#allocation14 + $0xa9c] sm:$0xf0]  ;;  %v8934_v48 = vld [vmem:[#allocation14 + $0xa50] sm:$0xf]  ;;  %v9889_v60 = vld [vmem:[#allocation14 + $0x528] sm:$0xf0] }
 0x273   :  { %v2651_v56 = vadd.f32 %v2650_v46, %v2638_v52  ;;  %v9096_v46 = vld [vmem:[#allocation14 + $0xbb4] sm:$0xf0]  ;;  %v9735_v52 = vld [vmem:[#allocation14 + $0x58] sm:$0xf0]  ;;  %v9043_v18 = vor.u32 %v10081_v7, %v9040_v11 }
 0x274   :  { %5714 = vmatpush.bf16.msrb.mxu2 %v8595_v23  ;;  %v9152_v23 = vld [vmem:[#allocation14 + $0xc24] sm:$0xf0]  ;;  %v9099_v58 = vor.u32 %v10095_v44, %v9096_v46  ;;  %v9987_v0 = vld [vmem:[#allocation14 + $0x838] sm:$0xf0] }
 0x275   :  { %v2712_v28 = vmax.f32 %v2651_v56, 0.0  ;;  %v9155_v30 = vor.u32 %v10109_v19, %v9152_v23  ;;  %v10074_v19 = vld [vmem:[#allocation14 + $0xaf4] sm:$0xf]  ;;  %v9012_v56 = vld [vmem:[#allocation14 + $0xb0c] sm:$0xf0]  ;;  %v8655_v11 = vor.u32 %v9987_v0, %v8654_v63 }
 0x276   :  { %5729 = vmatpush.bf16.msrb.mxu3 %v8763_v2  ;;  %5703 = vmatpush.bf16.msrb.mxu1 %v8315_v31  ;;  %v7927_v31 = vor.u32 %v9805_v9, %v7926_v8  ;;  %v7618_v23 = vld [vmem:[#allocation14 + $0x8] sm:$0xf]  ;;  %v8906_v8 = vld [vmem:[#allocation14 + $0xa18] sm:$0xf]  ;;  %v10050_v9 = vld [vmem:[#allocation14 + $0xa30] sm:$0xf0] }
 0x277   :  { %v10671_v27 = vpack.c.bf16 %v2712_v28, %v2712_v28  ;;  %v9015_v28 = vor.u32 %v10074_v19, %v9012_v56  ;;  %v7842_v44 = vld [vmem:[#allocation14 + $0x1c8] sm:$0xf]  ;;  %v8907_v21 = vor.u32 %v10050_v9, %v8906_v8  ;;  %v10151_v56 = vld [vmem:[#allocation14 + $0xd5c] sm:$0xf]  ;;  %v8542_v63 = vld [vmem:[#allocation14 + $0x740] sm:$0xf] }
 0x278   :  { %5715 = vmatpush.bf16.msrb.mxu2 %v8567_v34  ;;  %v10102_v34 = vld [vmem:[#allocation14 + $0xbd4] sm:$0xf]  ;;  %v2639_v41 = vpop.f32.mrf.mxu0  ;;  %v7843_v61 = vor.u32 %v9784_v1, %v7842_v44  ;;  %v8570_v44 = vld [vmem:[#allocation14 + $0x778] sm:$0xf]  ;;  %v9959_v0 = vld [vmem:[#allocation14 + $0x758] sm:$0xf0] }
 0x279   :  { %5640 = vmatmul.bf16.vlgmr.msra.gmra.mxu0 %v10671_v27  ;;  %v9127_v43 = vor.u32 %v10102_v34, %v9124_v38  ;;  %v8984_v38 = vld [vmem:[#allocation14 + $0xad4] sm:$0xf0]  ;;  %v9966_v1 = vld [vmem:[#allocation14 + $0x790] sm:$0xf0] }
 0x27a   :  { %5730 = vmatpush.bf16.msrb.mxu3 %v8735_v49  ;;  %5736 = vmatpush.bf16.msra.mxu0 %v9155_v30  ;;  %v8710_v49 = vld [vmem:[#allocation14 + $0x890] sm:$0xf]  ;;  %v7870_v30 = vld [vmem:[#allocation14 + $0x200] sm:$0xf]  ;;  %v8794_v8 = vld [vmem:[#allocation14 + $0x938] sm:$0xf] }
 0x27b   :  { %5704 = vmatpush.bf16.msrb.mxu1 %v8287_v40  ;;  %v8711_v37 = vor.u32 %v10001_v53, %v8710_v49  ;;  %v8206_v53 = vld [vmem:[#allocation14 + $0x4a0] sm:$0xf]  ;;  %v10022_v9 = vld [vmem:[#allocation14 + $0x950] sm:$0xf0] }
 0x27c   :  { %5716 = vmatpush.bf16.msrb.mxu2 %v8539_v54  ;;  %v7731_v54 = vor.u32 %v9756_v26, %v7730_v39  ;;  %v8682_v39 = vld [vmem:[#allocation14 + $0x858] sm:$0xf]  ;;  %v9994_v26 = vld [vmem:[#allocation14 + $0x870] sm:$0xf0] }
 0x27d   :  { %5731 = vmatmul.bf16.vlgmr.msrb.gmra.mxu3 %v10665_v55  ;;  %v8683_v46 = vor.u32 %v9994_v26, %v8682_v39  ;;  %v10036_v39 = vld [vmem:[#allocation14 + $0x9c0] sm:$0xf0] }
 0x27e   :  { %5775 = vmatpush.bf16.msra.mxu3 %v8039_v29  ;;  %5737 = vmatpush.bf16.msra.mxu0 %v9127_v43  ;;  %v7619_v29 = vor.u32 %v9728_v24, %v7618_v23  ;;  %v8987_v43 = vor.u32 %v10067_v57, %v8984_v38  ;;  %v8878_v23 = vld [vmem:[#allocation14 + $0x9e0] sm:$0xf]  ;;  %v10043_v24 = vld [vmem:[#allocation14 + $0x9f8] sm:$0xf0]  ;;  %v8850_v38 = vld [vmem:[#allocation14 + $0x9a8] sm:$0xf] }
 0x280   :  { %5717 = vmatpush.bf16.msrb.mxu2 %v8511_v10  ;;  %v2676_v51 = vpop.f32.mrf.mxu3  ;;  %v9068_v10 = vld [vmem:[#allocation14 + $0xb7c] sm:$0xf0] }
 0x282   :  { %5776 = vmatpush.bf16.msra.mxu3 %v8011_v42  ;;  %5738 = vmatpush.bf16.msra.mxu0 %v9099_v58 }
 0x283   :  { %5718 = vmatmul.bf16.vlgmr.msrb.gmra.mxu2 %v10655_v6 }
 0x284   :  { %5762 = vmatpush.bf16.msra.mxu2 %v7815_v4  ;;  %v9071_v4 = vor.u32 %v10088_v59, %v9068_v10  ;;  %v8262_v59 = vld [vmem:[#allocation14 + $0x510] sm:$0xf]  ;;  %v9376_v10 = vld [vmem:[#allocation14 + $0xde4] sm:$0xf0] }
 0x285   :  { %v8263_v7 = vor.u32 %v9889_v60, %v8262_v59  ;;  %v10137_v59 = vld [vmem:[#allocation14 + $0xcec] sm:$0xf]  ;;  %v8150_v60 = vld [vmem:[#allocation14 + $0x430] sm:$0xf] }
 0x286   :  { %5777 = vmatpush.bf16.msra.mxu3 %v7983_v45  ;;  %v2663_v2 = vpop.f32.mrf.mxu2  ;;  %5739 = vmatpush.bf16.msra.mxu0 %v9071_v4  ;;  %v10057_v45 = vld [vmem:[#allocation14 + $0xa68] sm:$0xf0] }
 0x287   :  { %v2664_v25 = vadd.f32 %v2663_v2, %v1001_v13  ;;  %v8935_v4 = vor.u32 %v10057_v45, %v8934_v48  ;;  %v9882_v13 = vld [vmem:[#allocation14 + $0x4f0] sm:$0xf0]  ;;  %v10029_v48 = vld [vmem:[#allocation14 + $0x988] sm:$0xf0] }
 0x288   :  { %5763 = vmatpush.bf16.msra.mxu2 %v7787_v17  ;;  %v2678_v14 = vpop.f32.mrf.mxu3  ;;  %v7647_v17 = vor.u32 %v9735_v52, %v7646_v12  ;;  %v10158_v12 = vld [vmem:[#allocation14 + $0xd94] sm:$0xf]  ;;  %v8234_v52 = vld [vmem:[#allocation14 + $0x4d8] sm:$0xf] }
 0x289   :  { %5692 = vmatmul.bf16.vlgmr.msrb.gmra.mxu0 %v10651_v15  ;;  %v2677_v40 = vadd.f32 %v2676_v51, %v2664_v25  ;;  %v8235_v22 = vor.u32 %v9882_v13, %v8234_v52  ;;  %v9875_v25 = vld [vmem:[#allocation14 + $0x4b8] sm:$0xf0]  ;;  %v8122_v52 = vld [vmem:[#allocation14 + $0x3f8] sm:$0xf]  ;;  %v9854_v13 = vld [vmem:[#allocation14 + $0x410] sm:$0xf0] }
 0x28a   :  { %5778 = vmatpush.bf16.msra.mxu3 %v7955_v3  ;;  %v2702_v20 = vpop.f32.mrf.mxu1  ;;  %5740 = vmatpush.bf16.msra.mxu0 %v9043_v18  ;;  %v8626_v18 = vld [vmem:[#allocation14 + $0x7e8] sm:$0xf] }
 0x28c   :  { %5764 = vmatpush.bf16.msra.mxu2 %v7759_v33  ;;  %v9791_v33 = vld [vmem:[#allocation14 + $0x218] sm:$0xf0] }
 0x28d   :  { %v7871_v41 = vor.u32 %v9791_v33, %v7870_v30  ;;  %v9973_v30 = vld [vmem:[#allocation14 + $0x7c8] sm:$0xf0]  ;;  %v8879_v33 = vor.u32 %v10043_v24, %v8878_v23  ;;  %v8123_v23 = vor.u32 %v9854_v13, %v8122_v52  ;;  %v8766_v24 = vld [vmem:[#allocation14 + $0x900] sm:$0xf]  ;;  %v9938_v52 = vld [vmem:[#allocation14 + $0x6b0] sm:$0xf0] }
 0x28e   :  { %5779 = vmatpush.bf16.msra.mxu3 %v7927_v31  ;;  %v2665_v34 = vpop.f32.mrf.mxu2  ;;  %5741 = vmatpush.bf16.msra.mxu0 %v9015_v28  ;;  %v9348_v31 = vld [vmem:[#allocation14 + $0xdac] sm:$0xf0]  ;;  %v9320_v28 = vld [vmem:[#allocation14 + $0xd74] sm:$0xf0]  ;;  %v9753_v13 = vld [vmem:[#allocation14 + $0xec] sm:$0xf] }
 0x28f   :  { %v9323_v26 = vor.u32 %v10151_v56, %v9320_v28  ;;  %v7816_v56 = vld [vmem:[#allocation14 + $0x1ac] sm:$0xf0]  ;;  %v9847_v28 = vld [vmem:[#allocation14 + $0x3d8] sm:$0xf0] }
 0x290   :  { %5765 = vmatpush.bf16.msra.mxu2 %v7731_v54  ;;  %v2689_v42 = vpop.f32.mrf.mxu0  ;;  %v10060_v54 = vld [vmem:[#allocation14 + $0xa84] sm:$0xf] }
 0x291   :  { %v2690_v36 = vadd.f32 %v2689_v42, %v2677_v40  ;;  %v8959_v3 = vor.u32 %v10060_v54, %v8956_v47  ;;  %v8178_v42 = vld [vmem:[#allocation14 + $0x468] sm:$0xf]  ;;  %v9292_v54 = vld [vmem:[#allocation14 + $0xd3c] sm:$0xf0]  ;;  %v8822_v47 = vld [vmem:[#allocation14 + $0x970] sm:$0xf] }
 0x292   :  { %5780 = vmatpush.bf16.msra.mxu3 %v7899_v50  ;;  %v2704_v58 = vpop.f32.mrf.mxu1  ;;  %5742 = vmatpush.bf16.msra.mxu0 %v8987_v43  ;;  %v3234_v50 = vld [vmem:[#allocation16] sm:$0xff] }
 0x293   :  { %v2703_v51 = vadd.f32 %v2702_v20, %v2690_v36  ;;  %v9351_v20 = vor.u32 %v10158_v12, %v9348_v31  ;;  %v3236_v57 = vperm.slane %v3234_v50, 0  ;;  %v9868_v43 = vld [vmem:[#allocation14 + $0x480] sm:$0xf0]  ;;  %v8851_v36 = vor.u32 %v10036_v39, %v8850_v38  ;;  %v10130_v12 = vld [vmem:[#allocation14 + $0xcb4] sm:$0xf] }
 0x294   :  { %5766 = vmatpush.bf16.msra.mxu2 %v7703_v32  ;;  %v10165_v32 = vld [vmem:[#allocation14 + $0xdcc] sm:$0xf]  ;;  %v9236_v31 = vld [vmem:[#allocation14 + $0xccc] sm:$0xf0]  ;;  %v8094_v50 = vld [vmem:[#allocation14 + $0x3c0] sm:$0xf] }
 0x295   :  { %v9379_v2 = vor.u32 %v10165_v32, %v9376_v10  ;;  %v8571_v32 = vor.u32 %v9966_v1, %v8570_v44  ;;  %v9264_v10 = vld [vmem:[#allocation14 + $0xd04] sm:$0xf0]  ;;  %v8095_v39 = vor.u32 %v9847_v28, %v8094_v50  ;;  %v9840_v1 = vld [vmem:[#allocation14 + $0x3a0] sm:$0xf0]  ;;  %v7704_v50 = vld [vmem:[#allocation14 + $0xcc] sm:$0xf0] }
 0x296   :  { %5781 = vmatpush.bf16.msra.mxu3 %v7871_v41  ;;  %5743 = vmatpush.bf16.msra.mxu0 %v8959_v3  ;;  %v10144_v41 = vld [vmem:[#allocation14 + $0xd24] sm:$0xf]  ;;  %v8823_v3 = vor.u32 %v10029_v48, %v8822_v47  ;;  %v8486_v48 = vld [vmem:[#allocation14 + $0x6d0] sm:$0xf] }
 0x297   :  { %v9295_v58 = vor.u32 %v10144_v41, %v9292_v54  ;;  %v8066_v41 = vld [vmem:[#allocation14 + $0x388] sm:$0xf] }
 0x298   :  { %5767 = vmatpush.bf16.msra.mxu2 %v7675_v5  ;;  %v2713_v5 = vmax.f32 %v2703_v51, 0.0  ;;  %v2691_v19 = vpop.f32.mrf.mxu0  ;;  %v9861_v51 = vld [vmem:[#allocation14 + $0x448] sm:$0xf0] }
 0x299   :  { %5744 = vmatmul.bf16.vlgmr.msra.gmra.mxu0 %v10671_v27 }
 0x29a   :  { %v10678_v14 = vpack.c.bf16 %v2713_v5, %v2713_v5  ;;  %5782 = vmatpush.bf16.msra.mxu3 %v7843_v61  ;;  %5788 = vmatpush.bf16.msrb.mxu0 %v8263_v7  ;;  %v8151_v5 = vor.u32 %v9861_v51, %v8150_v60  ;;  %v9945_v60 = vld [vmem:[#allocation14 + $0x6e8] sm:$0xf0]  ;;  %v9760_v51 = vld [vmem:[#allocation14 + $0x124] sm:$0xf] }
 0x29c   :  { %5768 = vmatpush.bf16.msra.mxu2 %v7647_v17  ;;  %v9980_v17 = vld [vmem:[#allocation14 + $0x800] sm:$0xf0]  ;;  %5653 = vmatmul.bf16.vlgmr.msra.gmra.mxu1 %v10678_v14 }
 0x29d   :  { %5749 = vmatpush.bf16.msra.mxu1 %v9379_v2  ;;  %v8627_v49 = vor.u32 %v9980_v17, %v8626_v18  ;;  %5783 = vmatmul.bf16.vlgmr.msra.gmra.mxu3 %v10633_v62  ;;  %v9267_v2 = vor.u32 %v10137_v59, %v9264_v10  ;;  %v8514_v18 = vld [vmem:[#allocation14 + $0x708] sm:$0xf]  ;;  %v9952_v17 = vld [vmem:[#allocation14 + $0x720] sm:$0xf0] }
 0x29e   :  { %5827 = vmatpush.bf16.msrb.mxu3 %v8935_v4  ;;  %5789 = vmatpush.bf16.msrb.mxu0 %v8235_v22  ;;  %v9774_v22 = vld [vmem:[#allocation14 + $0x194] sm:$0xf] }
 0x2a0   :  { %5769 = vmatpush.bf16.msra.mxu2 %v7619_v29  ;;  %v8598_v29 = vld [vmem:[#allocation14 + $0x7b0] sm:$0xf]  ;;  %v5576_v34 = vpop.f32.mrf.mxu3 }
 0x2a1   :  { %5750 = vmatpush.bf16.msra.mxu1 %v9351_v20  ;;  %v8599_v40 = vor.u32 %v9973_v30, %v8598_v29  ;;  %v10015_v20 = vld [vmem:[#allocation14 + $0x918] sm:$0xf0]  ;;  %v7819_v29 = vor.u32 %v9774_v22, %v7816_v56  ;;  %v7984_v22 = vld [vmem:[#allocation14 + $0x2fc] sm:$0xf0] }
 0x2a2   :  { %5828 = vmatpush.bf16.msrb.mxu3 %v8907_v21  ;;  %v8795_v21 = vor.u32 %v10022_v9, %v8794_v8  ;;  %v10123_v30 = vld [vmem:[#allocation14 + $0xc7c] sm:$0xf]  ;;  %v8487_v8 = vor.u32 %v9945_v60, %v8486_v48  ;;  %v10085_v48 = vld [vmem:[#allocation14 + $0xb48] sm:$0xf0] }
 0x2a3   :  { %5770 = vmatmul.bf16.vlgmr.msra.gmra.mxu2 %v10638_v16 }
 0x2a4   :  { %5814 = vmatpush.bf16.msrb.mxu2 %v8711_v37  ;;  %v8207_v37 = vor.u32 %v9875_v25, %v8206_v53  ;;  %v9239_v53 = vor.u32 %v10130_v12, %v9236_v31  ;;  %v8515_v25 = vor.u32 %v9952_v17, %v8514_v18  ;;  %v10106_v12 = vld [vmem:[#allocation14 + $0xbf0] sm:$0xf0]  ;;  %v7732_v31 = vld [vmem:[#allocation14 + $0x104] sm:$0xf0] }
 0x2a5   :  { %5751 = vmatpush.bf16.msra.mxu1 %v9323_v26  ;;  %v10116_v26 = vld [vmem:[#allocation14 + $0xc44] sm:$0xf] }
 0x2a6   :  { %5829 = vmatpush.bf16.msrb.mxu3 %v8879_v33  ;;  %5790 = vmatpush.bf16.msrb.mxu0 %v8207_v37  ;;  %v5563_v45 = vpop.f32.mrf.mxu2  ;;  %v9208_v33 = vld [vmem:[#allocation14 + $0xc94] sm:$0xf0]  ;;  %v9767_v37 = vld [vmem:[#allocation14 + $0x15c] sm:$0xf] }
 0x2a7   :  { %v5564_v61 = vadd.f32 %v5563_v45, %v3236_v57  ;;  %v7788_v57 = vld [vmem:[#allocation14 + $0x174] sm:$0xf0]  ;;  %v9211_v44 = vor.u32 %v10123_v30, %v9208_v33  ;;  %v9158_v45 = vld [vmem:[#allocation14 + $0xc10] sm:$0xf]  ;;  %v9809_v30 = vld [vmem:[#allocation14 + $0x2ac] sm:$0xf] }
 0x2a8   :  { %5815 = vmatpush.bf16.msrb.mxu2 %v8683_v46  ;;  %v8179_v46 = vor.u32 %v9868_v43, %v8178_v42  ;;  %v5578_v4 = vpop.f32.mrf.mxu3  ;;  %v8738_v42 = vld [vmem:[#allocation14 + $0x8c8] sm:$0xf]  ;;  %v10008_v43 = vld [vmem:[#allocation14 + $0x8e0] sm:$0xf0]  ;;  %v7791_v47 = vor.u32 %v9767_v37, %v7788_v57 }
 0x2a9   :  { %v5577_v7 = vadd.f32 %v5576_v34, %v5564_v61  ;;  %5752 = vmatpush.bf16.msra.mxu1 %v9295_v58  ;;  %v8767_v34 = vor.u32 %v10015_v20, %v8766_v24  ;;  %v10113_v58 = vld [vmem:[#allocation14 + $0xc28] sm:$0xf0]  ;;  %v8739_v59 = vor.u32 %v10008_v43, %v8738_v42  ;;  %v7760_v61 = vld [vmem:[#allocation14 + $0x13c] sm:$0xf0]  ;;  %v7956_v33 = vld [vmem:[#allocation14 + $0x2c4] sm:$0xf0] }
 0x2aa   :  { %5830 = vmatpush.bf16.msrb.mxu3 %v8851_v36  ;;  %5791 = vmatpush.bf16.msrb.mxu0 %v8179_v46  ;;  %v5602_v19 = vpop.f32.mrf.mxu1  ;;  %v9830_v36 = vld [vmem:[#allocation14 + $0x354] sm:$0xf]  ;;  %v8040_v46 = vld [vmem:[#allocation14 + $0x36c] sm:$0xf0]  ;;  %v9159_v4 = vor.u32 %v10113_v58, %v9158_v45  ;;  %v7763_v9 = vor.u32 %v9760_v51, %v7760_v61  ;;  %v8430_v24 = vld [vmem:[#allocation14 + $0x660] sm:$0xf]  ;;  %v7959_v42 = vor.u32 %v9809_v30, %v7956_v33 }
 0x2ab   :  { %v9102_v20 = vld [vmem:[#allocation14 + $0xba0] sm:$0xf]  ;;  %v8402_v57 = vld [vmem:[#allocation14 + $0x628] sm:$0xf]  ;;  %v9917_v45 = vld [vmem:[#allocation14 + $0x608] sm:$0xf0] }
 0x2ac   :  { %5816 = vmatpush.bf16.msrb.mxu2 %v8655_v11  ;;  %v8543_v11 = vor.u32 %v9959_v0, %v8542_v63  ;;  %5705 = vmatmul.bf16.vlgmr.msrb.gmra.mxu1 %v10647_v35  ;;  %v8067_v63 = vor.u32 %v9840_v1, %v8066_v41  ;;  %v8043_v0 = vor.u32 %v9830_v36, %v8040_v46  ;;  %v7676_v41 = vld [vmem:[#allocation14 + $0x94] sm:$0xf0]  ;;  %v8374_v46 = vld [vmem:[#allocation14 + $0x5f0] sm:$0xf]  ;;  %v9732_v58 = vld [vmem:[#allocation14 + $0x44] sm:$0xf] }
 0x2ad   :  { %5753 = vmatpush.bf16.msra.mxu1 %v9267_v2  ;;  %v8458_v2 = vld [vmem:[#allocation14 + $0x698] sm:$0xf]  ;;  %v9795_v61 = vld [vmem:[#allocation14 + $0x23c] sm:$0xf]  ;;  %v8962_v30 = vld [vmem:[#allocation14 + $0xa88] sm:$0xf] }
 0x2ae   :  { %5831 = vmatpush.bf16.msrb.mxu3 %v8823_v3  ;;  %5792 = vmatpush.bf16.msrb.mxu0 %v8151_v5  ;;  %v9823_v5 = vld [vmem:[#allocation14 + $0x31c] sm:$0xf]  ;;  %v8459_v56 = vor.u32 %v9938_v52, %v8458_v2  ;;  %v9725_v2 = vld [vmem:[#allocation14 + $0xc] sm:$0xf]  ;;  %v9998_v52 = vld [vmem:[#allocation14 + $0x894] sm:$0xf] }
 0x2af   :  { %v9781_v33 = vld [vmem:[#allocation14 + $0x1cc] sm:$0xf] }
 0x2b0   :  { %5817 = vmatpush.bf16.msrb.mxu2 %v8627_v49  ;;  %v5565_v49 = vpop.f32.mrf.mxu2  ;;  %v5589_v38 = vpop.f32.mrf.mxu0 }
 0x2b1   :  { %v5590_v54 = vadd.f32 %v5589_v38, %v5577_v7  ;;  %5754 = vmatpush.bf16.msra.mxu1 %v9239_v53  ;;  %v8012_v7 = vld [vmem:[#allocation14 + $0x334] sm:$0xf0]  ;;  %v10099_v49 = vld [vmem:[#allocation14 + $0xbb8] sm:$0xf0]  ;;  %v9074_v38 = vld [vmem:[#allocation14 + $0xb68] sm:$0xf] }
 0x2b2   :  { %5832 = vmatpush.bf16.msrb.mxu3 %v8795_v21  ;;  %5793 = vmatpush.bf16.msrb.mxu0 %v8123_v23  ;;  %v8015_v17 = vor.u32 %v9823_v5, %v8012_v7  ;;  %v9816_v21 = vld [vmem:[#allocation14 + $0x2e4] sm:$0xf]  ;;  %v7735_v23 = vor.u32 %v9753_v13, %v7732_v31  ;;  %v9931_v53 = vld [vmem:[#allocation14 + $0x678] sm:$0xf0]  ;;  %v8346_v5 = vld [vmem:[#allocation14 + $0x5b8] sm:$0xf] }
 0x2b3   :  { %v10684_v10 = vadd.f32 %v5602_v19, %v5590_v54  ;;  %v7987_v28 = vor.u32 %v9816_v21, %v7984_v22  ;;  %v9802_v54 = vld [vmem:[#allocation14 + $0x274] sm:$0xf]  ;;  %v9018_v7 = vld [vmem:[#allocation14 + $0xaf8] sm:$0xf]  ;;  %v8712_v13 = vld [vmem:[#allocation14 + $0x8ac] sm:$0xf0] }
 0x2b4   :  { %5818 = vmatpush.bf16.msrb.mxu2 %v8599_v40  ;;  %v9180_v40 = vld [vmem:[#allocation14 + $0xc5c] sm:$0xf0]  ;;  %v10071_v22 = vld [vmem:[#allocation14 + $0xad8] sm:$0xf0] }
 0x2b5   :  { %5755 = vmatpush.bf16.msra.mxu1 %v9211_v44  ;;  %v9183_v3 = vor.u32 %v10116_v26, %v9180_v40  ;;  %v9924_v26 = vld [vmem:[#allocation14 + $0x640] sm:$0xf0]  ;;  %v9739_v40 = vld [vmem:[#allocation14 + $0x7c] sm:$0xf]  ;;  %v7928_v44 = vld [vmem:[#allocation14 + $0x28c] sm:$0xf0] }
 0x2b6   :  { %5833 = vmatpush.bf16.msrb.mxu3 %v8767_v34  ;;  %5794 = vmatpush.bf16.msrb.mxu0 %v8095_v39  ;;  %v8431_v34 = vor.u32 %v9931_v53, %v8430_v24  ;;  %v10092_v39 = vld [vmem:[#allocation14 + $0xb80] sm:$0xf0]  ;;  %v8403_v1 = vor.u32 %v9924_v26, %v8402_v57  ;;  %v7679_v36 = vor.u32 %v9739_v40, %v7676_v41  ;;  %v8990_v21 = vld [vmem:[#allocation14 + $0xac0] sm:$0xf]  ;;  %v9903_v24 = vld [vmem:[#allocation14 + $0x598] sm:$0xf0] }
 0x2b7   :  { %v9075_v43 = vor.u32 %v10092_v39, %v9074_v38  ;;  %v8684_v53 = vld [vmem:[#allocation14 + $0x874] sm:$0xf0]  ;;  %v10064_v57 = vld [vmem:[#allocation14 + $0xaa0] sm:$0xf0]  ;;  %v10054_v38 = vld [vmem:[#allocation14 + $0xa54] sm:$0xf] }
 0x2b8   :  { %5819 = vmatpush.bf16.msrb.mxu2 %v8571_v32  ;;  %v5604_v32 = vpop.f32.mrf.mxu1  ;;  %v5591_v18 = vpop.f32.mrf.mxu0  ;;  %v8936_v39 = vld [vmem:[#allocation14 + $0xa6c] sm:$0xf0]  ;;  %v9886_v41 = vld [vmem:[#allocation14 + $0x514] sm:$0xf] }
 0x2b9   :  { %5756 = vmatpush.bf16.msra.mxu1 %v9183_v3  ;;  %v7648_v32 = vld [vmem:[#allocation14 + $0x5c] sm:$0xf0]  ;;  %v8375_v3 = vor.u32 %v9917_v45, %v8374_v46  ;;  %v9788_v18 = vld [vmem:[#allocation14 + $0x204] sm:$0xf]  ;;  %v9382_v40 = vld [vmem:[#allocation14 + $0xdd0] sm:$0xf]  ;;  %v8939_v46 = vor.u32 %v10054_v38, %v8936_v39 }
 0x2ba   :  { %5834 = vmatpush.bf16.msrb.mxu3 %v8739_v59  ;;  %5795 = vmatpush.bf16.msrb.mxu0 %v8067_v63  ;;  %v7931_v59 = vor.u32 %v9802_v54, %v7928_v44  ;;  %v7900_v63 = vld [vmem:[#allocation14 + $0x254] sm:$0xf0]  ;;  %v10169_v54 = vld [vmem:[#allocation14 + $0xde8] sm:$0xf0]  ;;  %v9984_v44 = vld [vmem:[#allocation14 + $0x824] sm:$0xf] }
 0x2bb   :  { %v10047_v45 = vld [vmem:[#allocation14 + $0xa1c] sm:$0xf]  ;;  %v9270_v38 = vld [vmem:[#allocation14 + $0xcf0] sm:$0xf]  ;;  %v9858_v39 = vld [vmem:[#allocation14 + $0x434] sm:$0xf] }
 0x2bc   :  { %5820 = vmatpush.bf16.msrb.mxu2 %v8543_v11  ;;  %v9130_v11 = vld [vmem:[#allocation14 + $0xbd8] sm:$0xf]  ;;  %5757 = vmatmul.bf16.vlgmr.msra.gmra.mxu1 %v10678_v14 }
 0x2bd   :  { %v9131_v19 = vor.u32 %v10106_v12, %v9130_v11  ;;  %5801 = vmatpush.bf16.msrb.mxu1 %v8487_v8  ;;  %5796 = vmatmul.bf16.vlgmr.msrb.gmra.mxu0 %v10651_v15  ;;  %v10078_v8 = vld [vmem:[#allocation14 + $0xb10] sm:$0xf0]  ;;  %v7620_v11 = vld [vmem:[#allocation14 + $0x24] sm:$0xf0]  ;;  %v7903_v12 = vor.u32 %v9795_v61, %v7900_v63  ;;  %v8236_v61 = vld [vmem:[#allocation14 + $0x4f4] sm:$0xf0] }
 0x2be   :  { %5879 = vmatpush.bf16.msra.mxu3 %v8043_v0  ;;  %5840 = vmatpush.bf16.msra.mxu0 %v9159_v4  ;;  %v7651_v4 = vor.u32 %v9732_v58, %v7648_v32  ;;  %v9019_v31 = vor.u32 %v10078_v8, %v9018_v7  ;;  %v8908_v58 = vld [vmem:[#allocation14 + $0xa34] sm:$0xf0]  ;;  %v9383_v32 = vor.u32 %v10169_v54, %v9382_v40  ;;  %v10162_v63 = vld [vmem:[#allocation14 + $0xdb0] sm:$0xf0]  ;;  %v10040_v8 = vld [vmem:[#allocation14 + $0x9e4] sm:$0xf] }
 0x2bf   :  { %5835 = vmatmul.bf16.vlgmr.msrb.gmra.mxu3 %v10665_v55  ;;  %v10141_v40 = vld [vmem:[#allocation14 + $0xd08] sm:$0xf0] }
 0x2c0   :  { %5821 = vmatpush.bf16.msrb.mxu2 %v8515_v25  ;;  %v9746_v25 = vld [vmem:[#allocation14 + $0xb4] sm:$0xf] }
 0x2c1   :  { %5802 = vmatpush.bf16.msrb.mxu1 %v8459_v56  ;;  %v7707_v37 = vor.u32 %v9746_v25, %v7704_v50  ;;  %v8715_v56 = vor.u32 %v9998_v52, %v8712_v13  ;;  %v8991_v50 = vor.u32 %v10071_v22, %v8990_v21  ;;  %v9872_v52 = vld [vmem:[#allocation14 + $0x4a4] sm:$0xf]  ;;  %v8208_v13 = vld [vmem:[#allocation14 + $0x4bc] sm:$0xf0]  ;;  %v10033_v21 = vld [vmem:[#allocation14 + $0x9ac] sm:$0xf] }
 0x2c2   :  { %5880 = vmatpush.bf16.msra.mxu3 %v8015_v17  ;;  %5841 = vmatpush.bf16.msra.mxu0 %v9131_v19  ;;  %v7872_v17 = vld [vmem:[#allocation14 + $0x21c] sm:$0xf0]  ;;  %v7623_v19 = vor.u32 %v9725_v2, %v7620_v11  ;;  %v8852_v22 = vld [vmem:[#allocation14 + $0x9c4] sm:$0xf0] }
 0x2c3   :  { %5822 = vmatmul.bf16.vlgmr.msrb.gmra.mxu2 %v10655_v6 }
 0x2c4   :  { %5866 = vmatpush.bf16.msra.mxu2 %v7819_v29  ;;  %v9103_v29 = vor.u32 %v10099_v49, %v9102_v20  ;;  %v7875_v20 = vor.u32 %v9788_v18, %v7872_v17  ;;  %v9991_v49 = vld [vmem:[#allocation14 + $0x85c] sm:$0xf]  ;;  %v9970_v18 = vld [vmem:[#allocation14 + $0x7b4] sm:$0xf]  ;;  %v8600_v17 = vld [vmem:[#allocation14 + $0x7cc] sm:$0xf0] }
 0x2c5   :  { %5803 = vmatpush.bf16.msrb.mxu1 %v8431_v34  ;;  %v7844_v34 = vld [vmem:[#allocation14 + $0x1e4] sm:$0xf0]  ;;  %v8687_v26 = vor.u32 %v9991_v49, %v8684_v53  ;;  %v10148_v53 = vld [vmem:[#allocation14 + $0xd40] sm:$0xf0] }
 0x2c6   :  { %5881 = vmatpush.bf16.msra.mxu3 %v7987_v28  ;;  %5842 = vmatpush.bf16.msra.mxu0 %v9103_v29  ;;  %v5615_v60 = vpop.f32.mrf.mxu2  ;;  %v8290_v28 = vld [vmem:[#allocation14 + $0x548] sm:$0xf]  ;;  %v9896_v29 = vld [vmem:[#allocation14 + $0x560] sm:$0xf0] }
 0x2c7   :  { %v10691_v0 = vadd.f32 %v5615_v60, %v10684_v10  ;;  %v9354_v60 = vld [vmem:[#allocation14 + $0xd98] sm:$0xf]  ;;  %v8180_v49 = vld [vmem:[#allocation14 + $0x484] sm:$0xf0] }
 0x2c8   :  { %5867 = vmatpush.bf16.msra.mxu2 %v7791_v47  ;;  %v9046_v47 = vld [vmem:[#allocation14 + $0xb30] sm:$0xf]  ;;  %v9355_v2 = vor.u32 %v10162_v63, %v9354_v60  ;;  %v8516_v60 = vld [vmem:[#allocation14 + $0x724] sm:$0xf0]  ;;  %v9778_v63 = vld [vmem:[#allocation14 + $0x1b0] sm:$0xf0] }
 0x2c9   :  { %v9047_v51 = vor.u32 %v10085_v48, %v9046_v47  ;;  %5804 = vmatpush.bf16.msrb.mxu1 %v8403_v1  ;;  %v8656_v1 = vld [vmem:[#allocation14 + $0x83c] sm:$0xf0]  ;;  %v8291_v47 = vor.u32 %v9896_v29, %v8290_v28  ;;  %v8855_v28 = vor.u32 %v10033_v21, %v8852_v22  ;;  %v10120_v21 = vld [vmem:[#allocation14 + $0xc60] sm:$0xf0]  ;;  %v9837_v22 = vld [vmem:[#allocation14 + $0x38c] sm:$0xf] }
 0x2ca   :  { %5882 = vmatpush.bf16.msra.mxu3 %v7959_v42  ;;  %5843 = vmatpush.bf16.msra.mxu0 %v9075_v43  ;;  %v8264_v42 = vld [vmem:[#allocation14 + $0x52c] sm:$0xf0]  ;;  %v7847_v43 = vor.u32 %v9781_v33, %v7844_v34 }
 0x2cb   :  { %v8267_v48 = vor.u32 %v9886_v41, %v8264_v42  ;;  %v8824_v33 = vld [vmem:[#allocation14 + $0x98c] sm:$0xf0]  ;;  %v9956_v41 = vld [vmem:[#allocation14 + $0x744] sm:$0xf]  ;;  %v8544_v42 = vld [vmem:[#allocation14 + $0x75c] sm:$0xf0] }
 0x2cc   :  { %5868 = vmatpush.bf16.msra.mxu2 %v7763_v9  ;;  %v9910_v9 = vld [vmem:[#allocation14 + $0x5d0] sm:$0xf0] }
 0x2cd   :  { %5805 = vmatpush.bf16.msrb.mxu1 %v8375_v3  ;;  %v8347_v10 = vor.u32 %v9910_v9, %v8346_v5  ;;  %v9977_v3 = vld [vmem:[#allocation14 + $0x7ec] sm:$0xf]  ;;  %v8911_v5 = vor.u32 %v10047_v45, %v8908_v58  ;;  %v8880_v9 = vld [vmem:[#allocation14 + $0x9fc] sm:$0xf0]  ;;  %v9851_v45 = vld [vmem:[#allocation14 + $0x3fc] sm:$0xf] }
 0x2ce   :  { %5883 = vmatpush.bf16.msra.mxu3 %v7931_v59  ;;  %5844 = vmatpush.bf16.msra.mxu0 %v9047_v51  ;;  %v5617_v25 = vpop.f32.mrf.mxu2  ;;  %v8659_v59 = vor.u32 %v9984_v44, %v8656_v1  ;;  %v9879_v51 = vld [vmem:[#allocation14 + $0x4dc] sm:$0xf]  ;;  %v8796_v1 = vld [vmem:[#allocation14 + $0x954] sm:$0xf0] }
 0x2cf   :  { %v8239_v7 = vor.u32 %v9879_v51, %v8236_v61  ;;  %v9963_v25 = vld [vmem:[#allocation14 + $0x77c] sm:$0xf]  ;;  %v8124_v58 = vld [vmem:[#allocation14 + $0x414] sm:$0xf0] }
 0x2d0   :  { %5869 = vmatpush.bf16.msra.mxu2 %v7735_v23  ;;  %v8318_v23 = vld [vmem:[#allocation14 + $0x580] sm:$0xf]  ;;  %v10019_v44 = vld [vmem:[#allocation14 + $0x93c] sm:$0xf]  ;;  %v7822_v61 = vld [vmem:[#allocation14 + $0x198] sm:$0xf] }
 0x2d1   :  { %5806 = vmatpush.bf16.msrb.mxu1 %v8347_v10  ;;  %v8883_v10 = vor.u32 %v10040_v8, %v8880_v9  ;;  %v8799_v51 = vor.u32 %v10019_v44, %v8796_v1  ;;  %v9935_v1 = vld [vmem:[#allocation14 + $0x69c] sm:$0xf] }
 0x2d2   :  { %5884 = vmatpush.bf16.msra.mxu3 %v7903_v12  ;;  %5845 = vmatpush.bf16.msra.mxu0 %v9019_v31  ;;  %v9326_v12 = vld [vmem:[#allocation14 + $0xd60] sm:$0xf]  ;;  %v10155_v31 = vld [vmem:[#allocation14 + $0xd78] sm:$0xf0] }
 0x2d4   :  { %5870 = vmatpush.bf16.msra.mxu2 %v7707_v37  ;;  %v8319_v37 = vor.u32 %v9903_v24, %v8318_v23  ;;  %v8603_v23 = vor.u32 %v9970_v18, %v8600_v17  ;;  %v9298_v24 = vld [vmem:[#allocation14 + $0xd28] sm:$0xf]  ;;  %v7794_v18 = vld [vmem:[#allocation14 + $0x160] sm:$0xf]  ;;  %v9771_v17 = vld [vmem:[#allocation14 + $0x178] sm:$0xf0] }
 0x2d6   :  { %5885 = vmatpush.bf16.msra.mxu3 %v7875_v20  ;;  %5846 = vmatpush.bf16.msra.mxu0 %v8991_v50  ;;  %v9865_v20 = vld [vmem:[#allocation14 + $0x46c] sm:$0xf]  ;;  %v8572_v50 = vld [vmem:[#allocation14 + $0x794] sm:$0xf0] }
 0x2d7   :  { %5807 = vmatpush.bf16.msrb.mxu1 %v8319_v37  ;;  %v8183_v29 = vor.u32 %v9865_v20, %v8180_v49  ;;  %v9299_v37 = vor.u32 %v10148_v53, %v9298_v24  ;;  %v8068_v49 = vld [vmem:[#allocation14 + $0x3a4] sm:$0xf0]  ;;  %v8046_v53 = vld [vmem:[#allocation14 + $0x358] sm:$0xf] }
 0x2d8   :  { %5871 = vmatpush.bf16.msra.mxu2 %v7679_v36  ;;  %v8963_v36 = vor.u32 %v10064_v57, %v8962_v30  ;;  %v10026_v30 = vld [vmem:[#allocation14 + $0x974] sm:$0xf]  ;;  %v8575_v57 = vor.u32 %v9963_v25, %v8572_v50  ;;  %v7795_v50 = vor.u32 %v9771_v17, %v7794_v18  ;;  %v9921_v17 = vld [vmem:[#allocation14 + $0x62c] sm:$0xf] }
 0x2d9   :  { %v9834_v25 = vld [vmem:[#allocation14 + $0x370] sm:$0xf0] }
 0x2da   :  { %5886 = vmatpush.bf16.msra.mxu3 %v7847_v43  ;;  %5847 = vmatpush.bf16.msra.mxu0 %v8963_v36  ;;  %v8827_v43 = vor.u32 %v10026_v30, %v8824_v33  ;;  %v9160_v30 = vld [vmem:[#allocation14 + $0xc2c] sm:$0xf0] }
 0x2db   :  { %5808 = vmatpush.bf16.msrb.mxu1 %v8291_v47  ;;  %v8547_v47 = vor.u32 %v9956_v41, %v8544_v42  ;;  %v8018_v42 = vld [vmem:[#allocation14 + $0x320] sm:$0xf] }
 0x2dc   :  { %5872 = vmatpush.bf16.msra.mxu2 %v7651_v4  ;;  %v8628_v4 = vld [vmem:[#allocation14 + $0x804] sm:$0xf0] }
 0x2dd   :  { %v8631_v11 = vor.u32 %v9977_v3, %v8628_v4  ;;  %5848 = vmatmul.bf16.vlgmr.msra.gmra.mxu0 %v10671_v27  ;;  %5887 = vmatmul.bf16.vlgmr.msra.gmra.mxu3 %v10633_v62  ;;  %v8127_v3 = vor.u32 %v9851_v45, %v8124_v58  ;;  %v10012_v4 = vld [vmem:[#allocation14 + $0x904] sm:$0xf]  ;;  %v7738_v45 = vld [vmem:[#allocation14 + $0xf0] sm:$0xf]  ;;  %v9757_v58 = vld [vmem:[#allocation14 + $0x108] sm:$0xf0] }
 0x2de   :  { %5931 = vmatpush.bf16.msrb.mxu3 %v8939_v46  ;;  %5892 = vmatpush.bf16.msrb.mxu0 %v8267_v48  ;;  %v10699_v36 = vpop.f32.mrf.mxu3  ;;  %v9271_v46 = vor.u32 %v10141_v40, %v9270_v38  ;;  %v9242_v48 = vld [vmem:[#allocation14 + $0xcb8] sm:$0xf]  ;;  %v9764_v38 = vld [vmem:[#allocation14 + $0x140] sm:$0xf0] }
 0x2df   :  { %5853 = vmatpush.bf16.msra.mxu1 %v9383_v32  ;;  %v10134_v32 = vld [vmem:[#allocation14 + $0xcd0] sm:$0xf0] }
 0x2e0   :  { %5873 = vmatpush.bf16.msra.mxu2 %v7623_v19  ;;  %5809 = vmatmul.bf16.vlgmr.msrb.gmra.mxu1 %v10647_v35  ;;  %v8211_v19 = vor.u32 %v9872_v52, %v8208_v13  ;;  %v9243_v8 = vor.u32 %v10134_v32, %v9242_v48  ;;  %v9214_v52 = vld [vmem:[#allocation14 + $0xc80] sm:$0xf]  ;;  %v10127_v13 = vld [vmem:[#allocation14 + $0xc98] sm:$0xf0]  ;;  %v8460_v48 = vld [vmem:[#allocation14 + $0x6b4] sm:$0xf0] }
 0x2e1   :  { %v9215_v20 = vor.u32 %v10127_v13, %v9214_v52  ;;  %v7962_v52 = vld [vmem:[#allocation14 + $0x2b0] sm:$0xf]  ;;  %v9813_v13 = vld [vmem:[#allocation14 + $0x2c8] sm:$0xf0] }
 0x2e2   :  { %5932 = vmatpush.bf16.msrb.mxu3 %v8911_v5  ;;  %5893 = vmatpush.bf16.msrb.mxu0 %v8239_v7  ;;  %v8768_v5 = vld [vmem:[#allocation14 + $0x91c] sm:$0xf0] }
 0x2e3   :  { %5874 = vmatmul.bf16.vlgmr.msra.gmra.mxu2 %v10638_v16  ;;  %5854 = vmatpush.bf16.msra.mxu1 %v9355_v2  ;;  %v9844_v2 = vld [vmem:[#allocation14 + $0x3c4] sm:$0xf] }
 0x2e4   :  { %5918 = vmatpush.bf16.msrb.mxu2 %v8715_v56  ;;  %v9327_v56 = vor.u32 %v10155_v31, %v9326_v12  ;;  %v7823_v12 = vor.u32 %v9778_v63, %v7822_v61  ;;  %v8771_v31 = vor.u32 %v10012_v4, %v8768_v5  ;;  %v9820_v61 = vld [vmem:[#allocation14 + $0x300] sm:$0xf0]  ;;  %v8463_v63 = vor.u32 %v9935_v1, %v8460_v48  ;;  %v10075_v1 = vld [vmem:[#allocation14 + $0xafc] sm:$0xf]  ;;  %v7626_v48 = vld [vmem:[#allocation14 + $0x10] sm:$0xf] }
 0x2e5   :  { %v9928_v4 = vld [vmem:[#allocation14 + $0x664] sm:$0xf] }
 0x2e6   :  { %5933 = vmatpush.bf16.msrb.mxu3 %v8883_v10  ;;  %5894 = vmatpush.bf16.msrb.mxu0 %v8211_v19  ;;  %v10697_v34 = vpop.f32.mrf.mxu2  ;;  %v9186_v19 = vld [vmem:[#allocation14 + $0xc48] sm:$0xf]  ;;  %v5630_v24 = vpop.f32.mrf.mxu3  ;;  %v10096_v5 = vld [vmem:[#allocation14 + $0xba4] sm:$0xf] }
 0x2e7   :  { %5855 = vmatpush.bf16.msra.mxu1 %v9327_v56  ;;  %v10005_v56 = vld [vmem:[#allocation14 + $0x8cc] sm:$0xf]  ;;  %v9187_v40 = vor.u32 %v10120_v21, %v9186_v19  ;;  %v9076_v19 = vld [vmem:[#allocation14 + $0xb84] sm:$0xf0] }
 0x2e8   :  { %5919 = vmatpush.bf16.msrb.mxu2 %v8687_v26  ;;  %v8152_v26 = vld [vmem:[#allocation14 + $0x44c] sm:$0xf0]  ;;  %v8404_v21 = vld [vmem:[#allocation14 + $0x644] sm:$0xf0] }
 0x2e9   :  { %v8155_v54 = vor.u32 %v9858_v39, %v8152_v26  ;;  %v8071_v39 = vor.u32 %v9837_v22, %v8068_v49  ;;  %v8047_v26 = vor.u32 %v9834_v25, %v8046_v53  ;;  %v7682_v22 = vld [vmem:[#allocation14 + $0x80] sm:$0xf]  ;;  %v7934_v53 = vld [vmem:[#allocation14 + $0x278] sm:$0xf]  ;;  %v9806_v25 = vld [vmem:[#allocation14 + $0x290] sm:$0xf0] }
 0x2ea   :  { %5934 = vmatpush.bf16.msrb.mxu3 %v8855_v28  ;;  %5895 = vmatpush.bf16.msrb.mxu0 %v8183_v29  ;;  %v9942_v28 = vld [vmem:[#allocation14 + $0x6d4] sm:$0xf] }
 0x2eb   :  { %5856 = vmatpush.bf16.msra.mxu1 %v9299_v37  ;;  %v10110_v29 = vld [vmem:[#allocation14 + $0xc14] sm:$0xf]  ;;  %v8488_v37 = vld [vmem:[#allocation14 + $0x6ec] sm:$0xf0] }
 0x2ec   :  { %5920 = vmatpush.bf16.msrb.mxu2 %v8659_v59  ;;  %v9949_v59 = vld [vmem:[#allocation14 + $0x70c] sm:$0xf]  ;;  %v9163_v41 = vor.u32 %v10110_v29, %v9160_v30  ;;  %v9914_v30 = vld [vmem:[#allocation14 + $0x5f4] sm:$0xf] }
 0x2ed   :  { %v8519_v9 = vor.u32 %v9949_v59, %v8516_v60 }
 0x2ee   :  { %5935 = vmatpush.bf16.msrb.mxu3 %v8827_v43  ;;  %5896 = vmatpush.bf16.msrb.mxu0 %v8155_v54  ;;  %v5669_v7 = vpop.f32.mrf.mxu2  ;;  %v9827_v43 = vld [vmem:[#allocation14 + $0x338] sm:$0xf0]  ;;  %v8491_v54 = vor.u32 %v9942_v28, %v8488_v37  ;;  %v10702_v59 = vpop.f32.mrf.mxu3  ;;  %v8407_v28 = vor.u32 %v9921_v17, %v8404_v21  ;;  %v9048_v37 = vld [vmem:[#allocation14 + $0xb4c] sm:$0xf0]  ;;  %v10061_v21 = vld [vmem:[#allocation14 + $0xa8c] sm:$0xf] }
 0x2ef   :  { %5857 = vmatpush.bf16.msra.mxu1 %v9271_v46  ;;  %v10103_v46 = vld [vmem:[#allocation14 + $0xbdc] sm:$0xf]  ;;  %v8019_v32 = vor.u32 %v9827_v43, %v8018_v42  ;;  %v9104_v7 = vld [vmem:[#allocation14 + $0xbbc] sm:$0xf0] }
 0x2f0   :  { %5921 = vmatpush.bf16.msrb.mxu2 %v8631_v11  ;;  %v8096_v11 = vld [vmem:[#allocation14 + $0x3dc] sm:$0xf0]  ;;  %v9799_v42 = vld [vmem:[#allocation14 + $0x258] sm:$0xf0] }
 0x2f1   :  { %v8099_v10 = vor.u32 %v9844_v2, %v8096_v11  ;;  %v9750_v2 = vld [vmem:[#allocation14 + $0xd0] sm:$0xf0] }
 0x2f2   :  { %5936 = vmatpush.bf16.msrb.mxu3 %v8799_v51  ;;  %5897 = vmatpush.bf16.msrb.mxu0 %v8127_v3  ;;  %v7990_v51 = vld [vmem:[#allocation14 + $0x2e8] sm:$0xf]  ;;  %v7739_v3 = vor.u32 %v9757_v58, %v7738_v45  ;;  %v9729_v45 = vld [vmem:[#allocation14 + $0x28] sm:$0xf0] }
 0x2f3   :  { %5858 = vmatpush.bf16.msra.mxu1 %v9243_v8  ;;  %v8432_v8 = vld [vmem:[#allocation14 + $0x67c] sm:$0xf0]  ;;  %v7991_v11 = vor.u32 %v9820_v61, %v7990_v51 }
 0x2f4   :  { %5922 = vmatpush.bf16.msrb.mxu2 %v8603_v23  ;;  %v8740_v23 = vld [vmem:[#allocation14 + $0x8e4] sm:$0xf0] }
 0x2f5   :  { %v8743_v33 = vor.u32 %v10005_v56, %v8740_v23  ;;  %v9743_v56 = vld [vmem:[#allocation14 + $0x98] sm:$0xf0]  ;;  %v7963_v23 = vor.u32 %v9813_v13, %v7962_v52  ;;  %v8320_v52 = vld [vmem:[#allocation14 + $0x59c] sm:$0xf0] }
 0x2f6   :  { %5937 = vmatpush.bf16.msrb.mxu3 %v8771_v31  ;;  %5898 = vmatpush.bf16.msrb.mxu0 %v8099_v10  ;;  %v8435_v31 = vor.u32 %v9928_v4, %v8432_v8  ;;  %v10089_v10 = vld [vmem:[#allocation14 + $0xb6c] sm:$0xf]  ;;  %v10707_v24 = vpop.f32.mrf.mxu0  ;;  %v7683_v29 = vor.u32 %v9743_v56, %v7682_v22  ;;  %v9792_v4 = vld [vmem:[#allocation14 + $0x220] sm:$0xf0]  ;;  %v7627_v8 = vor.u32 %v9729_v45, %v7626_v48  ;;  %v7850_v22 = vld [vmem:[#allocation14 + $0x1d0] sm:$0xf] }
 0x2f7   :  { %5859 = vmatpush.bf16.msra.mxu1 %v9215_v20  ;;  %v5682_v20 = vpop.f32.mrf.mxu3  ;;  %v9079_v49 = vor.u32 %v10089_v10, %v9076_v19  ;;  %v9893_v10 = vld [vmem:[#allocation14 + $0x54c] sm:$0xf]  ;;  %v8292_v19 = vld [vmem:[#allocation14 + $0x564] sm:$0xf0]  ;;  %v8242_v48 = vld [vmem:[#allocation14 + $0x4e0] sm:$0xf] }
 0x2f8   :  { %5923 = vmatpush.bf16.msrb.mxu2 %v8575_v57  ;;  %v7766_v57 = vld [vmem:[#allocation14 + $0x128] sm:$0xf]  ;;  %v9785_v56 = vld [vmem:[#allocation14 + $0x1e8] sm:$0xf0]  ;;  %v9883_v45 = vld [vmem:[#allocation14 + $0x4f8] sm:$0xf0] }
 0x2f9   :  { %v7767_v44 = vor.u32 %v9764_v38, %v7766_v57  ;;  %v8376_v57 = vld [vmem:[#allocation14 + $0x60c] sm:$0xf0]  ;;  %v7654_v38 = vld [vmem:[#allocation14 + $0x48] sm:$0xf] }
 0x2fa   :  { %5938 = vmatpush.bf16.msrb.mxu3 %v8743_v33  ;;  %5899 = vmatpush.bf16.msrb.mxu0 %v8071_v39  ;;  %v10082_v33 = vld [vmem:[#allocation14 + $0xb34] sm:$0xf]  ;;  %v9736_v39 = vld [vmem:[#allocation14 + $0x60] sm:$0xf0]  ;;  %v8379_v43 = vor.u32 %v9914_v30, %v8376_v57  ;;  %v8964_v20 = vld [vmem:[#allocation14 + $0xaa4] sm:$0xf0] }
 0x2fb   :  { %5860 = vmatpush.bf16.msra.mxu1 %v9187_v40  ;;  %v9051_v40 = vor.u32 %v10082_v33, %v9048_v37  ;;  %v9890_v30 = vld [vmem:[#allocation14 + $0x530] sm:$0xf0]  ;;  %v7851_v33 = vor.u32 %v9785_v56, %v7850_v22  ;;  %v9384_v37 = vld [vmem:[#allocation14 + $0xdec] sm:$0xf0]  ;;  %v8662_v57 = vld [vmem:[#allocation14 + $0x828] sm:$0xf] }
 0x2fc   :  { %5924 = vmatpush.bf16.msrb.mxu2 %v8547_v47  ;;  %v9132_v47 = vld [vmem:[#allocation14 + $0xbf4] sm:$0xf0]  ;;  %v10145_v22 = vld [vmem:[#allocation14 + $0xd2c] sm:$0xf]  ;;  %v8186_v56 = vld [vmem:[#allocation14 + $0x470] sm:$0xf] }
 0x2fd   :  { %v9135_v60 = vor.u32 %v10103_v46, %v9132_v47  ;;  %5900 = vmatmul.bf16.vlgmr.msrb.gmra.mxu0 %v10651_v15  ;;  %5939 = vmatmul.bf16.vlgmr.msrb.gmra.mxu3 %v10665_v55  ;;  %v9020_v46 = vld [vmem:[#allocation14 + $0xb14] sm:$0xf0] }
 0x2fe   :  { %5983 = vmatpush.bf16.msra.mxu3 %v8047_v26  ;;  %5944 = vmatpush.bf16.msra.mxu0 %v9163_v41  ;;  %v7935_v26 = vor.u32 %v9806_v25, %v7934_v53  ;;  %v7906_v41 = vld [vmem:[#allocation14 + $0x240] sm:$0xf]  ;;  %v8348_v47 = vld [vmem:[#allocation14 + $0x5d4] sm:$0xf0]  ;;  %v5643_v51 = vpop.f32.mrf.mxu0  ;;  %v10058_v53 = vld [vmem:[#allocation14 + $0xa70] sm:$0xf0] }
 0x2ff   :  { %5905 = vmatpush.bf16.msrb.mxu1 %v8491_v54  ;;  %v7655_v54 = vor.u32 %v9736_v39, %v7654_v38  ;;  %v7907_v58 = vor.u32 %v9799_v42, %v7906_v41  ;;  %v9988_v38 = vld [vmem:[#allocation14 + $0x840] sm:$0xf0]  ;;  %v8295_v42 = vor.u32 %v9893_v10, %v8292_v19  ;;  %v10037_v10 = vld [vmem:[#allocation14 + $0x9c8] sm:$0xf0] }
 0x300   :  { %5925 = vmatpush.bf16.msrb.mxu2 %v8519_v9  ;;  %v7710_v9 = vld [vmem:[#allocation14 + $0xb8] sm:$0xf]  ;;  %5861 = vmatmul.bf16.vlgmr.msra.gmra.mxu1 %v10678_v14  ;;  %v10711_v61 = vpop.f32.mrf.mxu3 }
 0x301   :  { %v7711_v18 = vor.u32 %v9750_v2, %v7710_v9  ;;  %v10068_v9 = vld [vmem:[#allocation14 + $0xac4] sm:$0xf]  ;;  %v8992_v2 = vld [vmem:[#allocation14 + $0xadc] sm:$0xf0] }
 0x302   :  { %5984 = vmatpush.bf16.msra.mxu3 %v8019_v32  ;;  %5945 = vmatpush.bf16.msra.mxu0 %v9135_v60  ;;  %v8718_v32 = vld [vmem:[#allocation14 + $0x898] sm:$0xf]  ;;  %v10002_v60 = vld [vmem:[#allocation14 + $0x8b0] sm:$0xf0]  ;;  %v8995_v17 = vor.u32 %v10068_v9, %v8992_v2  ;;  %v8214_v9 = vld [vmem:[#allocation14 + $0x4a8] sm:$0xf] }
 0x303   :  { %5926 = vmatmul.bf16.vlgmr.msrb.gmra.mxu2 %v10655_v6  ;;  %5906 = vmatpush.bf16.msrb.mxu1 %v8463_v63  ;;  %v9023_v63 = vor.u32 %v10075_v1, %v9020_v46  ;;  %v8663_v46 = vor.u32 %v9988_v38, %v8662_v57  ;;  %v9876_v2 = vld [vmem:[#allocation14 + $0x4c0] sm:$0xf0] }
 0x304   :  { %5970 = vmatpush.bf16.msra.mxu2 %v7823_v12  ;;  %v9107_v12 = vor.u32 %v10096_v5, %v9104_v7 }
 0x306   :  { %5985 = vmatpush.bf16.msra.mxu3 %v7991_v11  ;;  %5946 = vmatpush.bf16.msra.mxu0 %v9107_v12  ;;  %v8719_v11 = vor.u32 %v10002_v60, %v8718_v32  ;;  %v9900_v12 = vld [vmem:[#allocation14 + $0x584] sm:$0xf]  ;;  %v10714_v39 = vpop.f32.mrf.mxu0  ;;  %v8634_v32 = vld [vmem:[#allocation14 + $0x7f0] sm:$0xf]  ;;  %v9981_v60 = vld [vmem:[#allocation14 + $0x808] sm:$0xf0] }
 0x307   :  { %5907 = vmatpush.bf16.msrb.mxu1 %v8435_v31  ;;  %v8690_v31 = vld [vmem:[#allocation14 + $0x860] sm:$0xf] }
 0x308   :  { %5971 = vmatpush.bf16.msra.mxu2 %v7795_v50  ;;  %v10709_v50 = vpop.f32.mrf.mxu2 }
 0x30a   :  { %5986 = vmatpush.bf16.msra.mxu3 %v7963_v23  ;;  %5947 = vmatpush.bf16.msra.mxu0 %v9079_v49  ;;  %v8323_v23 = vor.u32 %v9900_v12, %v8320_v52  ;;  %v8942_v49 = vld [vmem:[#allocation14 + $0xa58] sm:$0xf]  ;;  %v9974_v52 = vld [vmem:[#allocation14 + $0x7d0] sm:$0xf0] }
 0x30b   :  { %5908 = vmatpush.bf16.msrb.mxu1 %v8407_v28  ;;  %v10166_v28 = vld [vmem:[#allocation14 + $0xdd4] sm:$0xf]  ;;  %v8943_v41 = vor.u32 %v10058_v53, %v8942_v49  ;;  %v8606_v12 = vld [vmem:[#allocation14 + $0x7b8] sm:$0xf]  ;;  %v9300_v49 = vld [vmem:[#allocation14 + $0xd44] sm:$0xf0] }
 0x30c   :  { %5972 = vmatpush.bf16.msra.mxu2 %v7767_v44  ;;  %v9907_v44 = vld [vmem:[#allocation14 + $0x5bc] sm:$0xf]  ;;  %v9387_v1 = vor.u32 %v10166_v28, %v9384_v37  ;;  %v8578_v53 = vld [vmem:[#allocation14 + $0x780] sm:$0xf]  ;;  %v10030_v37 = vld [vmem:[#allocation14 + $0x990] sm:$0xf0] }
 0x30d   :  { %v8351_v7 = vor.u32 %v9907_v44, %v8348_v47  ;;  %v10051_v44 = vld [vmem:[#allocation14 + $0xa38] sm:$0xf0] }
 0x30e   :  { %5987 = vmatpush.bf16.msra.mxu3 %v7935_v26  ;;  %5948 = vmatpush.bf16.msra.mxu0 %v9051_v40  ;;  %v5734_v26 = vpop.f32.mrf.mxu3  ;;  %v8967_v40 = vor.u32 %v10061_v21, %v8964_v20  ;;  %v10159_v47 = vld [vmem:[#allocation14 + $0xd9c] sm:$0xf]  ;;  %v8607_v21 = vor.u32 %v9974_v52, %v8606_v12  ;;  %v5629_v20 = vadd.f32 %v10699_v36, %v10691_v0  ;;  %v9862_v0 = vld [vmem:[#allocation14 + $0x450] sm:$0xf0]  ;;  %v8774_v52 = vld [vmem:[#allocation14 + $0x908] sm:$0xf] }
 0x30f   :  { %5909 = vmatpush.bf16.msrb.mxu1 %v8379_v43  ;;  %v9303_v26 = vor.u32 %v10145_v22, %v9300_v49  ;;  %v10124_v49 = vld [vmem:[#allocation14 + $0xc84] sm:$0xf] }
 0x310   :  { %5973 = vmatpush.bf16.msra.mxu2 %v7739_v3  ;;  %v7878_v3 = vld [vmem:[#allocation14 + $0x208] sm:$0xf]  ;;  %v5721_v5 = vpop.f32.mrf.mxu2 }
 0x311   :  { %v7879_v13 = vor.u32 %v9792_v4, %v7878_v3  ;;  %v8886_v3 = vld [vmem:[#allocation14 + $0x9e8] sm:$0xf]  ;;  %v10044_v4 = vld [vmem:[#allocation14 + $0xa00] sm:$0xf0] }
 0x312   :  { %5988 = vmatpush.bf16.msra.mxu3 %v7907_v58  ;;  %5949 = vmatpush.bf16.msra.mxu0 %v9023_v63  ;;  %v9356_v58 = vld [vmem:[#allocation14 + $0xdb4] sm:$0xf0]  ;;  %v8243_v63 = vor.u32 %v9883_v45, %v8242_v48  ;;  %v8802_v45 = vld [vmem:[#allocation14 + $0x940] sm:$0xf] }
 0x313   :  { %5910 = vmatpush.bf16.msrb.mxu1 %v8351_v7  ;;  %v9359_v5 = vor.u32 %v10159_v47, %v9356_v58  ;;  %v8635_v7 = vor.u32 %v9981_v60, %v8634_v32  ;;  %v10023_v58 = vld [vmem:[#allocation14 + $0x958] sm:$0xf0] }
 0x314   :  { %5974 = vmatpush.bf16.msra.mxu2 %v7711_v18  ;;  %v9995_v18 = vld [vmem:[#allocation14 + $0x878] sm:$0xf0] }
 0x315   :  { %v8691_v25 = vor.u32 %v9995_v18, %v8690_v31  ;;  %v8887_v31 = vor.u32 %v10044_v4, %v8886_v3  ;;  %v8215_v18 = vor.u32 %v9876_v2, %v8214_v9  ;;  %v9855_v3 = vld [vmem:[#allocation14 + $0x418] sm:$0xf0]  ;;  %v9244_v4 = vld [vmem:[#allocation14 + $0xcd4] sm:$0xf0] }
 0x316   :  { %5989 = vmatpush.bf16.msra.mxu3 %v7879_v13  ;;  %5950 = vmatpush.bf16.msra.mxu0 %v8995_v17  ;;  %v5695_v13 = vpop.f32.mrf.mxu0  ;;  %v8858_v17 = vld [vmem:[#allocation14 + $0x9b0] sm:$0xf]  ;;  %v9775_v9 = vld [vmem:[#allocation14 + $0x19c] sm:$0xf]  ;;  %v7824_v2 = vld [vmem:[#allocation14 + $0x1b4] sm:$0xf0] }
 0x317   :  { %5911 = vmatpush.bf16.msrb.mxu1 %v8323_v23  ;;  %v9869_v23 = vld [vmem:[#allocation14 + $0x488] sm:$0xf0]  ;;  %v8859_v28 = vor.u32 %v10037_v10, %v8858_v17  ;;  %v10016_v13 = vld [vmem:[#allocation14 + $0x920] sm:$0xf0] }
 0x318   :  { %5975 = vmatpush.bf16.msra.mxu2 %v7683_v29  ;;  %v8270_v29 = vld [vmem:[#allocation14 + $0x518] sm:$0xf] }
 0x319   :  { %v8271_v43 = vor.u32 %v9890_v30, %v8270_v29  ;;  %v5642_v29 = vadd.f32 %v10707_v24, %v5629_v20  ;;  %v8187_v30 = vor.u32 %v9869_v23, %v8186_v56  ;;  %v5654_v57 = vpop.f32.mrf.mxu1  ;;  %v7827_v20 = vor.u32 %v9775_v9, %v7824_v2 }
 0x31a   :  { %5990 = vmatpush.bf16.msra.mxu3 %v7851_v33  ;;  %5951 = vmatpush.bf16.msra.mxu0 %v8967_v40  ;;  %v8830_v33 = vld [vmem:[#allocation14 + $0x978] sm:$0xf] }
 0x31b   :  { %5912 = vmatpush.bf16.msrb.mxu1 %v8295_v42  ;;  %v8158_v42 = vld [vmem:[#allocation14 + $0x438] sm:$0xf]  ;;  %v5655_v36 = vadd.f32 %v5654_v57, %v5642_v29  ;;  %v8831_v24 = vor.u32 %v10030_v37, %v8830_v33  ;;  %v9768_v29 = vld [vmem:[#allocation14 + $0x164] sm:$0xf]  ;;  %v10117_v37 = vld [vmem:[#allocation14 + $0xc4c] sm:$0xf] }
 0x31c   :  { %5976 = vmatpush.bf16.msra.mxu2 %v7655_v54  ;;  %v8914_v54 = vld [vmem:[#allocation14 + $0xa20] sm:$0xf]  ;;  %v8159_v48 = vor.u32 %v9862_v0, %v8158_v42  ;;  %v9188_v57 = vld [vmem:[#allocation14 + $0xc64] sm:$0xf0]  ;;  %v9841_v42 = vld [vmem:[#allocation14 + $0x3a8] sm:$0xf0] }
 0x31d   :  { %v8915_v51 = vor.u32 %v10051_v44, %v8914_v54  ;;  %5952 = vmatmul.bf16.vlgmr.msra.gmra.mxu0 %v10671_v27  ;;  %5991 = vmatmul.bf16.vlgmr.msra.gmra.mxu3 %v10633_v62  ;;  %v8550_v54 = vld [vmem:[#allocation14 + $0x748] sm:$0xf]  ;;  %v9960_v44 = vld [vmem:[#allocation14 + $0x760] sm:$0xf0]  ;;  %6282 = vst [vmem:[#allocation17] sm:$0xff] %v5655_v36 }
 0x31e   :  { %6035 = vmatpush.bf16.msrb.mxu3 %v8943_v41  ;;  %5996 = vmatpush.bf16.msrb.mxu0 %v8271_v43  ;;  %v10138_v41 = vld [vmem:[#allocation14 + $0xcf4] sm:$0xf]  ;;  %v9272_v43 = vld [vmem:[#allocation14 + $0xd0c] sm:$0xf0]  ;;  %v8551_v60 = vor.u32 %v9960_v44, %v8550_v54  ;;  %v9831_v0 = vld [vmem:[#allocation14 + $0x35c] sm:$0xf] }
 0x31f   :  { %5957 = vmatpush.bf16.msra.mxu1 %v9387_v1  ;;  %v10722_v1 = vpop.f32.mrf.mxu0  ;;  %v9275_v32 = vor.u32 %v10138_v41, %v9272_v43  ;;  %v8048_v36 = vld [vmem:[#allocation14 + $0x374] sm:$0xf0] }
 0x320   :  { %5977 = vmatpush.bf16.msra.mxu2 %v7627_v8  ;;  %v10152_v8 = vld [vmem:[#allocation14 + $0xd64] sm:$0xf]  ;;  %5913 = vmatmul.bf16.vlgmr.msrb.gmra.mxu1 %v10647_v35  ;;  %v8494_v44 = vld [vmem:[#allocation14 + $0x6d8] sm:$0xf] }
 0x322   :  { %6036 = vmatpush.bf16.msrb.mxu3 %v8915_v51  ;;  %5997 = vmatpush.bf16.msrb.mxu0 %v8243_v63  ;;  %v10131_v51 = vld [vmem:[#allocation14 + $0xcbc] sm:$0xf]  ;;  %v8130_v63 = vld [vmem:[#allocation14 + $0x400] sm:$0xf] }
 0x323   :  { %5978 = vmatmul.bf16.vlgmr.msra.gmra.mxu2 %v10638_v16  ;;  %5958 = vmatpush.bf16.msra.mxu1 %v9359_v5  ;;  %v8522_v5 = vld [vmem:[#allocation14 + $0x710] sm:$0xf]  ;;  %v8131_v12 = vor.u32 %v9855_v3, %v8130_v63  ;;  %v9247_v17 = vor.u32 %v10131_v51, %v9244_v4  ;;  %v8051_v63 = vor.u32 %v9831_v0, %v8048_v36  ;;  %v10093_v36 = vld [vmem:[#allocation14 + $0xb88] sm:$0xf0] }
 0x324   :  { %6022 = vmatpush.bf16.msrb.mxu2 %v8719_v11  ;;  %v9328_v11 = vld [vmem:[#allocation14 + $0xd7c] sm:$0xf0]  ;;  %v9191_v4 = vor.u32 %v10117_v37, %v9188_v57  ;;  %v9082_v0 = vld [vmem:[#allocation14 + $0xb70] sm:$0xf] }
 0x325   :  { %v9331_v19 = vor.u32 %v10152_v8, %v9328_v11  ;;  %v8803_v8 = vor.u32 %v10023_v58, %v8802_v45  ;;  %v9946_v45 = vld [vmem:[#allocation14 + $0x6f0] sm:$0xf0]  ;;  %v9761_v58 = vld [vmem:[#allocation14 + $0x12c] sm:$0xf] }
 0x326   :  { %6037 = vmatpush.bf16.msrb.mxu3 %v8887_v31  ;;  %5998 = vmatpush.bf16.msrb.mxu0 %v8215_v18  ;;  %v5771_v38 = vpop.f32.mrf.mxu2  ;;  %v5656_v31 = vpop.f32.mrf.mxu1  ;;  %v8495_v2 = vor.u32 %v9946_v45, %v8494_v44  ;;  %v7684_v44 = vld [vmem:[#allocation14 + $0x9c] sm:$0xf0]  ;;  %v7936_v45 = vld [vmem:[#allocation14 + $0x294] sm:$0xf0] }
 0x327   :  { %5959 = vmatpush.bf16.msra.mxu1 %v9331_v19  ;;  %v5784_v18 = vpop.f32.mrf.mxu3  ;;  %v8102_v19 = vld [vmem:[#allocation14 + $0x3c8] sm:$0xf]  ;;  %v9754_v31 = vld [vmem:[#allocation14 + $0xf4] sm:$0xf] }
 0x328   :  { %6023 = vmatpush.bf16.msrb.mxu2 %v8691_v25  ;;  %v9967_v25 = vld [vmem:[#allocation14 + $0x798] sm:$0xf0] }
 0x329   :  { %v8579_v40 = vor.u32 %v9967_v25, %v8578_v53  ;;  %v9216_v53 = vld [vmem:[#allocation14 + $0xc9c] sm:$0xf0]  ;;  %v5747_v25 = vpop.f32.mrf.mxu0 }
 0x32a   :  { %6038 = vmatpush.bf16.msrb.mxu3 %v8859_v28  ;;  %5999 = vmatpush.bf16.msrb.mxu0 %v8187_v30  ;;  %v8775_v28 = vor.u32 %v10016_v13, %v8774_v52  ;;  %v7796_v30 = vld [vmem:[#allocation14 + $0x17c] sm:$0xf0]  ;;  %v9219_v41 = vor.u32 %v10124_v49, %v9216_v53  ;;  %v9939_v13 = vld [vmem:[#allocation14 + $0x6b8] sm:$0xf0]  ;;  %v9110_v49 = vld [vmem:[#allocation14 + $0xba8] sm:$0xf] }
 0x32b   :  { %5960 = vmatpush.bf16.msra.mxu1 %v9303_v26  ;;  %v8746_v26 = vld [vmem:[#allocation14 + $0x8d0] sm:$0xf]  ;;  %v7799_v54 = vor.u32 %v9768_v29, %v7796_v30  ;;  %v9138_v52 = vld [vmem:[#allocation14 + $0xbe0] sm:$0xf]  ;;  %v10100_v53 = vld [vmem:[#allocation14 + $0xbc0] sm:$0xf0] }
 0x32c   :  { %6024 = vmatpush.bf16.msrb.mxu2 %v8663_v46  ;;  %v10724_v46 = vld [vmem:[#allocation16] sm:$0xff]  ;;  %v7712_v29 = vld [vmem:[#allocation14 + $0xd4] sm:$0xf0]  ;;  %v9111_v57 = vor.u32 %v10100_v53, %v9110_v49  ;;  %v7880_v49 = vld [vmem:[#allocation14 + $0x224] sm:$0xf0] }
 0x32d   :  { %v3238_v47 = vperm.slane %v10724_v46, 2  ;;  %v3237_v22 = vperm.slane %v10724_v46, 1  ;;  %v9932_v25 = vld [vmem:[#allocation14 + $0x680] sm:$0xf0] }
 0x32e   :  { %6039 = vmatpush.bf16.msrb.mxu3 %v8831_v24  ;;  %6000 = vmatpush.bf16.msrb.mxu0 %v8159_v48  ;;  %v5773_v23 = vpop.f32.mrf.mxu2  ;;  %v9166_v24 = vld [vmem:[#allocation14 + $0xc18] sm:$0xf]  ;;  %v5706_v3 = vpop.f32.mrf.mxu1 }
 0x32f   :  { %v5772_v11 = vadd.f32 %v5771_v38, %v3238_v47  ;;  %5961 = vmatpush.bf16.msra.mxu1 %v9275_v32  ;;  %v8074_v38 = vld [vmem:[#allocation14 + $0x390] sm:$0xf]  ;;  %v5668_v43 = vadd.f32 %v10697_v34, %v3237_v22  ;;  %v10114_v47 = vld [vmem:[#allocation14 + $0xc30] sm:$0xf0]  ;;  %v7768_v32 = vld [vmem:[#allocation14 + $0x144] sm:$0xf0]  ;;  %v5786_v34 = vpop.f32.mrf.mxu3 }
 0x330   :  { %6025 = vmatpush.bf16.msrb.mxu2 %v8635_v7  ;;  %v9953_v7 = vld [vmem:[#allocation14 + $0x728] sm:$0xf0]  ;;  %v8075_v51 = vor.u32 %v9841_v42, %v8074_v38  ;;  %v7992_v22 = vld [vmem:[#allocation14 + $0x304] sm:$0xf0]  ;;  %v9810_v38 = vld [vmem:[#allocation14 + $0x2b4] sm:$0xf] }
 0x331   :  { %v8523_v10 = vor.u32 %v9953_v7, %v8522_v5  ;;  %v10728_v56 = vadd.f32 %v5784_v18, %v5772_v11  ;;  %v9167_v5 = vor.u32 %v10114_v47, %v9166_v24  ;;  %v9824_v7 = vld [vmem:[#allocation14 + $0x324] sm:$0xf]  ;;  %v7771_v11 = vor.u32 %v9761_v58, %v7768_v32  ;;  %v7740_v18 = vld [vmem:[#allocation14 + $0x10c] sm:$0xf0]  ;;  %v9918_v34 = vld [vmem:[#allocation14 + $0x610] sm:$0xf0] }
 0x332   :  { %6040 = vmatpush.bf16.msrb.mxu3 %v8803_v8  ;;  %6001 = vmatpush.bf16.msrb.mxu0 %v8131_v12  ;;  %v8020_v8 = vld [vmem:[#allocation14 + $0x33c] sm:$0xf0]  ;;  %v7743_v23 = vor.u32 %v9754_v31, %v7740_v18  ;;  %v8410_v42 = vld [vmem:[#allocation14 + $0x630] sm:$0xf]  ;;  %v9083_v47 = vor.u32 %v10093_v36, %v9082_v0 }
 0x333   :  { %5962 = vmatpush.bf16.msra.mxu1 %v9247_v17  ;;  %v8466_v12 = vld [vmem:[#allocation14 + $0x6a0] sm:$0xf] }
 0x334   :  { %6026 = vmatpush.bf16.msrb.mxu2 %v8607_v21  ;;  %v9848_v21 = vld [vmem:[#allocation14 + $0x3e0] sm:$0xf0]  ;;  %v8354_v31 = vld [vmem:[#allocation14 + $0x5c0] sm:$0xf] }
 0x335   :  { %v8103_v33 = vor.u32 %v9848_v21, %v8102_v19  ;;  %v9817_v21 = vld [vmem:[#allocation14 + $0x2ec] sm:$0xf]  ;;  %v9026_v18 = vld [vmem:[#allocation14 + $0xb00] sm:$0xf] }
 0x336   :  { %6041 = vmatpush.bf16.msrb.mxu3 %v8775_v28  ;;  %v9747_v28 = vld [vmem:[#allocation14 + $0xbc] sm:$0xf]  ;;  %v5708_v37 = vpop.f32.mrf.mxu1 }
 0x337   :  { %6002 = vmatpush.bf16.msrb.mxu0 %v8103_v33  ;;  %5963 = vmatpush.bf16.msra.mxu1 %v9219_v41  ;;  %v7995_v33 = vor.u32 %v9817_v21, %v7992_v22  ;;  %v7715_v41 = vor.u32 %v9747_v28, %v7712_v29  ;;  %v7628_v21 = vld [vmem:[#allocation14 + $0x2c] sm:$0xf0]  ;;  %v9999_v22 = vld [vmem:[#allocation14 + $0x89c] sm:$0xf]  ;;  %v8998_v29 = vld [vmem:[#allocation14 + $0xac8] sm:$0xf] }
 0x338   :  { %6027 = vmatpush.bf16.msrb.mxu2 %v8579_v40  ;;  %v10009_v40 = vld [vmem:[#allocation14 + $0x8e8] sm:$0xf0] }
 0x339   :  { %v8747_v48 = vor.u32 %v10009_v40, %v8746_v26  ;;  %v7964_v26 = vld [vmem:[#allocation14 + $0x2cc] sm:$0xf0] }
 0x33a   :  { %v7967_v24 = vor.u32 %v9810_v38, %v7964_v26  ;;  %v9904_v38 = vld [vmem:[#allocation14 + $0x5a0] sm:$0xf0] }
 0x33b   :  { %6042 = vmatpush.bf16.msrb.mxu3 %v8747_v48  ;;  %6003 = vmatpush.bf16.msrb.mxu0 %v8075_v51  ;;  %v9803_v48 = vld [vmem:[#allocation14 + $0x27c] sm:$0xf]  ;;  %v9054_v51 = vld [vmem:[#allocation14 + $0xb38] sm:$0xf] }
 0x33c   :  { %6028 = vmatpush.bf16.msrb.mxu2 %v8551_v60  ;;  %v5681_v60 = vadd.f32 %v10702_v59, %v5668_v43  ;;  %v10107_v59 = vld [vmem:[#allocation14 + $0xbf8] sm:$0xf0]  ;;  %5964 = vmatpush.bf16.msra.mxu1 %v9191_v4  ;;  %v9925_v43 = vld [vmem:[#allocation14 + $0x648] sm:$0xf0] }
 0x33d   :  { %v9139_v19 = vor.u32 %v10107_v59, %v9138_v52  ;;  %v8411_v58 = vor.u32 %v9925_v43, %v8410_v42  ;;  %v9733_v4 = vld [vmem:[#allocation14 + $0x4c] sm:$0xf]  ;;  %v8692_v42 = vld [vmem:[#allocation14 + $0x87c] sm:$0xf0]  ;;  %v8298_v43 = vld [vmem:[#allocation14 + $0x550] sm:$0xf] }
 0x33e   :  { %v5694_v9 = vadd.f32 %v10714_v39, %v5681_v60  ;;  %v8467_v39 = vor.u32 %v9939_v13, %v8466_v12  ;;  %6004 = vmatmul.bf16.vlgmr.msrb.gmra.mxu0 %v10651_v15  ;;  %6043 = vmatmul.bf16.vlgmr.msrb.gmra.mxu3 %v10665_v55  ;;  %v8382_v60 = vld [vmem:[#allocation14 + $0x5f8] sm:$0xf]  ;;  %v7908_v12 = vld [vmem:[#allocation14 + $0x25c] sm:$0xf0] }
 0x33f   :  { %6087 = vmatpush.bf16.msra.mxu3 %v8051_v63  ;;  %6048 = vmatpush.bf16.msra.mxu0 %v9167_v5  ;;  %v10086_v63 = vld [vmem:[#allocation14 + $0xb50] sm:$0xf0]  ;;  %v7656_v5 = vld [vmem:[#allocation14 + $0x64] sm:$0xf0]  ;;  %v8383_v59 = vor.u32 %v9918_v34, %v8382_v60  ;;  %v9390_v60 = vld [vmem:[#allocation14 + $0xdd8] sm:$0xf] }
 0x340   :  { %6029 = vmatpush.bf16.msrb.mxu2 %v8523_v10  ;;  %v5707_v17 = vadd.f32 %v5706_v3, %v5694_v9  ;;  %v8023_v10 = vor.u32 %v9824_v7, %v8020_v8  ;;  %6009 = vmatpush.bf16.msrb.mxu1 %v8495_v2  ;;  %v10741_v7 = vpop.f32.mrf.mxu0  ;;  %v7939_v8 = vor.u32 %v9803_v48, %v7936_v45  ;;  %v5758_v9 = vpop.f32.mrf.mxu1  ;;  %v10065_v48 = vld [vmem:[#allocation14 + $0xaa8] sm:$0xf0]  ;;  %v10055_v45 = vld [vmem:[#allocation14 + $0xa5c] sm:$0xf] }
 0x341   :  { %5965 = vmatmul.bf16.vlgmr.msra.gmra.mxu1 %v10678_v14  ;;  %v9055_v2 = vor.u32 %v10086_v63, %v9054_v51  ;;  %v7659_v13 = vor.u32 %v9733_v4, %v7656_v5  ;;  %v9887_v51 = vld [vmem:[#allocation14 + $0x51c] sm:$0xf]  ;;  %v8272_v63 = vld [vmem:[#allocation14 + $0x534] sm:$0xf0]  ;;  %v10170_v4 = vld [vmem:[#allocation14 + $0xdf0] sm:$0xf0] }
 0x342   :  { %v5720_v30 = vadd.f32 %v10709_v50, %v5707_v17  ;;  %v10079_v17 = vld [vmem:[#allocation14 + $0xb18] sm:$0xf0]  ;;  %v10744_v53 = vpop.f32.mrf.mxu3  ;;  %v9985_v5 = vld [vmem:[#allocation14 + $0x82c] sm:$0xf] }
 0x343   :  { %6030 = vmatmul.bf16.vlgmr.msrb.gmra.mxu2 %v10655_v6  ;;  %6088 = vmatpush.bf16.msra.mxu3 %v8023_v10  ;;  %v9911_v10 = vld [vmem:[#allocation14 + $0x5d8] sm:$0xf0] }
 0x344   :  { %6074 = vmatpush.bf16.msra.mxu2 %v7827_v20  ;;  %v8438_v20 = vld [vmem:[#allocation14 + $0x668] sm:$0xf]  ;;  %6049 = vmatpush.bf16.msra.mxu0 %v9139_v19  ;;  %v5733_v50 = vadd.f32 %v10711_v61, %v5720_v30  ;;  %v9726_v19 = vld [vmem:[#allocation14 + $0x14] sm:$0xf]  ;;  %v10072_v30 = vld [vmem:[#allocation14 + $0xae0] sm:$0xf0] }
 0x345   :  { %6010 = vmatpush.bf16.msrb.mxu1 %v8467_v39  ;;  %v8439_v40 = vor.u32 %v9932_v25, %v8438_v20  ;;  %v8720_v39 = vld [vmem:[#allocation14 + $0x8b4] sm:$0xf0]  ;;  %v9789_v20 = vld [vmem:[#allocation14 + $0x20c] sm:$0xf]  ;;  %v8355_v25 = vor.u32 %v9911_v10, %v8354_v31  ;;  %v7631_v28 = vor.u32 %v9726_v19, %v7628_v21  ;;  %v8999_v36 = vor.u32 %v10072_v30, %v8998_v29  ;;  %v8244_v10 = vld [vmem:[#allocation14 + $0x4fc] sm:$0xf0] }
 0x346   :  { %v10739_v3 = vpop.f32.mrf.mxu2  ;;  %v5746_v61 = vadd.f32 %v10722_v1, %v5733_v50  ;;  %v8723_v37 = vor.u32 %v9999_v22, %v8720_v39  ;;  %v9782_v50 = vld [vmem:[#allocation14 + $0x1d4] sm:$0xf]  ;;  %v10163_v19 = vld [vmem:[#allocation14 + $0xdb8] sm:$0xf0]  ;;  %v9873_v29 = vld [vmem:[#allocation14 + $0x4ac] sm:$0xf] }
 0x347   :  { %6089 = vmatpush.bf16.msra.mxu3 %v7995_v33  ;;  %v9978_v21 = vld [vmem:[#allocation14 + $0x7f4] sm:$0xf]  ;;  %v8216_v30 = vld [vmem:[#allocation14 + $0x4c4] sm:$0xf0] }
 0x348   :  { %6075 = vmatpush.bf16.msra.mxu2 %v7799_v54  ;;  %v9740_v54 = vld [vmem:[#allocation14 + $0x84] sm:$0xf]  ;;  %6050 = vmatpush.bf16.msra.mxu0 %v9111_v57  ;;  %v5759_v52 = vadd.f32 %v5758_v9, %v5746_v61  ;;  %v8326_v57 = vld [vmem:[#allocation14 + $0x588] sm:$0xf]  ;;  %v5799_v26 = vpop.f32.mrf.mxu0  ;;  %v5760_v0 = vpop.f32.mrf.mxu1 }
 0x349   :  { %6011 = vmatpush.bf16.msrb.mxu1 %v8439_v40  ;;  %v7687_v32 = vor.u32 %v9740_v54, %v7684_v44  ;;  %v7883_v40 = vor.u32 %v9789_v20, %v7880_v49  ;;  %v9897_v54 = vld [vmem:[#allocation14 + $0x568] sm:$0xf0]  ;;  %v8970_v44 = vld [vmem:[#allocation14 + $0xa90] sm:$0xf]  ;;  %v8664_v61 = vld [vmem:[#allocation14 + $0x844] sm:$0xf0]  ;;  %v8219_v26 = vor.u32 %v9873_v29, %v8216_v30 }
 0x34a   :  { %6283 = vst [vmem:[#allocation17 + $0x8] sm:$0xff] %v5759_v52  ;;  %v10048_v52 = vld [vmem:[#allocation14 + $0xa24] sm:$0xf]  ;;  %v8667_v31 = vor.u32 %v9985_v5, %v8664_v61  ;;  %v8888_v20 = vld [vmem:[#allocation14 + $0xa04] sm:$0xf0] }
 0x34b   :  { %6090 = vmatpush.bf16.msra.mxu3 %v7967_v24  ;;  %v7852_v24 = vld [vmem:[#allocation14 + $0x1ec] sm:$0xf0]  ;;  %v10142_v5 = vld [vmem:[#allocation14 + $0xd10] sm:$0xf0]  ;;  %v9957_v61 = vld [vmem:[#allocation14 + $0x74c] sm:$0xf] }
 0x34c   :  { %6076 = vmatpush.bf16.msra.mxu2 %v7771_v11  ;;  %6051 = vmatpush.bf16.msra.mxu0 %v9083_v47  ;;  %v9796_v11 = vld [vmem:[#allocation14 + $0x244] sm:$0xf]  ;;  %v8327_v47 = vor.u32 %v9904_v38, %v8326_v57  ;;  %v7855_v34 = vor.u32 %v9782_v50, %v7852_v24  ;;  %v8608_v57 = vld [vmem:[#allocation14 + $0x7d4] sm:$0xf0]  ;;  %v8580_v24 = vld [vmem:[#allocation14 + $0x79c] sm:$0xf0] }
 0x34d   :  { %6012 = vmatpush.bf16.msrb.mxu1 %v8411_v58  ;;  %v7911_v1 = vor.u32 %v9796_v11, %v7908_v12  ;;  %v8944_v58 = vld [vmem:[#allocation14 + $0xa74] sm:$0xf0]  ;;  %v8299_v11 = vor.u32 %v9897_v54, %v8298_v43  ;;  %v8275_v12 = vor.u32 %v9887_v51, %v8272_v63  ;;  %v9866_v43 = vld [vmem:[#allocation14 + $0x474] sm:$0xf]  ;;  %v8188_v54 = vld [vmem:[#allocation14 + $0x48c] sm:$0xf0] }
 0x34e   :  { %v5825_v33 = vpop.f32.mrf.mxu2  ;;  %v8947_v9 = vor.u32 %v10055_v45, %v8944_v58  ;;  %v9964_v50 = vld [vmem:[#allocation14 + $0x784] sm:$0xf]  ;;  %v10027_v45 = vld [vmem:[#allocation14 + $0x97c] sm:$0xf]  ;;  %v8832_v58 = vld [vmem:[#allocation14 + $0x994] sm:$0xf0] }
 0x34f   :  { %6091 = vmatpush.bf16.msra.mxu3 %v7939_v8  ;;  %v8971_v8 = vor.u32 %v10065_v48, %v8970_v44  ;;  %v10156_v33 = vld [vmem:[#allocation14 + $0xd80] sm:$0xf0]  ;;  %v10149_v44 = vld [vmem:[#allocation14 + $0xd48] sm:$0xf0]  ;;  %v8191_v48 = vor.u32 %v9866_v43, %v8188_v54  ;;  %v9278_v51 = vld [vmem:[#allocation14 + $0xcf8] sm:$0xf] }
 0x350   :  { %6077 = vmatpush.bf16.msra.mxu2 %v7743_v23  ;;  %6052 = vmatpush.bf16.msra.mxu0 %v9055_v2  ;;  %v9027_v23 = vor.u32 %v10079_v17, %v9026_v18  ;;  %v5838_v2 = vpop.f32.mrf.mxu3  ;;  %v9362_v18 = vld [vmem:[#allocation14 + $0xda0] sm:$0xf]  ;;  %v9880_v17 = vld [vmem:[#allocation14 + $0x4e4] sm:$0xf]  ;;  %v9859_v63 = vld [vmem:[#allocation14 + $0x43c] sm:$0xf] }
 0x351   :  { %6013 = vmatpush.bf16.msrb.mxu1 %v8383_v59  ;;  %v8916_v59 = vld [vmem:[#allocation14 + $0xa3c] sm:$0xf0]  ;;  %v8247_v39 = vor.u32 %v9880_v17, %v8244_v10  ;;  %v9363_v49 = vor.u32 %v10163_v19, %v9362_v18  ;;  %v8835_v2 = vor.u32 %v10027_v45, %v8832_v58  ;;  %v9852_v10 = vld [vmem:[#allocation14 + $0x404] sm:$0xf]  ;;  %v7802_v43 = vld [vmem:[#allocation14 + $0x168] sm:$0xf] }
 0x352   :  { %v8919_v22 = vor.u32 %v10048_v52, %v8916_v59  ;;  %v10020_v59 = vld [vmem:[#allocation14 + $0x944] sm:$0xf]  ;;  %v9250_v17 = vld [vmem:[#allocation14 + $0xcc0] sm:$0xf]  ;;  %v10006_v45 = vld [vmem:[#allocation14 + $0x8d4] sm:$0xf] }
 0x353   :  { %6092 = vmatpush.bf16.msra.mxu3 %v7911_v1  ;;  %v8636_v1 = vld [vmem:[#allocation14 + $0x80c] sm:$0xf0]  ;;  %v8132_v19 = vld [vmem:[#allocation14 + $0x41c] sm:$0xf0]  ;;  %v9772_v54 = vld [vmem:[#allocation14 + $0x180] sm:$0xf0] }
 0x354   :  { %6078 = vmatpush.bf16.msra.mxu2 %v7715_v41  ;;  %v9992_v41 = vld [vmem:[#allocation14 + $0x864] sm:$0xf]  ;;  %6053 = vmatpush.bf16.msra.mxu0 %v9027_v23  ;;  %v10041_v23 = vld [vmem:[#allocation14 + $0x9ec] sm:$0xf]  ;;  %v8748_v58 = vld [vmem:[#allocation14 + $0x8ec] sm:$0xf0] }
 0x355   :  { %6014 = vmatpush.bf16.msrb.mxu1 %v8355_v25  ;;  %v8639_v25 = vor.u32 %v9978_v21, %v8636_v1  ;;  %v8891_v38 = vor.u32 %v10041_v23, %v8888_v20  ;;  %v10135_v21 = vld [vmem:[#allocation14 + $0xcd8] sm:$0xf0]  ;;  %v9950_v1 = vld [vmem:[#allocation14 + $0x714] sm:$0xf]  ;;  %v7830_v23 = vld [vmem:[#allocation14 + $0x1a0] sm:$0xf] }
 0x356   :  { %v9251_v30 = vor.u32 %v10135_v21, %v9250_v17  ;;  %v5798_v21 = vadd.f32 %v10741_v7, %v10728_v56  ;;  %v9821_v56 = vld [vmem:[#allocation14 + $0x308] sm:$0xf0] }
 0x357   :  { %6093 = vmatpush.bf16.msra.mxu3 %v7883_v40  ;;  %v10034_v40 = vld [vmem:[#allocation14 + $0x9b4] sm:$0xf] }
 0x358   :  { %6079 = vmatpush.bf16.msra.mxu2 %v7687_v32  ;;  %v8695_v32 = vor.u32 %v9992_v41, %v8692_v42  ;;  %6054 = vmatpush.bf16.msra.mxu0 %v8999_v36  ;;  %v8860_v41 = vld [vmem:[#allocation14 + $0x9cc] sm:$0xf0] }
 0x359   :  { %6015 = vmatpush.bf16.msrb.mxu1 %v8327_v47  ;;  %v9306_v36 = vld [vmem:[#allocation14 + $0xd30] sm:$0xf]  ;;  %v8863_v47 = vor.u32 %v10034_v40, %v8860_v41  ;;  %v9222_v41 = vld [vmem:[#allocation14 + $0xc88] sm:$0xf] }
 0x35b   :  { %6094 = vmatpush.bf16.msra.mxu3 %v7855_v34  ;;  %v8160_v34 = vld [vmem:[#allocation14 + $0x454] sm:$0xf0] }
 0x35c   :  { %6080 = vmatpush.bf16.msra.mxu2 %v7659_v13  ;;  %v9391_v13 = vor.u32 %v10170_v4, %v9390_v60  ;;  %6055 = vmatpush.bf16.msra.mxu0 %v8971_v8  ;;  %v8583_v60 = vor.u32 %v9964_v50, %v8580_v24  ;;  %v8552_v8 = vld [vmem:[#allocation14 + $0x764] sm:$0xf0]  ;;  %v8163_v52 = vor.u32 %v9859_v63, %v8160_v34  ;;  %v9194_v24 = vld [vmem:[#allocation14 + $0xc50] sm:$0xf]  ;;  %v9835_v63 = vld [vmem:[#allocation14 + $0x378] sm:$0xf0] }
 0x35d   :  { %6016 = vmatpush.bf16.msrb.mxu1 %v8299_v11  ;;  %v3239_v11 = vperm.slane %v10724_v46, 3  ;;  %v8555_v18 = vor.u32 %v9957_v61, %v8552_v8  ;;  %v9779_v46 = vld [vmem:[#allocation14 + $0x1b8] sm:$0xf0]  ;;  %v7803_v34 = vor.u32 %v9772_v54, %v7802_v43  ;;  %v9168_v61 = vld [vmem:[#allocation14 + $0xc34] sm:$0xf0]  ;;  %v8751_v8 = vor.u32 %v10006_v45, %v8748_v58 }
 0x35e   :  { %6095 = vmatmul.bf16.vlgmr.msra.gmra.mxu3 %v10633_v62  ;;  %v7831_v40 = vor.u32 %v9779_v46, %v7830_v23  ;;  %v10104_v23 = vld [vmem:[#allocation14 + $0xbe4] sm:$0xf]  ;;  %v9140_v46 = vld [vmem:[#allocation14 + $0xbfc] sm:$0xf0]  ;;  %v7970_v54 = vld [vmem:[#allocation14 + $0x2b8] sm:$0xf] }
 0x35f   :  { %6139 = vmatpush.bf16.msrb.mxu3 %v8947_v9  ;;  %6056 = vmatmul.bf16.vlgmr.msra.gmra.mxu0 %v10671_v27  ;;  %v10750_v9 = vpop.f32.mrf.mxu0  ;;  %v9084_v45 = vld [vmem:[#allocation14 + $0xb8c] sm:$0xf0] }
 0x360   :  { %6081 = vmatpush.bf16.msra.mxu2 %v7631_v28  ;;  %6100 = vmatpush.bf16.msrb.mxu0 %v8275_v12  ;;  %v9334_v28 = vld [vmem:[#allocation14 + $0xd68] sm:$0xf]  ;;  %v10753_v12 = vpop.f32.mrf.mxu1  ;;  %v5888_v29 = vpop.f32.mrf.mxu3  ;;  %v8412_v58 = vld [vmem:[#allocation14 + $0x64c] sm:$0xf0] }
 0x361   :  { %6061 = vmatpush.bf16.msra.mxu1 %v9391_v13  ;;  %v9335_v42 = vor.u32 %v10156_v33, %v9334_v28  ;;  %v8804_v13 = vld [vmem:[#allocation14 + $0x95c] sm:$0xf0]  ;;  %v8776_v28 = vld [vmem:[#allocation14 + $0x924] sm:$0xf0] }
 0x362   :  { %6017 = vmatmul.bf16.vlgmr.msrb.gmra.mxu1 %v10647_v35 }
 0x363   :  { %6082 = vmatmul.bf16.vlgmr.msra.gmra.mxu2 %v10638_v16  ;;  %6140 = vmatpush.bf16.msrb.mxu3 %v8919_v22  ;;  %v8524_v22 = vld [vmem:[#allocation14 + $0x72c] sm:$0xf0] }
 0x364   :  { %6126 = vmatpush.bf16.msrb.mxu2 %v8723_v37  ;;  %v9971_v37 = vld [vmem:[#allocation14 + $0x7bc] sm:$0xf]  ;;  %6101 = vmatpush.bf16.msrb.mxu0 %v8247_v39  ;;  %v8807_v39 = vor.u32 %v10020_v59, %v8804_v13  ;;  %v8527_v33 = vor.u32 %v9950_v1, %v8524_v22 }
 0x365   :  { %6062 = vmatpush.bf16.msra.mxu1 %v9363_v49  ;;  %v8611_v0 = vor.u32 %v9971_v37, %v8608_v57  ;;  %v8135_v49 = vor.u32 %v9852_v10, %v8132_v19  ;;  %v9845_v37 = vld [vmem:[#allocation14 + $0x3cc] sm:$0xf]  ;;  %v8104_v57 = vld [vmem:[#allocation14 + $0x3e4] sm:$0xf0]  ;;  %v9828_v19 = vld [vmem:[#allocation14 + $0x340] sm:$0xf0] }
 0x366   :  { %v5875_v4 = vpop.f32.mrf.mxu2  ;;  %v8107_v50 = vor.u32 %v9845_v37, %v8104_v57  ;;  %v8026_v10 = vld [vmem:[#allocation14 + $0x328] sm:$0xf]  ;;  %v9929_v57 = vld [vmem:[#allocation14 + $0x66c] sm:$0xf] }
 0x367   :  { %6141 = vmatpush.bf16.msrb.mxu3 %v8891_v38  ;;  %v5876_v20 = vadd.f32 %v5875_v4, %v3239_v11  ;;  %v9943_v4 = vld [vmem:[#allocation14 + $0x6dc] sm:$0xf]  ;;  %v7774_v11 = vld [vmem:[#allocation14 + $0x130] sm:$0xf] }
 0x368   :  { %6127 = vmatpush.bf16.msrb.mxu2 %v8695_v32  ;;  %6102 = vmatpush.bf16.msrb.mxu0 %v8219_v26  ;;  %v9307_v32 = vor.u32 %v10149_v44, %v9306_v36  ;;  %v5812_v44 = vpop.f32.mrf.mxu1 }
 0x369   :  { %6063 = vmatpush.bf16.msra.mxu1 %v9335_v42  ;;  %v10755_v38 = vadd.f32 %v5888_v29, %v5876_v20  ;;  %v10128_v42 = vld [vmem:[#allocation14 + $0xca0] sm:$0xf0]  ;;  %v8468_v20 = vld [vmem:[#allocation14 + $0x6bc] sm:$0xf0]  ;;  %v8027_v29 = vor.u32 %v9828_v19, %v8026_v10  ;;  %v9814_v44 = vld [vmem:[#allocation14 + $0x2d0] sm:$0xf0] }
 0x36b   :  { %6142 = vmatpush.bf16.msrb.mxu3 %v8863_v47  ;;  %v10121_v47 = vld [vmem:[#allocation14 + $0xc68] sm:$0xf0] }
 0x36c   :  { %6128 = vmatpush.bf16.msrb.mxu2 %v8667_v31  ;;  %6103 = vmatpush.bf16.msrb.mxu0 %v8191_v48  ;;  %v9279_v31 = vor.u32 %v10142_v5, %v9278_v51  ;;  %v9838_v48 = vld [vmem:[#allocation14 + $0x394] sm:$0xf]  ;;  %v8054_v51 = vld [vmem:[#allocation14 + $0x360] sm:$0xf]  ;;  %v10111_v5 = vld [vmem:[#allocation14 + $0xc1c] sm:$0xf] }
 0x36d   :  { %6064 = vmatpush.bf16.msra.mxu1 %v9307_v32  ;;  %v9223_v32 = vor.u32 %v10128_v42, %v9222_v41  ;;  %v8055_v13 = vor.u32 %v9835_v63, %v8054_v51  ;;  %v9171_v17 = vor.u32 %v10111_v5, %v9168_v61  ;;  %v7718_v41 = vld [vmem:[#allocation14 + $0xc0] sm:$0xf]  ;;  %v9751_v42 = vld [vmem:[#allocation14 + $0xd8] sm:$0xf0]  ;;  %v7971_v51 = vor.u32 %v9814_v44, %v7970_v54 }
 0x36e   :  { %v5877_v26 = vpop.f32.mrf.mxu2 }
 0x36f   :  { %6143 = vmatpush.bf16.msrb.mxu3 %v8835_v2  ;;  %v8496_v2 = vld [vmem:[#allocation14 + $0x6f4] sm:$0xf0]  ;;  %v10097_v26 = vld [vmem:[#allocation14 + $0xbac] sm:$0xf] }
 0x370   :  { %6129 = vmatpush.bf16.msrb.mxu2 %v8639_v25  ;;  %6104 = vmatpush.bf16.msrb.mxu0 %v8163_v52  ;;  %v10013_v25 = vld [vmem:[#allocation14 + $0x90c] sm:$0xf]  ;;  %v8499_v1 = vor.u32 %v9943_v4, %v8496_v2  ;;  %v9807_v4 = vld [vmem:[#allocation14 + $0x298] sm:$0xf0] }
 0x371   :  { %6065 = vmatpush.bf16.msra.mxu1 %v9279_v31  ;;  %v8779_v36 = vor.u32 %v10013_v25, %v8776_v28  ;;  %v9765_v52 = vld [vmem:[#allocation14 + $0x148] sm:$0xf0]  ;;  %v5890_v31 = vpop.f32.mrf.mxu3  ;;  %v9758_v25 = vld [vmem:[#allocation14 + $0x110] sm:$0xf0]  ;;  %v5811_v28 = vadd.f32 %v10753_v12, %v5798_v21  ;;  %v8440_v12 = vld [vmem:[#allocation14 + $0x684] sm:$0xf0] }
 0x372   :  { %v7775_v22 = vor.u32 %v9765_v52, %v7774_v11  ;;  %v10083_v2 = vld [vmem:[#allocation14 + $0xb3c] sm:$0xf]  ;;  %v9056_v11 = vld [vmem:[#allocation14 + $0xb54] sm:$0xf0]  ;;  %v9737_v31 = vld [vmem:[#allocation14 + $0x68] sm:$0xf0] }
 0x373   :  { %6144 = vmatpush.bf16.msrb.mxu3 %v8807_v39  ;;  %v9936_v39 = vld [vmem:[#allocation14 + $0x6a4] sm:$0xf]  ;;  %v9059_v19 = vor.u32 %v10083_v2, %v9056_v11  ;;  %v7914_v21 = vld [vmem:[#allocation14 + $0x248] sm:$0xf]  ;;  %v9891_v2 = vld [vmem:[#allocation14 + $0x538] sm:$0xf0] }
 0x374   :  { %6130 = vmatpush.bf16.msrb.mxu2 %v8611_v0  ;;  %v5851_v0 = vpop.f32.mrf.mxu0  ;;  %6105 = vmatpush.bf16.msrb.mxu0 %v8135_v49  ;;  %v7746_v49 = vld [vmem:[#allocation14 + $0xf8] sm:$0xf]  ;;  %v8471_v7 = vor.u32 %v9936_v39, %v8468_v20  ;;  %v10076_v20 = vld [vmem:[#allocation14 + $0xb04] sm:$0xf] }
 0x375   :  { %6066 = vmatpush.bf16.msra.mxu1 %v9251_v30  ;;  %v9143_v30 = vor.u32 %v10104_v23, %v9140_v46  ;;  %v7747_v37 = vor.u32 %v9758_v25, %v7746_v49  ;;  %v5824_v0 = vadd.f32 %v10739_v3, %v5811_v28  ;;  %v9908_v46 = vld [vmem:[#allocation14 + $0x5c4] sm:$0xf]  ;;  %v9028_v49 = vld [vmem:[#allocation14 + $0xb1c] sm:$0xf0]  ;;  %v7634_v28 = vld [vmem:[#allocation14 + $0x18] sm:$0xf] }
 0x376   :  { %v8356_v25 = vld [vmem:[#allocation14 + $0x5dc] sm:$0xf0] }
 0x377   :  { %6145 = vmatpush.bf16.msrb.mxu3 %v8779_v36  ;;  %v5837_v3 = vadd.f32 %v10744_v53, %v5824_v0 }
 0x378   :  { %6131 = vmatpush.bf16.msrb.mxu2 %v8583_v60  ;;  %v8076_v60 = vld [vmem:[#allocation14 + $0x3ac] sm:$0xf0]  ;;  %6106 = vmatpush.bf16.msrb.mxu0 %v8107_v50  ;;  %v8443_v50 = vor.u32 %v9929_v57, %v8440_v12  ;;  %v10069_v12 = vld [vmem:[#allocation14 + $0xacc] sm:$0xf] }
 0x379   :  { %v8079_v59 = vor.u32 %v9838_v48, %v8076_v60  ;;  %6067 = vmatpush.bf16.msra.mxu1 %v9223_v32  ;;  %v10090_v48 = vld [vmem:[#allocation14 + $0xb74] sm:$0xf]  ;;  %v7690_v32 = vld [vmem:[#allocation14 + $0x88] sm:$0xf]  ;;  %v9744_v60 = vld [vmem:[#allocation14 + $0xa0] sm:$0xf0]  ;;  %v5850_v53 = vadd.f32 %v10750_v9, %v5837_v3 }
 0x37a   :  { %v9087_v63 = vor.u32 %v10090_v48, %v9084_v45  ;;  %v7691_v61 = vor.u32 %v9744_v60, %v7690_v32  ;;  %v9730_v9 = vld [vmem:[#allocation14 + $0x30] sm:$0xf0]  ;;  %v7858_v60 = vld [vmem:[#allocation14 + $0x1d8] sm:$0xf] }
 0x37b   :  { %6146 = vmatpush.bf16.msrb.mxu3 %v8751_v8  ;;  %v9915_v8 = vld [vmem:[#allocation14 + $0x5fc] sm:$0xf]  ;;  %v9894_v45 = vld [vmem:[#allocation14 + $0x554] sm:$0xf] }
 0x37c   :  { %6132 = vmatpush.bf16.msrb.mxu2 %v8555_v18  ;;  %v9195_v18 = vor.u32 %v10121_v47, %v9194_v24  ;;  %6107 = vmatpush.bf16.msrb.mxu0 %v8079_v59  ;;  %v7719_v24 = vor.u32 %v9751_v42, %v7718_v41  ;;  %v9922_v47 = vld [vmem:[#allocation14 + $0x634] sm:$0xf]  ;;  %v8384_v59 = vld [vmem:[#allocation14 + $0x614] sm:$0xf0]  ;;  %v9000_v41 = vld [vmem:[#allocation14 + $0xae4] sm:$0xf0] }
 0x37d   :  { %v8415_v5 = vor.u32 %v9922_v47, %v8412_v58  ;;  %v5862_v10 = vpop.f32.mrf.mxu1  ;;  %v8387_v39 = vor.u32 %v9915_v8, %v8384_v59  ;;  %v9003_v48 = vor.u32 %v10069_v12, %v9000_v41  ;;  %v8300_v58 = vld [vmem:[#allocation14 + $0x56c] sm:$0xf0]  ;;  %v10062_v32 = vld [vmem:[#allocation14 + $0xa94] sm:$0xf]  ;;  %v8278_v8 = vld [vmem:[#allocation14 + $0x520] sm:$0xf] }
 0x37e   :  { %6068 = vmatpush.bf16.msra.mxu1 %v9195_v18  ;;  %6147 = vmatmul.bf16.vlgmr.msrb.gmra.mxu3 %v10665_v55  ;;  %v10769_v18 = vpop.f32.mrf.mxu0  ;;  %v9786_v3 = vld [vmem:[#allocation14 + $0x1f0] sm:$0xf0]  ;;  %v9392_v59 = vld [vmem:[#allocation14 + $0xdf4] sm:$0xf0]  ;;  %v9336_v12 = vld [vmem:[#allocation14 + $0xd84] sm:$0xf0] }
 0x37f   :  { %6191 = vmatpush.bf16.msra.mxu3 %v8055_v13  ;;  %6108 = vmatmul.bf16.vlgmr.msrb.gmra.mxu0 %v10651_v15  ;;  %v7662_v13 = vld [vmem:[#allocation14 + $0x50] sm:$0xf]  ;;  %v7859_v11 = vor.u32 %v9786_v3, %v7858_v60  ;;  %v8614_v41 = vld [vmem:[#allocation14 + $0x7c0] sm:$0xf] }
 0x380   :  { %6133 = vmatpush.bf16.msrb.mxu2 %v8527_v33  ;;  %6152 = vmatpush.bf16.msra.mxu0 %v9171_v17  ;;  %v7998_v33 = vld [vmem:[#allocation14 + $0x2f0] sm:$0xf]  ;;  %v7663_v23 = vor.u32 %v9737_v31, %v7662_v13  ;;  %v10771_v57 = vpop.f32.mrf.mxu3  ;;  %v9989_v31 = vld [vmem:[#allocation14 + $0x848] sm:$0xf0]  ;;  %v8838_v3 = vld [vmem:[#allocation14 + $0x980] sm:$0xf] }
 0x381   :  { %6069 = vmatmul.bf16.vlgmr.msra.gmra.mxu1 %v10678_v14  ;;  %v7999_v36 = vor.u32 %v9821_v56, %v7998_v33  ;;  %v10003_v33 = vld [vmem:[#allocation14 + $0x8b8] sm:$0xf0]  ;;  %v9031_v56 = vor.u32 %v10076_v20, %v9028_v49  ;;  %v8670_v13 = vld [vmem:[#allocation14 + $0x830] sm:$0xf]  ;;  %v8250_v20 = vld [vmem:[#allocation14 + $0x4e8] sm:$0xf] }
 0x382   :  { %6113 = vmatpush.bf16.msrb.mxu1 %v8499_v1  ;;  %v9800_v1 = vld [vmem:[#allocation14 + $0x260] sm:$0xf0] }
 0x383   :  { %6134 = vmatmul.bf16.vlgmr.msrb.gmra.mxu2 %v10655_v6  ;;  %6192 = vmatpush.bf16.msra.mxu3 %v8027_v29  ;;  %v7915_v29 = vor.u32 %v9800_v1, %v7914_v21  ;;  %v8279_v21 = vor.u32 %v9891_v2, %v8278_v8  ;;  %v8922_v1 = vld [vmem:[#allocation14 + $0xa28] sm:$0xf]  ;;  %v9884_v49 = vld [vmem:[#allocation14 + $0x500] sm:$0xf0]  ;;  %v9280_v2 = vld [vmem:[#allocation14 + $0xd14] sm:$0xf0] }
 0x384   :  { %6178 = vmatpush.bf16.msra.mxu2 %v7831_v40  ;;  %v9112_v40 = vld [vmem:[#allocation14 + $0xbc4] sm:$0xf0]  ;;  %6153 = vmatpush.bf16.msra.mxu0 %v9143_v30  ;;  %v8726_v30 = vld [vmem:[#allocation14 + $0x8a0] sm:$0xf] }
 0x385   :  { %v9115_v43 = vor.u32 %v10097_v26, %v9112_v40  ;;  %v8359_v26 = vor.u32 %v9908_v46, %v8356_v25  ;;  %v7635_v40 = vor.u32 %v9730_v9, %v7634_v28  ;;  %v8727_v0 = vor.u32 %v10003_v33, %v8726_v30  ;;  %v5864_v47 = vpop.f32.mrf.mxu1  ;;  %v10160_v46 = vld [vmem:[#allocation14 + $0xda4] sm:$0xf]  ;;  %v9364_v25 = vld [vmem:[#allocation14 + $0xdbc] sm:$0xf0]  ;;  %v8642_v28 = vld [vmem:[#allocation14 + $0x7f8] sm:$0xf] }
 0x386   :  { %6114 = vmatpush.bf16.msrb.mxu1 %v8471_v7  ;;  %v10766_v52 = vpop.f32.mrf.mxu2  ;;  %v7886_v7 = vld [vmem:[#allocation14 + $0x210] sm:$0xf]  ;;  %v5903_v54 = vpop.f32.mrf.mxu0  ;;  %v9982_v9 = vld [vmem:[#allocation14 + $0x810] sm:$0xf0]  ;;  %v10045_v33 = vld [vmem:[#allocation14 + $0xa08] sm:$0xf0] }
 0x387   :  { %6193 = vmatpush.bf16.msra.mxu3 %v7999_v36  ;;  %v9901_v36 = vld [vmem:[#allocation14 + $0x58c] sm:$0xf]  ;;  %v8894_v30 = vld [vmem:[#allocation14 + $0x9f0] sm:$0xf]  ;;  %v10038_v54 = vld [vmem:[#allocation14 + $0x9d0] sm:$0xf0] }
 0x388   :  { %6179 = vmatpush.bf16.msra.mxu2 %v7803_v34  ;;  %6154 = vmatpush.bf16.msra.mxu0 %v9115_v43  ;;  %v7942_v34 = vld [vmem:[#allocation14 + $0x280] sm:$0xf]  ;;  %v8328_v43 = vld [vmem:[#allocation14 + $0x5a4] sm:$0xf0]  ;;  %v8194_v47 = vld [vmem:[#allocation14 + $0x478] sm:$0xf] }
 0x389   :  { %v7943_v17 = vor.u32 %v9807_v4, %v7942_v34  ;;  %v8950_v34 = vld [vmem:[#allocation14 + $0xa60] sm:$0xf]  ;;  %v10059_v4 = vld [vmem:[#allocation14 + $0xa78] sm:$0xf0] }
 0x38a   :  { %6115 = vmatpush.bf16.msrb.mxu1 %v8443_v50  ;;  %v8698_v50 = vld [vmem:[#allocation14 + $0x868] sm:$0xf] }
 0x38b   :  { %6194 = vmatpush.bf16.msra.mxu3 %v7971_v51  ;;  %v8331_v51 = vor.u32 %v9901_v36, %v8328_v43  ;;  %v8866_v43 = vld [vmem:[#allocation14 + $0x9b8] sm:$0xf] }
 0x38c   :  { %6180 = vmatpush.bf16.msra.mxu2 %v7775_v22  ;;  %6155 = vmatpush.bf16.msra.mxu0 %v9087_v63  ;;  %v5863_v22 = vadd.f32 %v5862_v10, %v5850_v53  ;;  %v8972_v63 = vld [vmem:[#allocation14 + $0xaac] sm:$0xf0]  ;;  %v5942_v10 = vpop.f32.mrf.mxu3 }
 0x38d   :  { %v8975_v53 = vor.u32 %v10062_v32, %v8972_v63  ;;  %v8867_v32 = vor.u32 %v10038_v54, %v8866_v43 }
 0x38e   :  { %6116 = vmatpush.bf16.msrb.mxu1 %v8415_v5  ;;  %6284 = vst [vmem:[#allocation17 + $0x10] sm:$0xff] %v5863_v22  ;;  %v5929_v42 = vpop.f32.mrf.mxu2  ;;  %v10052_v22 = vld [vmem:[#allocation14 + $0xa40] sm:$0xf0] }
 0x38f   :  { %6195 = vmatpush.bf16.msra.mxu3 %v7943_v17  ;;  %v8951_v17 = vor.u32 %v10059_v4, %v8950_v34  ;;  %v9975_v42 = vld [vmem:[#allocation14 + $0x7d8] sm:$0xf0] }
 0x390   :  { %6181 = vmatpush.bf16.msra.mxu2 %v7747_v37  ;;  %6156 = vmatpush.bf16.msra.mxu0 %v9059_v19  ;;  %v9793_v37 = vld [vmem:[#allocation14 + $0x228] sm:$0xf0]  ;;  %v8303_v19 = vor.u32 %v9894_v45, %v8300_v58  ;;  %v9308_v45 = vld [vmem:[#allocation14 + $0xd4c] sm:$0xf0]  ;;  %v9968_v58 = vld [vmem:[#allocation14 + $0x7a0] sm:$0xf0] }
 0x391   :  { %v7887_v44 = vor.u32 %v9793_v37, %v7886_v7  ;;  %v8643_v7 = vor.u32 %v9982_v9, %v8642_v28  ;;  %v10153_v37 = vld [vmem:[#allocation14 + $0xd6c] sm:$0xf]  ;;  %v10139_v4 = vld [vmem:[#allocation14 + $0xcfc] sm:$0xf]  ;;  %v9954_v28 = vld [vmem:[#allocation14 + $0x730] sm:$0xf0] }
 0x392   :  { %6117 = vmatpush.bf16.msrb.mxu1 %v8387_v39 }
 0x393   :  { %6196 = vmatpush.bf16.msra.mxu3 %v7915_v29  ;;  %v8251_v29 = vor.u32 %v9884_v49, %v8250_v20  ;;  %v9856_v20 = vld [vmem:[#allocation14 + $0x420] sm:$0xf0]  ;;  %v9252_v49 = vld [vmem:[#allocation14 + $0xcdc] sm:$0xf0] }
 0x394   :  { %6182 = vmatpush.bf16.msra.mxu2 %v7719_v24  ;;  %v9996_v24 = vld [vmem:[#allocation14 + $0x880] sm:$0xf0]  ;;  %6157 = vmatpush.bf16.msra.mxu0 %v9031_v56  ;;  %v9367_v56 = vor.u32 %v10160_v46, %v9364_v25  ;;  %v8138_v46 = vld [vmem:[#allocation14 + $0x408] sm:$0xf]  ;;  %v8530_v25 = vld [vmem:[#allocation14 + $0x718] sm:$0xf] }
 0x395   :  { %v8699_v5 = vor.u32 %v9996_v24, %v8698_v50  ;;  %v8615_v50 = vor.u32 %v9975_v42, %v8614_v41  ;;  %v10146_v24 = vld [vmem:[#allocation14 + $0xd34] sm:$0xf]  ;;  %v10125_v42 = vld [vmem:[#allocation14 + $0xc8c] sm:$0xf] }
 0x396   :  { %6118 = vmatpush.bf16.msrb.mxu1 %v8359_v26  ;;  %v8222_v26 = vld [vmem:[#allocation14 + $0x4b0] sm:$0xf]  ;;  %v9311_v63 = vor.u32 %v10146_v24, %v9308_v45  ;;  %v10010_v24 = vld [vmem:[#allocation14 + $0x8f0] sm:$0xf0]  ;;  %v8082_v45 = vld [vmem:[#allocation14 + $0x398] sm:$0xf] }
 0x397   :  { %6197 = vmatpush.bf16.msra.mxu3 %v7887_v44  ;;  %v9339_v44 = vor.u32 %v10153_v37, %v9336_v12  ;;  %v8531_v37 = vor.u32 %v9954_v28, %v8530_v25  ;;  %v9926_v25 = vld [vmem:[#allocation14 + $0x650] sm:$0xf0] }
 0x398   :  { %6183 = vmatpush.bf16.msra.mxu2 %v7691_v61  ;;  %v10167_v61 = vld [vmem:[#allocation14 + $0xddc] sm:$0xf]  ;;  %6158 = vmatpush.bf16.msra.mxu0 %v9003_v48  ;;  %v9870_v48 = vld [vmem:[#allocation14 + $0x490] sm:$0xf0] }
 0x399   :  { %v9395_v39 = vor.u32 %v10167_v61, %v9392_v59  ;;  %v8195_v60 = vor.u32 %v9870_v48, %v8194_v47  ;;  %v9863_v61 = vld [vmem:[#allocation14 + $0x458] sm:$0xf0]  ;;  %v9961_v59 = vld [vmem:[#allocation14 + $0x768] sm:$0xf0]  ;;  %v10118_v48 = vld [vmem:[#allocation14 + $0xc54] sm:$0xf] }
 0x39a   :  { %6119 = vmatpush.bf16.msrb.mxu1 %v8331_v51  ;;  %v10031_v51 = vld [vmem:[#allocation14 + $0x998] sm:$0xf0] }
 0x39b   :  { %6198 = vmatpush.bf16.msra.mxu3 %v7859_v11  ;;  %v8558_v11 = vld [vmem:[#allocation14 + $0x750] sm:$0xf] }
 0x39c   :  { %6184 = vmatpush.bf16.msra.mxu2 %v7663_v23  ;;  %v8671_v23 = vor.u32 %v9989_v31, %v8670_v13  ;;  %6159 = vmatpush.bf16.msra.mxu0 %v8975_v53  ;;  %v10777_v13 = vpop.f32.mrf.mxu0  ;;  %v8839_v31 = vor.u32 %v10031_v51, %v8838_v3  ;;  %v10779_v53 = vld [vmem:[#allocation16] sm:$0xff] }
 0x39d   :  { %v10782_v10 = vpop.f32.mrf.mxu1  ;;  %v8502_v51 = vld [vmem:[#allocation14 + $0x6e0] sm:$0xf] }
 0x39e   :  { %6120 = vmatpush.bf16.msrb.mxu1 %v8303_v19  ;;  %6199 = vmatmul.bf16.vlgmr.msra.gmra.mxu3 %v10633_v62  ;;  %v8586_v62 = vld [vmem:[#allocation14 + $0x788] sm:$0xf] }
 0x39f   :  { %6243 = vmatpush.bf16.msrb.mxu3 %v8951_v17  ;;  %6160 = vmatmul.bf16.vlgmr.msra.gmra.mxu0 %v10671_v27  ;;  %v8587_v34 = vor.u32 %v9968_v58, %v8586_v62  ;;  %v3240_v17 = vperm.slane %v10779_v53, 4  ;;  %v9842_v62 = vld [vmem:[#allocation14 + $0x3b0] sm:$0xf0]  ;;  %v9196_v58 = vld [vmem:[#allocation14 + $0xc6c] sm:$0xf0] }
 0x3a0   :  { %6185 = vmatpush.bf16.msra.mxu2 %v7635_v40  ;;  %6204 = vmatpush.bf16.msrb.mxu0 %v8279_v21  ;;  %v9877_v40 = vld [vmem:[#allocation14 + $0x4c8] sm:$0xf0]  ;;  %v8810_v21 = vld [vmem:[#allocation14 + $0x948] sm:$0xf] }
 0x3a1   :  { %6121 = vmatmul.bf16.vlgmr.msrb.gmra.mxu1 %v10647_v35  ;;  %v8223_v36 = vor.u32 %v9877_v40, %v8222_v26  ;;  %v8110_v26 = vld [vmem:[#allocation14 + $0x3d0] sm:$0xf]  ;;  %v9849_v40 = vld [vmem:[#allocation14 + $0x3e8] sm:$0xf0] }
 0x3a2   :  { %6165 = vmatpush.bf16.msra.mxu1 %v9395_v39  ;;  %v8559_v39 = vor.u32 %v9961_v59, %v8558_v11  ;;  %v9146_v11 = vld [vmem:[#allocation14 + $0xbe8] sm:$0xf]  ;;  %v10108_v59 = vld [vmem:[#allocation14 + $0xc00] sm:$0xf0] }
 0x3a3   :  { %6186 = vmatmul.bf16.vlgmr.msra.gmra.mxu2 %v10638_v16  ;;  %v8923_v16 = vor.u32 %v10052_v22, %v8922_v1  ;;  %v10024_v1 = vld [vmem:[#allocation14 + $0x960] sm:$0xf0]  ;;  %v9283_v22 = vor.u32 %v10139_v4, %v9280_v2 }
 0x3a4   :  { %6230 = vmatpush.bf16.msrb.mxu2 %v8727_v0  ;;  %v8895_v0 = vor.u32 %v10045_v33, %v8894_v30  ;;  %6205 = vmatpush.bf16.msrb.mxu0 %v8251_v29  ;;  %v8811_v9 = vor.u32 %v10024_v1, %v8810_v21  ;;  %v8139_v29 = vor.u32 %v9856_v20, %v8138_v46  ;;  %v8782_v30 = vld [vmem:[#allocation14 + $0x910] sm:$0xf]  ;;  %v10017_v33 = vld [vmem:[#allocation14 + $0x928] sm:$0xf0]  ;;  %v9090_v46 = vld [vmem:[#allocation14 + $0xb78] sm:$0xf] }
 0x3a5   :  { %6244 = vmatpush.bf16.msrb.mxu3 %v8923_v16  ;;  %v8783_v43 = vor.u32 %v10017_v33, %v8782_v30  ;;  %v5916_v54 = vpop.f32.mrf.mxu1  ;;  %v9118_v1 = vld [vmem:[#allocation14 + $0xbb0] sm:$0xf]  ;;  %v10094_v20 = vld [vmem:[#allocation14 + $0xb90] sm:$0xf0]  ;;  %v9919_v30 = vld [vmem:[#allocation14 + $0x618] sm:$0xf0] }
 0x3a6   :  { %6166 = vmatpush.bf16.msra.mxu1 %v9367_v56  ;;  %v5979_v8 = vpop.f32.mrf.mxu2  ;;  %v5992_v56 = vpop.f32.mrf.mxu3  ;;  %v9091_v28 = vor.u32 %v10094_v20, %v9090_v46  ;;  %v10136_v20 = vld [vmem:[#allocation14 + $0xce0] sm:$0xf0] }
 0x3a7   :  { %v5980_v16 = vadd.f32 %v5979_v8, %v3240_v17  ;;  %v5902_v8 = vadd.f32 %v10769_v18, %v10755_v38  ;;  %v9940_v17 = vld [vmem:[#allocation14 + $0x6c0] sm:$0xf0]  ;;  %v8446_v38 = vld [vmem:[#allocation14 + $0x670] sm:$0xf]  ;;  %v9933_v18 = vld [vmem:[#allocation14 + $0x688] sm:$0xf0] }
 0x3a8   :  { %6231 = vmatpush.bf16.msrb.mxu2 %v8699_v5  ;;  %6206 = vmatpush.bf16.msrb.mxu0 %v8223_v36  ;;  %v8166_v5 = vld [vmem:[#allocation14 + $0x440] sm:$0xf]  ;;  %v5955_v36 = vpop.f32.mrf.mxu0 }
 0x3a9   :  { %6245 = vmatpush.bf16.msrb.mxu3 %v8895_v0  ;;  %v8167_v19 = vor.u32 %v9863_v61, %v8166_v5  ;;  %v10784_v12 = vadd.f32 %v5992_v56, %v5980_v16  ;;  %v9224_v0 = vld [vmem:[#allocation14 + $0xca4] sm:$0xf0]  ;;  %v9199_v5 = vor.u32 %v10118_v48, %v9196_v58  ;;  %v10087_v16 = vld [vmem:[#allocation14 + $0xb58] sm:$0xf0] }
 0x3aa   :  { %6167 = vmatpush.bf16.msra.mxu1 %v9339_v44  ;;  %v8111_v44 = vor.u32 %v9849_v40, %v8110_v26  ;;  %v9227_v47 = vor.u32 %v10125_v42, %v9224_v0  ;;  %v9034_v40 = vld [vmem:[#allocation14 + $0xb08] sm:$0xf]  ;;  %v9912_v0 = vld [vmem:[#allocation14 + $0x5e0] sm:$0xf0] }
 0x3ab   :  { %v8362_v42 = vld [vmem:[#allocation14 + $0x5c8] sm:$0xf] }
 0x3ac   :  { %6232 = vmatpush.bf16.msrb.mxu2 %v8671_v23  ;;  %6207 = vmatpush.bf16.msrb.mxu0 %v8195_v60  ;;  %v10132_v23 = vld [vmem:[#allocation14 + $0xcc4] sm:$0xf]  ;;  %v10115_v60 = vld [vmem:[#allocation14 + $0xc38] sm:$0xf0]  ;;  %v8363_v54 = vor.u32 %v9912_v0, %v8362_v42 }
 0x3ad   :  { %6246 = vmatpush.bf16.msrb.mxu3 %v8867_v32  ;;  %v9174_v32 = vld [vmem:[#allocation14 + $0xc20] sm:$0xf] }
 0x3ae   :  { %6168 = vmatpush.bf16.msra.mxu1 %v9311_v63  ;;  %v5981_v41 = vpop.f32.mrf.mxu2  ;;  %v9947_v63 = vld [vmem:[#allocation14 + $0x6f8] sm:$0xf0]  ;;  %v5994_v4 = vpop.f32.mrf.mxu3  ;;  %v9175_v61 = vor.u32 %v10115_v60, %v9174_v32  ;;  %v8978_v32 = vld [vmem:[#allocation14 + $0xa98] sm:$0xf]  ;;  %v10066_v60 = vld [vmem:[#allocation14 + $0xab0] sm:$0xf0] }
 0x3af   :  { %v8503_v2 = vor.u32 %v9947_v63, %v8502_v51  ;;  %v10080_v41 = vld [vmem:[#allocation14 + $0xb20] sm:$0xf0]  ;;  %v9898_v51 = vld [vmem:[#allocation14 + $0x570] sm:$0xf0]  ;;  %v9398_v63 = vld [vmem:[#allocation14 + $0xde0] sm:$0xf]  ;;  %v8979_v4 = vor.u32 %v10066_v60, %v8978_v32 }
 0x3b0   :  { %6233 = vmatpush.bf16.msrb.mxu2 %v8643_v7  ;;  %6208 = vmatpush.bf16.msrb.mxu0 %v8167_v19  ;;  %v9255_v7 = vor.u32 %v10132_v23, %v9252_v49  ;;  %v5915_v19 = vadd.f32 %v10782_v10, %v5902_v8  ;;  %v8447_v23 = vor.u32 %v9933_v18, %v8446_v38  ;;  %v8418_v49 = vld [vmem:[#allocation14 + $0x638] sm:$0xf]  ;;  %v9286_v38 = vld [vmem:[#allocation14 + $0xd00] sm:$0xf]  ;;  %v10143_v18 = vld [vmem:[#allocation14 + $0xd18] sm:$0xf0] }
 0x3b1   :  { %6247 = vmatpush.bf16.msrb.mxu3 %v8839_v31  ;;  %v8474_v31 = vld [vmem:[#allocation14 + $0x6a8] sm:$0xf]  ;;  %v9035_v36 = vor.u32 %v10080_v41, %v9034_v40  ;;  %v9287_v46 = vor.u32 %v10143_v18, %v9286_v38 }
 0x3b2   :  { %6169 = vmatpush.bf16.msra.mxu1 %v9283_v22  ;;  %v8475_v21 = vor.u32 %v9940_v17, %v8474_v31  ;;  %v10101_v22 = vld [vmem:[#allocation14 + $0xbc8] sm:$0xf0]  ;;  %v9342_v31 = vld [vmem:[#allocation14 + $0xd70] sm:$0xf] }
 0x3b3   :  { %v9119_v10 = vor.u32 %v10101_v22, %v9118_v1  ;;  %v10157_v17 = vld [vmem:[#allocation14 + $0xd88] sm:$0xf0] }
 0x3b4   :  { %6234 = vmatpush.bf16.msrb.mxu2 %v8615_v50  ;;  %6209 = vmatpush.bf16.msrb.mxu0 %v8139_v29  ;;  %v8754_v50 = vld [vmem:[#allocation14 + $0x8d8] sm:$0xf] }
 0x3b5   :  { %6248 = vmatpush.bf16.msrb.mxu3 %v8811_v9  ;;  %v8755_v3 = vor.u32 %v10010_v24, %v8754_v50  ;;  %v9062_v9 = vld [vmem:[#allocation14 + $0xb40] sm:$0xf]  ;;  %v8334_v24 = vld [vmem:[#allocation14 + $0x590] sm:$0xf] }
 0x3b6   :  { %6170 = vmatpush.bf16.msra.mxu1 %v9255_v7 }
 0x3b8   :  { %6235 = vmatpush.bf16.msrb.mxu2 %v8587_v34  ;;  %6210 = vmatpush.bf16.msrb.mxu0 %v8111_v44  ;;  %v8083_v34 = vor.u32 %v9842_v62, %v8082_v45  ;;  %v10073_v44 = vld [vmem:[#allocation14 + $0xae8] sm:$0xf0] }
 0x3b9   :  { %6249 = vmatpush.bf16.msrb.mxu3 %v8783_v43 }
 0x3ba   :  { %6171 = vmatpush.bf16.msra.mxu1 %v9227_v47  ;;  %v9905_v47 = vld [vmem:[#allocation14 + $0x5a8] sm:$0xf0] }
 0x3bb   :  { %v10798_v56 = vpop.f32.mrf.mxu0  ;;  %v8335_v58 = vor.u32 %v9905_v47, %v8334_v24 }
 0x3bc   :  { %6236 = vmatpush.bf16.msrb.mxu2 %v8559_v39  ;;  %6211 = vmatpush.bf16.msrb.mxu0 %v8083_v34  ;;  %v5928_v39 = vadd.f32 %v10766_v52, %v5915_v19  ;;  %v8390_v52 = vld [vmem:[#allocation14 + $0x600] sm:$0xf]  ;;  %v10171_v34 = vld [vmem:[#allocation14 + $0xdf8] sm:$0xf0]  ;;  %v9343_v19 = vor.u32 %v10157_v17, %v9342_v31 }
 0x3bd   :  { %6250 = vmatpush.bf16.msrb.mxu3 %v8755_v3  ;;  %v8306_v3 = vld [vmem:[#allocation14 + $0x558] sm:$0xf]  ;;  %v9399_v8 = vor.u32 %v10171_v34, %v9398_v63 }
 0x3be   :  { %6172 = vmatpush.bf16.msra.mxu1 %v9199_v5  ;;  %v5966_v7 = vpop.f32.mrf.mxu1 }
 0x3bf   :  { %6212 = vmatmul.bf16.vlgmr.msrb.gmra.mxu0 %v10651_v15  ;;  %v8419_v15 = vor.u32 %v9926_v25, %v8418_v49 }
 0x3c0   :  { %6237 = vmatpush.bf16.msrb.mxu2 %v8531_v37  ;;  %6256 = vmatpush.bf16.msra.mxu0 %v9175_v61  ;;  %v9063_v37 = vor.u32 %v10087_v16, %v9062_v9  ;;  %v8307_v61 = vor.u32 %v9898_v51, %v8306_v3  ;;  %v10129_v9 = vld [vmem:[#allocation14 + $0xca8] sm:$0xf0] }
 0x3c1   :  { %6251 = vmatmul.bf16.vlgmr.msrb.gmra.mxu3 %v10665_v55  ;;  %6173 = vmatmul.bf16.vlgmr.msra.gmra.mxu1 %v10678_v14  ;;  %v5941_v55 = vadd.f32 %v10771_v57, %v5928_v39  ;;  %v8391_v57 = vor.u32 %v9919_v30, %v8390_v52  ;;  %v10800_v43 = vpop.f32.mrf.mxu3 }
 0x3c2   :  { %6217 = vmatpush.bf16.msrb.mxu1 %v8503_v2  ;;  %v9370_v2 = vld [vmem:[#allocation14 + $0xda8] sm:$0xf] }
 0x3c3   :  { %6238 = vmatmul.bf16.vlgmr.msrb.gmra.mxu2 %v10655_v6  ;;  %v9147_v6 = vor.u32 %v10108_v59, %v9146_v11  ;;  %v5954_v33 = vadd.f32 %v10777_v13, %v5941_v55  ;;  %v9006_v13 = vld [vmem:[#allocation14 + $0xad0] sm:$0xf]  ;;  %v6007_v48 = vpop.f32.mrf.mxu0  ;;  %v10164_v11 = vld [vmem:[#allocation14 + $0xdc0] sm:$0xf0] }
 0x3c4   :  { %v9007_v62 = vor.u32 %v10073_v44, %v9006_v13  ;;  %v9371_v59 = vor.u32 %v10164_v11, %v9370_v2 }
 0x3c5   :  { %6257 = vmatpush.bf16.msra.mxu0 %v9147_v6  ;;  %v5967_v26 = vadd.f32 %v5966_v7, %v5954_v33  ;;  %v9314_v6 = vld [vmem:[#allocation14 + $0xd38] sm:$0xf]  ;;  %v10122_v7 = vld [vmem:[#allocation14 + $0xc70] sm:$0xf0] }
 0x3c6   :  { %6218 = vmatpush.bf16.msrb.mxu1 %v8475_v21  ;;  %v10795_v29 = vpop.f32.mrf.mxu2  ;;  %v5968_v45 = vpop.f32.mrf.mxu1  ;;  %v10150_v21 = vld [vmem:[#allocation14 + $0xd50] sm:$0xf0]  ;;  %v9202_v33 = vld [vmem:[#allocation14 + $0xc58] sm:$0xf] }
 0x3c7   :  { %6285 = vst [vmem:[#allocation17 + $0x18] sm:$0xff] %v5967_v26  ;;  %v9315_v1 = vor.u32 %v10150_v21, %v9314_v6  ;;  %v9203_v26 = vor.u32 %v10122_v7, %v9202_v33 }
 0x3c9   :  { %6258 = vmatpush.bf16.msra.mxu0 %v9119_v10  ;;  %v6046_v5 = vpop.f32.mrf.mxu3  ;;  %v3241_v10 = vperm.slane %v10779_v53, 5 }
 0x3ca   :  { %6219 = vmatpush.bf16.msrb.mxu1 %v8447_v23 }
 0x3cd   :  { %6259 = vmatpush.bf16.msra.mxu0 %v9091_v28 }
 0x3ce   :  { %6220 = vmatpush.bf16.msrb.mxu1 %v8419_v15  ;;  %v6033_v50 = vpop.f32.mrf.mxu2  ;;  %v9230_v15 = vld [vmem:[#allocation14 + $0xc90] sm:$0xf] }
 0x3cf   :  { %v9231_v30 = vor.u32 %v10129_v9, %v9230_v15 }
 0x3d1   :  { %6260 = vmatpush.bf16.msra.mxu0 %v9063_v37 }
 0x3d2   :  { %6221 = vmatpush.bf16.msrb.mxu1 %v8391_v57  ;;  %v6006_v57 = vadd.f32 %v10798_v56, %v10784_v12 }
 0x3d5   :  { %6261 = vmatpush.bf16.msra.mxu0 %v9035_v36 }
 0x3d6   :  { %6222 = vmatpush.bf16.msrb.mxu1 %v8363_v54 }
 0x3d9   :  { %6262 = vmatpush.bf16.msra.mxu0 %v9007_v62  ;;  %v3242_v62 = vperm.slane %v10779_v53, 6 }
 0x3da   :  { %6223 = vmatpush.bf16.msrb.mxu1 %v8335_v58 }
 0x3dc   :  { %v6057_v39 = vpop.f32.mrf.mxu0 }
 0x3dd   :  { %6263 = vmatpush.bf16.msra.mxu0 %v8979_v4 }
 0x3de   :  { %6224 = vmatpush.bf16.msrb.mxu1 %v8307_v61 }
 0x3df   :  { %v6018_v23 = vpop.f32.mrf.mxu1 }
 0x3e0   :  { %6264 = vmatmul.bf16.vlgmr.msra.gmra.mxu0 %v10671_v27  ;;  %v9258_v27 = vld [vmem:[#allocation14 + $0xcc8] sm:$0xf]  ;;  %v6019_v40 = vadd.f32 %v6018_v23, %v6006_v57 }
 0x3e1   :  { %6225 = vmatmul.bf16.vlgmr.msrb.gmra.mxu1 %v10647_v35  ;;  %v6096_v35 = vpop.f32.mrf.mxu3  ;;  %v9259_v25 = vor.u32 %v10136_v20, %v9258_v27 }
 0x3e2   :  { %6269 = vmatpush.bf16.msra.mxu1 %v9399_v8  ;;  %v6032_v41 = vadd.f32 %v10795_v29, %v6019_v40 }
 0x3e4   :  { %v6059_v16 = vpop.f32.mrf.mxu0  ;;  %v6045_v42 = vadd.f32 %v10800_v43, %v6032_v41 }
 0x3e6   :  { %6270 = vmatpush.bf16.msra.mxu1 %v9371_v59  ;;  %v6083_v22 = vpop.f32.mrf.mxu2  ;;  %v6058_v36 = vadd.f32 %v6057_v39, %v6045_v42 }
 0x3e7   :  { %v6084_v49 = vadd.f32 %v6083_v22, %v3241_v10  ;;  %v6020_v52 = vpop.f32.mrf.mxu1 }
 0x3e9   :  { %v6097_v55 = vadd.f32 %v6096_v35, %v6084_v49  ;;  %v6098_v37 = vpop.f32.mrf.mxu3 }
 0x3ea   :  { %6271 = vmatpush.bf16.msra.mxu1 %v9343_v19 }
 0x3ee   :  { %6272 = vmatpush.bf16.msra.mxu1 %v9315_v1  ;;  %v6085_v28 = vpop.f32.mrf.mxu2 }
 0x3f2   :  { %6273 = vmatpush.bf16.msra.mxu1 %v9287_v46 }
 0x3f6   :  { %6274 = vmatpush.bf16.msra.mxu1 %v9259_v25 }
 0x3fa   :  { %6275 = vmatpush.bf16.msra.mxu1 %v9231_v30 }
 0x3fc   :  { %v6109_v54 = vpop.f32.mrf.mxu0 }
 0x3fd   :  { %v6110_v63 = vadd.f32 %v6109_v54, %v6097_v55 }
 0x3fe   :  { %6276 = vmatpush.bf16.msra.mxu1 %v9203_v26  ;;  %v6070_v13 = vpop.f32.mrf.mxu1 }
 0x3ff   :  { %v6071_v44 = vadd.f32 %v6070_v13, %v6058_v36 }
 0x401   :  { %6277 = vmatmul.bf16.vlgmr.msra.gmra.mxu1 %v10678_v14  ;;  %6286 = vst [vmem:[#allocation17 + $0x20] sm:$0xff] %v6071_v44  ;;  %v6148_v50 = vpop.f32.mrf.mxu3 }
 0x404   :  { %v6111_v47 = vpop.f32.mrf.mxu0 }
 0x406   :  { %v6135_v0 = vpop.f32.mrf.mxu2  ;;  %v6072_v48 = vpop.f32.mrf.mxu1 }
 0x409   :  { %v6150_v45 = vpop.f32.mrf.mxu3 }
 0x40e   :  { %v6137_v24 = vpop.f32.mrf.mxu2 }
 0x41c   :  { %v6161_v56 = vpop.f32.mrf.mxu0 }
 0x41e   :  { %v6122_v29 = vpop.f32.mrf.mxu1 }
 0x41f   :  { %v6123_v34 = vadd.f32 %v6122_v29, %v6110_v63 }
 0x421   :  { %v6200_v14 = vpop.f32.mrf.mxu3  ;;  %v6136_v4 = vadd.f32 %v6135_v0, %v6123_v34 }
 0x423   :  { %v6149_v5 = vadd.f32 %v6148_v50, %v6136_v4 }
 0x424   :  { %v6163_v60 = vpop.f32.mrf.mxu0 }
 0x425   :  { %v6162_v8 = vadd.f32 %v6161_v56, %v6149_v5 }
 0x426   :  { %v6187_v12 = vpop.f32.mrf.mxu2  ;;  %v6124_v3 = vpop.f32.mrf.mxu1 }
 0x427   :  { %v6188_v58 = vadd.f32 %v6187_v12, %v3242_v62 }
 0x429   :  { %v6201_v32 = vadd.f32 %v6200_v14, %v6188_v58  ;;  %v6202_v51 = vpop.f32.mrf.mxu3 }
 0x42e   :  { %v6189_v43 = vpop.f32.mrf.mxu2 }
 0x43c   :  { %v6213_v2 = vpop.f32.mrf.mxu0 }
 0x43d   :  { %v6214_v18 = vadd.f32 %v6213_v2, %v6201_v32 }
 0x43e   :  { %v6174_v11 = vpop.f32.mrf.mxu1 }
 0x43f   :  { %v6175_v59 = vadd.f32 %v6174_v11, %v6162_v8 }
 0x441   :  { %6287 = vst [vmem:[#allocation17 + $0x28] sm:$0xff] %v6175_v59 }
 0x444   :  { %v6252_v31 = vpop.f32.mrf.mxu3  ;;  %v6215_v17 = vpop.f32.mrf.mxu0 }
 0x446   :  { %v6239_v61 = vpop.f32.mrf.mxu2  ;;  %v6176_v19 = vpop.f32.mrf.mxu1 }
 0x44c   :  { %v6254_v6 = vpop.f32.mrf.mxu3 }
 0x44e   :  { %v6241_v53 = vpop.f32.mrf.mxu2 }
 0x45d   :  { %v6265_v21 = vpop.f32.mrf.mxu0 }
 0x45e   :  { %v6226_v1 = vpop.f32.mrf.mxu1 }
 0x45f   :  { %v6227_v39 = vadd.f32 %v6226_v1, %v6214_v18 }
 0x461   :  { %v6240_v10 = vadd.f32 %v6239_v61, %v6227_v39 }
 0x463   :  { %v6253_v23 = vadd.f32 %v6252_v31, %v6240_v10 }
 0x465   :  { %v6267_v22 = vpop.f32.mrf.mxu0  ;;  %v6266_v46 = vadd.f32 %v6265_v21, %v6253_v23 }
 0x466   :  { %v6228_v38 = vpop.f32.mrf.mxu1 }
 0x47e   :  { %v6278_v27 = vpop.f32.mrf.mxu1 }
 0x47f   :  { %v6279_v20 = vadd.f32 %v6278_v27, %v6266_v46 }
 0x481   :  { %6288 = vst [vmem:[#allocation17 + $0x30] sm:$0xff] %v6279_v20 }
 0x482   :  { %6299 = dma.vmem_to_hbm [thread:$0]  %s6295_s8, 896, %s6297_s13, [#allocation4]  }
 0x486   :  { %v6280_v49 = vpop.f32.mrf.mxu1 }
 0x487   :  { %10443 = dma.done.wait [#allocation4], 896  }
 0x488   :  { %10444 = vsyncadd [#allocation4], 4294966400 }
 0x489   :  { %6304 = vsyncpa [#allocation3], 1 }
 0x48a   :  { %6305 = vsyncpa [#allocation6], 1 }
 0x48b   :  { %6306 = vsyncpa [#allocation9], 1 }
 0x48c   :  { %6307 = vsyncpa [#allocation12], 1 }
 0x48d   :  { %6308 = vsyncpa [#allocation15], 1 }
 0x48e   :  { %6309 = vsyncpa [#allocation4], 1 }

</bundles_post_ra>
